<compile_context>
chip_gen: v7x
topology: tpu7x:2x2x1
jax: 0.10.0
libtpu: 0.0.40
codegen_flags: <defaults>
</compile_context>

<pallas_src>
import functools

import jax
import jax.numpy as jnp
from jax import lax
from jax.experimental import pallas as pl
from jax.experimental.pallas import tpu as pltpu


def _round_up(x, m):
    return (x + m - 1) // m * m


# --------------------------------- kernel ------------------------------------

def _network_kernel(r_ref, w_ref, b_ref, m_ref, o_ref, *,
                    blocks, w_pad, halo, c_out_final):
    """Whole SelfCalibratedNetwork forward for one image.

    r_ref : (1, Cp, L)      zero-padded input image, flat spatial, channel-padded
    w_ref : (4, 9, Cp, Cp)  folded per-tap weights [in_conv, blk1, blk2, out_conv]
    b_ref : (4, Cp, 1)      folded biases
    m_ref : (1, L)          1.0 at valid interior pixels, 0.0 at pad/border/tail
    o_ref : (1, Cout, L)    delta = r - sigmoid(out_conv(fea))
    """
    cp = r_ref.shape[1]
    L = r_ref.shape[2]

    x0 = r_ref[0]                                   # (Cp, L) f32, stays in VMEM
    mask = m_ref[...]                               # (1, L)
    zhalo = jnp.zeros((cp, halo), jnp.float32)

    # 3x3 tap offsets in the flat (row-major, padded-width) spatial layout.
    taps = [(kh - 1) * w_pad + (kw - 1) for kh in range(3) for kw in range(3)]

    def conv3x3(x, stage):
        # In-kernel "im2col": halo-extend x with zeros (all slices stay in
        # bounds; out-of-image reads hit zeros and invalid outputs are masked),
        # then accumulate one small MXU matmul per tap.
        xh = jnp.concatenate([zhalo, x, zhalo], axis=1)      # (Cp, L + 2*halo)
        acc = jnp.zeros((cp, L), jnp.float32)
        for t, d in enumerate(taps):
            xt = xh[:, halo + d: halo + d + L]               # (Cp, L) static slice
            acc = acc + jnp.dot(w_ref[stage, t], xt,
                                preferred_element_type=jnp.float32)
        return acc + b_ref[stage]                            # folded bias (BN)

    relu = lambda v: jnp.maximum(v, 0.0)

    # in_conv (+ folded BN) + ReLU
    fea = relu(conv3x3(x0, 0)) * mask
    # blocks: fea = fea + conv(fea)   (one shared conv module across blocks)
    for _ in range(blocks):
        mid = relu(conv3x3(fea, 1)) * mask
        fea = fea + relu(conv3x3(mid, 2)) * mask
    # out_conv + sigmoid, fused with  delta = r - out
    y = conv3x3(fea, 3)
    sig = 1.0 / (1.0 + jnp.exp(-y))
    o_ref[0] = (x0[:c_out_final] - sig[:c_out_final]).astype(o_ref.dtype)


# ------------------------------- forward pass --------------------------------

def self_calibrated_forward(r, params, blocks):
    """Pallas forward of SelfCalibratedNetwork.forward(r), r in NCHW."""
    B, c_in, H, W = r.shape
    channels = params["blk_conv1"][0].shape[0]
    cp = _round_up(max(channels, c_in), 8)        # channel pad for sublane/MXU
    hp, wp = H + 2, W + 2
    S = hp * wp
    L = _round_up(S, 128)                         # lane-dense flat spatial length
    halo = _round_up(wp + 1, 128)                 # covers max |tap shift| = wp+1

    # ---- one-time layout plumbing: NCHW -> (B, Cp, L) with pad=1 built in ----
    r_flat = jnp.pad(r.astype(jnp.float32),
                     ((0, 0), (0, cp - c_in), (1, 1), (1, 1)))
    r_flat = r_flat.reshape(B, cp, S)
    r_flat = jnp.pad(r_flat, ((0, 0), (0, 0), (0, L - S)))

    # Interior-pixel mask: 1 at rows 1..H, cols 1..W of the padded grid.
    rows = jnp.arange(hp)
    cols = jnp.arange(wp)
    interior = (((rows >= 1) & (rows <= H))[:, None]
                & ((cols >= 1) & (cols <= W))[None, :])
    mask = jnp.pad(interior.reshape(1, S).astype(jnp.float32),
                   ((0, 0), (0, L - S)))

    # ---- fold BN into conv weights/biases, per-tap layout, channel pad ------
    def fold(w, b, bn):
        if bn is None:
            bias = b
        else:
            gamma, beta, mean, var = bn
            scale = gamma * lax.rsqrt(var + 1e-5)
            bias = scale * (b - mean) + beta
            w = w * scale[:, None, None, None]     # scale folded into weights
        cout, cin = w.shape[:2]
        wt = jnp.transpose(w, (2, 3, 0, 1)).reshape(9, cout, cin)
        wt = jnp.pad(wt, ((0, 0), (0, cp - cout), (0, cp - cin)))
        bp = jnp.pad(bias, (0, cp - cout)).reshape(cp, 1)
        return wt, bp

    stages = [fold(*params["in_conv"]), fold(*params["blk_conv1"]),
              fold(*params["blk_conv2"]), fold(*params["out_conv"])]
    w_all = jnp.stack([s[0] for s in stages]).astype(jnp.float32)  # (4,9,Cp,Cp)
    b_all = jnp.stack([s[1] for s in stages]).astype(jnp.float32)  # (4,Cp,1)

    c_out_final = params["out_conv"][0].shape[0]

    kernel = functools.partial(_network_kernel, blocks=blocks, w_pad=wp,
                               halo=halo, c_out_final=c_out_final)

    delta_flat = pl.pallas_call(
        kernel,
        out_shape=jax.ShapeDtypeStruct((B, c_out_final, L), jnp.float32),
        grid_spec=pl.GridSpec(
            grid=(B,),                                           # >= 2 steps (v7x)
            in_specs=[
                pl.BlockSpec((1, cp, L), lambda b: (b, 0, 0)),        # r image
                pl.BlockSpec((4, 9, cp, cp), lambda b: (0, 0, 0, 0)),  # weights
                pl.BlockSpec((4, cp, 1), lambda b: (0, 0, 0)),         # biases
                pl.BlockSpec((1, L), lambda b: (0, 0)),                # mask
            ],
            out_specs=pl.BlockSpec((1, c_out_final, L), lambda b: (b, 0, 0)),
        ),
        compiler_params=pltpu.CompilerParams(
            dimension_semantics=("parallel",),
            vmem_limit_bytes=32 * 1024 * 1024,
        ),
    )(r_flat, w_all, b_all, mask)

    # ---- one-time inverse plumbing: (B, Cout, L) -> NCHW interior -----------
    delta = delta_flat[:, :, :S].reshape(B, c_out_final, hp, wp)
    return delta[:, :, 1:H + 1, 1:W + 1]


# ----------------------------- pure-JAX reference ----------------------------

def _conv3x3_ref(x, w, b):
    y = lax.conv_general_dilated(x, w, (1, 1), ((1, 1), (1, 1)),
                                 dimension_numbers=("NCHW", "OIHW", "NCHW"))
    return y + b[None, :, None, None]


def _bn_ref(x, bn, eps=1e-5):
    gamma, beta, mean, var = bn
    s = gamma * lax.rsqrt(var + eps)
    return (x - mean[None, :, None, None]) * s[None, :, None, None] \
        + beta[None, :, None, None]


def ref_forward(r, params, blocks):
    def cba(x, w, b, bn, act):
        y = _conv3x3_ref(x, w, b)
        if bn is not None:
            y = _bn_ref(y, bn)
        return act(y)

    relu = lambda v: jnp.maximum(v, 0.0)
    sigmoid = lambda v: 1.0 / (1.0 + jnp.exp(-v))
    fea = cba(r, *params["in_conv"], relu)
    for _ in range(blocks):
        mid = cba(fea, *params["blk_conv1"], relu)
        fea = fea + cba(mid, *params["blk_conv2"], relu)
    fea = cba(fea, *params["out_conv"], sigmoid)
    return r - fea


# ------------------------------ parameter init -------------------------------

def init_params(key, channels):
    keys = jax.random.split(key, 8)

    def conv(k, cout, cin, std=0.2):
        kw, kb = jax.random.split(k)
        w = std * jax.random.normal(kw, (cout, cin, 3, 3), jnp.float32)
        b = 0.1 * jax.random.normal(kb, (cout,), jnp.float32)
        return w, b

    def bn(k, c):
        k1, k2, k3, k4 = jax.random.split(k, 4)
        gamma = 1.0 + 0.1 * jax.random.normal(k1, (c,), jnp.float32)
        beta = 0.1 * jax.random.normal(k2, (c,), jnp.float32)
        mean = 0.1 * jax.random.normal(k3, (c,), jnp.float32)
        var = 0.5 + jnp.abs(jax.random.normal(k4, (c,), jnp.float32))
        return gamma, beta, mean, var

    w_in, b_in = conv(keys[0], channels, 3)
    w1, b1 = conv(keys[2], channels, channels)
    w2, b2 = conv(keys[4], channels, channels)
    w_out, b_out = conv(keys[6], 3, channels)
    return {
        "in_conv": (w_in, b_in, bn(keys[1], channels)),
        "blk_conv1": (w1, b1, bn(keys[3], channels)),
        "blk_conv2": (w2, b2, bn(keys[5], channels)),
        "out_conv": (w_out, b_out, None),
    }


# ------------------------------------ main ------------------------------------

if __name__ == "__main__":
    blocks, channels = 2, 4
    key = jax.random.PRNGKey(0)
    kx, kp = jax.random.split(key)

    # forward(r): r is the NCHW image the module subtracts its output from.
    r = jax.random.normal(kx, (2, 3, 16, 16), dtype=jnp.float32)
    params = init_params(kp, channels)

    fwd = jax.jit(functools.partial(self_calibrated_forward, blocks=blocks))
    delta = fwd(r, params)
    jax.block_until_ready(delta)

    delta_ref = ref_forward(r, params, blocks)
    assert delta.shape == r.shape
    assert jnp.allclose(delta, delta_ref, atol=1e-4, rtol=1e-4), (
        "mismatch vs pure-JAX reference: max abs err "
        f"{jnp.max(jnp.abs(delta - delta_ref)):.3e}")

    print("KERNEL_OK")
</pallas_src>

<mosaic_0001>
module attributes {stable_mosaic.version = 11 : i64} {
  func.func @_network_kernel(%arg0: i32, %arg1: memref<1x8x384xf32, #tpu.memory_space<vmem>>, %arg2: memref<4x9x8x8xf32, #tpu.memory_space<vmem>>, %arg3: memref<4x8x1xf32, #tpu.memory_space<vmem>>, %arg4: memref<1x384xf32, #tpu.memory_space<vmem>>, %arg5: memref<1x3x384xf32, #tpu.memory_space<vmem>>) attributes {dimension_semantics = [#tpu.dimension_semantics<parallel>], iteration_bounds = array<i64: 2>, scalar_prefetch = 0 : i64, scratch_operands = 0 : i64, tpu.core_type = #tpu.core_type<tc>, window_params = [{transform_indices = @transform_0, window_bounds = array<i64: 1, 8, 384>}, {pipeline_mode = #tpu.pipeline_mode<synchronous>, transform_indices = @transform_1, window_bounds = array<i64: 4, 9, 8, 8>}, {pipeline_mode = #tpu.pipeline_mode<synchronous>, transform_indices = @transform_2, window_bounds = array<i64: 4, 8, 1>}, {pipeline_mode = #tpu.pipeline_mode<synchronous>, transform_indices = @transform_3, window_bounds = array<i64: 1, 384>}, {transform_indices = @transform_4, window_bounds = array<i64: 1, 3, 384>}]} {
    %c0 = arith.constant 0 : index
    %c0_0 = arith.constant 0 : index
    %c0_1 = arith.constant 0 : index
    %0 = vector.load %arg1[%c0, %c0_0, %c0_1] : memref<1x8x384xf32, #tpu.memory_space<vmem>>, vector<1x8x384xf32>
    %1 = vector.shape_cast %0 : vector<1x8x384xf32> to vector<8x384xf32>
    %c0_2 = arith.constant 0 : index
    %c0_3 = arith.constant 0 : index
    %2 = vector.load %arg4[%c0_2, %c0_3] : memref<1x384xf32, #tpu.memory_space<vmem>>, vector<1x384xf32>
    %cst = arith.constant 0.000000e+00 : f32
    %3 = vector.broadcast %cst : f32 to vector<8x128xf32>
    %4 = tpu.concatenate %3, %1, %3 in 1 : vector<8x128xf32>, vector<8x384xf32>, vector<8x128xf32> -> vector<8x640xf32>
    %cst_4 = arith.constant 0.000000e+00 : f32
    %5 = vector.broadcast %cst_4 : f32 to vector<8x384xf32>
    %6 = vector.extract_strided_slice %4 {offsets = [0, 109], sizes = [8, 384], strides = [1, 1]} : vector<8x640xf32> to vector<8x384xf32>
    %c0_5 = arith.constant 0 : index
    %c0_6 = arith.constant 0 : index
    %c0_7 = arith.constant 0 : index
    %c0_8 = arith.constant 0 : index
    %7 = vector.load %arg2[%c0_5, %c0_6, %c0_7, %c0_8] : memref<4x9x8x8xf32, #tpu.memory_space<vmem>>, vector<1x1x8x8xf32>
    %8 = vector.shape_cast %7 : vector<1x1x8x8xf32> to vector<8x8xf32>
    %cst_9 = arith.constant dense<0.000000e+00> : vector<8x384xf32>
    %9 = tpu.matmul %8, %6, %cst_9 {dimension_numbers = #tpu.dot_dimension_numbers<[1], [0], [0], [1], [0, 0, 1, 1], [], []>} : vector<8x8xf32>, vector<8x384xf32>, vector<8x384xf32> -> vector<8x384xf32>
    %10 = arith.addf %5, %9 : vector<8x384xf32>
    %11 = vector.extract_strided_slice %4 {offsets = [0, 110], sizes = [8, 384], strides = [1, 1]} : vector<8x640xf32> to vector<8x384xf32>
    %c0_10 = arith.constant 0 : index
    %c1 = arith.constant 1 : index
    %c0_11 = arith.constant 0 : index
    %c0_12 = arith.constant 0 : index
    %12 = vector.load %arg2[%c0_10, %c1, %c0_11, %c0_12] : memref<4x9x8x8xf32, #tpu.memory_space<vmem>>, vector<1x1x8x8xf32>
    %13 = vector.shape_cast %12 : vector<1x1x8x8xf32> to vector<8x8xf32>
    %cst_13 = arith.constant dense<0.000000e+00> : vector<8x384xf32>
    %14 = tpu.matmul %13, %11, %cst_13 {dimension_numbers = #tpu.dot_dimension_numbers<[1], [0], [0], [1], [0, 0, 1, 1], [], []>} : vector<8x8xf32>, vector<8x384xf32>, vector<8x384xf32> -> vector<8x384xf32>
    %15 = arith.addf %10, %14 : vector<8x384xf32>
    %16 = vector.extract_strided_slice %4 {offsets = [0, 111], sizes = [8, 384], strides = [1, 1]} : vector<8x640xf32> to vector<8x384xf32>
    %c0_14 = arith.constant 0 : index
    %c2 = arith.constant 2 : index
    %c0_15 = arith.constant 0 : index
    %c0_16 = arith.constant 0 : index
    %17 = vector.load %arg2[%c0_14, %c2, %c0_15, %c0_16] : memref<4x9x8x8xf32, #tpu.memory_space<vmem>>, vector<1x1x8x8xf32>
    %18 = vector.shape_cast %17 : vector<1x1x8x8xf32> to vector<8x8xf32>
    %cst_17 = arith.constant dense<0.000000e+00> : vector<8x384xf32>
    %19 = tpu.matmul %18, %16, %cst_17 {dimension_numbers = #tpu.dot_dimension_numbers<[1], [0], [0], [1], [0, 0, 1, 1], [], []>} : vector<8x8xf32>, vector<8x384xf32>, vector<8x384xf32> -> vector<8x384xf32>
    %20 = arith.addf %15, %19 : vector<8x384xf32>
    %21 = vector.extract_strided_slice %4 {offsets = [0, 127], sizes = [8, 384], strides = [1, 1]} : vector<8x640xf32> to vector<8x384xf32>
    %c0_18 = arith.constant 0 : index
    %c3 = arith.constant 3 : index
    %c0_19 = arith.constant 0 : index
    %c0_20 = arith.constant 0 : index
    %22 = vector.load %arg2[%c0_18, %c3, %c0_19, %c0_20] : memref<4x9x8x8xf32, #tpu.memory_space<vmem>>, vector<1x1x8x8xf32>
    %23 = vector.shape_cast %22 : vector<1x1x8x8xf32> to vector<8x8xf32>
    %cst_21 = arith.constant dense<0.000000e+00> : vector<8x384xf32>
    %24 = tpu.matmul %23, %21, %cst_21 {dimension_numbers = #tpu.dot_dimension_numbers<[1], [0], [0], [1], [0, 0, 1, 1], [], []>} : vector<8x8xf32>, vector<8x384xf32>, vector<8x384xf32> -> vector<8x384xf32>
    %25 = arith.addf %20, %24 : vector<8x384xf32>
    %26 = vector.extract_strided_slice %4 {offsets = [0, 128], sizes = [8, 384], strides = [1, 1]} : vector<8x640xf32> to vector<8x384xf32>
    %c0_22 = arith.constant 0 : index
    %c4 = arith.constant 4 : index
    %c0_23 = arith.constant 0 : index
    %c0_24 = arith.constant 0 : index
    %27 = vector.load %arg2[%c0_22, %c4, %c0_23, %c0_24] : memref<4x9x8x8xf32, #tpu.memory_space<vmem>>, vector<1x1x8x8xf32>
    %28 = vector.shape_cast %27 : vector<1x1x8x8xf32> to vector<8x8xf32>
    %cst_25 = arith.constant dense<0.000000e+00> : vector<8x384xf32>
    %29 = tpu.matmul %28, %26, %cst_25 {dimension_numbers = #tpu.dot_dimension_numbers<[1], [0], [0], [1], [0, 0, 1, 1], [], []>} : vector<8x8xf32>, vector<8x384xf32>, vector<8x384xf32> -> vector<8x384xf32>
    %30 = arith.addf %25, %29 : vector<8x384xf32>
    %31 = vector.extract_strided_slice %4 {offsets = [0, 129], sizes = [8, 384], strides = [1, 1]} : vector<8x640xf32> to vector<8x384xf32>
    %c0_26 = arith.constant 0 : index
    %c5 = arith.constant 5 : index
    %c0_27 = arith.constant 0 : index
    %c0_28 = arith.constant 0 : index
    %32 = vector.load %arg2[%c0_26, %c5, %c0_27, %c0_28] : memref<4x9x8x8xf32, #tpu.memory_space<vmem>>, vector<1x1x8x8xf32>
    %33 = vector.shape_cast %32 : vector<1x1x8x8xf32> to vector<8x8xf32>
    %cst_29 = arith.constant dense<0.000000e+00> : vector<8x384xf32>
    %34 = tpu.matmul %33, %31, %cst_29 {dimension_numbers = #tpu.dot_dimension_numbers<[1], [0], [0], [1], [0, 0, 1, 1], [], []>} : vector<8x8xf32>, vector<8x384xf32>, vector<8x384xf32> -> vector<8x384xf32>
    %35 = arith.addf %30, %34 : vector<8x384xf32>
    %36 = vector.extract_strided_slice %4 {offsets = [0, 145], sizes = [8, 384], strides = [1, 1]} : vector<8x640xf32> to vector<8x384xf32>
    %c0_30 = arith.constant 0 : index
    %c6 = arith.constant 6 : index
    %c0_31 = arith.constant 0 : index
    %c0_32 = arith.constant 0 : index
    %37 = vector.load %arg2[%c0_30, %c6, %c0_31, %c0_32] : memref<4x9x8x8xf32, #tpu.memory_space<vmem>>, vector<1x1x8x8xf32>
    %38 = vector.shape_cast %37 : vector<1x1x8x8xf32> to vector<8x8xf32>
    %cst_33 = arith.constant dense<0.000000e+00> : vector<8x384xf32>
    %39 = tpu.matmul %38, %36, %cst_33 {dimension_numbers = #tpu.dot_dimension_numbers<[1], [0], [0], [1], [0, 0, 1, 1], [], []>} : vector<8x8xf32>, vector<8x384xf32>, vector<8x384xf32> -> vector<8x384xf32>
    %40 = arith.addf %35, %39 : vector<8x384xf32>
    %41 = vector.extract_strided_slice %4 {offsets = [0, 146], sizes = [8, 384], strides = [1, 1]} : vector<8x640xf32> to vector<8x384xf32>
    %c0_34 = arith.constant 0 : index
    %c7 = arith.constant 7 : index
    %c0_35 = arith.constant 0 : index
    %c0_36 = arith.constant 0 : index
    %42 = vector.load %arg2[%c0_34, %c7, %c0_35, %c0_36] : memref<4x9x8x8xf32, #tpu.memory_space<vmem>>, vector<1x1x8x8xf32>
    %43 = vector.shape_cast %42 : vector<1x1x8x8xf32> to vector<8x8xf32>
    %cst_37 = arith.constant dense<0.000000e+00> : vector<8x384xf32>
    %44 = tpu.matmul %43, %41, %cst_37 {dimension_numbers = #tpu.dot_dimension_numbers<[1], [0], [0], [1], [0, 0, 1, 1], [], []>} : vector<8x8xf32>, vector<8x384xf32>, vector<8x384xf32> -> vector<8x384xf32>
    %45 = arith.addf %40, %44 : vector<8x384xf32>
    %46 = vector.extract_strided_slice %4 {offsets = [0, 147], sizes = [8, 384], strides = [1, 1]} : vector<8x640xf32> to vector<8x384xf32>
    %c0_38 = arith.constant 0 : index
    %c8 = arith.constant 8 : index
    %c0_39 = arith.constant 0 : index
    %c0_40 = arith.constant 0 : index
    %47 = vector.load %arg2[%c0_38, %c8, %c0_39, %c0_40] : memref<4x9x8x8xf32, #tpu.memory_space<vmem>>, vector<1x1x8x8xf32>
    %48 = vector.shape_cast %47 : vector<1x1x8x8xf32> to vector<8x8xf32>
    %cst_41 = arith.constant dense<0.000000e+00> : vector<8x384xf32>
    %49 = tpu.matmul %48, %46, %cst_41 {dimension_numbers = #tpu.dot_dimension_numbers<[1], [0], [0], [1], [0, 0, 1, 1], [], []>} : vector<8x8xf32>, vector<8x384xf32>, vector<8x384xf32> -> vector<8x384xf32>
    %50 = arith.addf %45, %49 : vector<8x384xf32>
    %c0_42 = arith.constant 0 : index
    %c0_43 = arith.constant 0 : index
    %c0_44 = arith.constant 0 : index
    %51 = vector.load %arg3[%c0_42, %c0_43, %c0_44] : memref<4x8x1xf32, #tpu.memory_space<vmem>>, vector<1x8x1xf32>
    %52 = vector.shape_cast %51 : vector<1x8x1xf32> to vector<8x1xf32>
    %53 = vector.broadcast %52 : vector<8x1xf32> to vector<8x384xf32>
    %54 = arith.addf %50, %53 : vector<8x384xf32>
    %cst_45 = arith.constant 0.000000e+00 : f32
    %55 = vector.broadcast %cst_45 : f32 to vector<8x384xf32>
    %56 = arith.maximumf %54, %55 : vector<8x384xf32>
    %57 = vector.broadcast %2 : vector<1x384xf32> to vector<8x384xf32>
    %58 = arith.mulf %56, %57 : vector<8x384xf32>
    %59 = tpu.concatenate %3, %58, %3 in 1 : vector<8x128xf32>, vector<8x384xf32>, vector<8x128xf32> -> vector<8x640xf32>
    %cst_46 = arith.constant 0.000000e+00 : f32
    %60 = vector.broadcast %cst_46 : f32 to vector<8x384xf32>
    %61 = vector.extract_strided_slice %59 {offsets = [0, 109], sizes = [8, 384], strides = [1, 1]} : vector<8x640xf32> to vector<8x384xf32>
    %c1_47 = arith.constant 1 : index
    %c0_48 = arith.constant 0 : index
    %c0_49 = arith.constant 0 : index
    %c0_50 = arith.constant 0 : index
    %62 = vector.load %arg2[%c1_47, %c0_48, %c0_49, %c0_50] : memref<4x9x8x8xf32, #tpu.memory_space<vmem>>, vector<1x1x8x8xf32>
    %63 = vector.shape_cast %62 : vector<1x1x8x8xf32> to vector<8x8xf32>
    %cst_51 = arith.constant dense<0.000000e+00> : vector<8x384xf32>
    %64 = tpu.matmul %63, %61, %cst_51 {dimension_numbers = #tpu.dot_dimension_numbers<[1], [0], [0], [1], [0, 0, 1, 1], [], []>} : vector<8x8xf32>, vector<8x384xf32>, vector<8x384xf32> -> vector<8x384xf32>
    %65 = arith.addf %60, %64 : vector<8x384xf32>
    %66 = vector.extract_strided_slice %59 {offsets = [0, 110], sizes = [8, 384], strides = [1, 1]} : vector<8x640xf32> to vector<8x384xf32>
    %c1_52 = arith.constant 1 : index
    %c1_53 = arith.constant 1 : index
    %c0_54 = arith.constant 0 : index
    %c0_55 = arith.constant 0 : index
    %67 = vector.load %arg2[%c1_52, %c1_53, %c0_54, %c0_55] : memref<4x9x8x8xf32, #tpu.memory_space<vmem>>, vector<1x1x8x8xf32>
    %68 = vector.shape_cast %67 : vector<1x1x8x8xf32> to vector<8x8xf32>
    %cst_56 = arith.constant dense<0.000000e+00> : vector<8x384xf32>
    %69 = tpu.matmul %68, %66, %cst_56 {dimension_numbers = #tpu.dot_dimension_numbers<[1], [0], [0], [1], [0, 0, 1, 1], [], []>} : vector<8x8xf32>, vector<8x384xf32>, vector<8x384xf32> -> vector<8x384xf32>
    %70 = arith.addf %65, %69 : vector<8x384xf32>
    %71 = vector.extract_strided_slice %59 {offsets = [0, 111], sizes = [8, 384], strides = [1, 1]} : vector<8x640xf32> to vector<8x384xf32>
    %c1_57 = arith.constant 1 : index
    %c2_58 = arith.constant 2 : index
    %c0_59 = arith.constant 0 : index
    %c0_60 = arith.constant 0 : index
    %72 = vector.load %arg2[%c1_57, %c2_58, %c0_59, %c0_60] : memref<4x9x8x8xf32, #tpu.memory_space<vmem>>, vector<1x1x8x8xf32>
    %73 = vector.shape_cast %72 : vector<1x1x8x8xf32> to vector<8x8xf32>
    %cst_61 = arith.constant dense<0.000000e+00> : vector<8x384xf32>
    %74 = tpu.matmul %73, %71, %cst_61 {dimension_numbers = #tpu.dot_dimension_numbers<[1], [0], [0], [1], [0, 0, 1, 1], [], []>} : vector<8x8xf32>, vector<8x384xf32>, vector<8x384xf32> -> vector<8x384xf32>
    %75 = arith.addf %70, %74 : vector<8x384xf32>
    %76 = vector.extract_strided_slice %59 {offsets = [0, 127], sizes = [8, 384], strides = [1, 1]} : vector<8x640xf32> to vector<8x384xf32>
    %c1_62 = arith.constant 1 : index
    %c3_63 = arith.constant 3 : index
    %c0_64 = arith.constant 0 : index
    %c0_65 = arith.constant 0 : index
    %77 = vector.load %arg2[%c1_62, %c3_63, %c0_64, %c0_65] : memref<4x9x8x8xf32, #tpu.memory_space<vmem>>, vector<1x1x8x8xf32>
    %78 = vector.shape_cast %77 : vector<1x1x8x8xf32> to vector<8x8xf32>
    %cst_66 = arith.constant dense<0.000000e+00> : vector<8x384xf32>
    %79 = tpu.matmul %78, %76, %cst_66 {dimension_numbers = #tpu.dot_dimension_numbers<[1], [0], [0], [1], [0, 0, 1, 1], [], []>} : vector<8x8xf32>, vector<8x384xf32>, vector<8x384xf32> -> vector<8x384xf32>
    %80 = arith.addf %75, %79 : vector<8x384xf32>
    %81 = vector.extract_strided_slice %59 {offsets = [0, 128], sizes = [8, 384], strides = [1, 1]} : vector<8x640xf32> to vector<8x384xf32>
    %c1_67 = arith.constant 1 : index
    %c4_68 = arith.constant 4 : index
    %c0_69 = arith.constant 0 : index
    %c0_70 = arith.constant 0 : index
    %82 = vector.load %arg2[%c1_67, %c4_68, %c0_69, %c0_70] : memref<4x9x8x8xf32, #tpu.memory_space<vmem>>, vector<1x1x8x8xf32>
    %83 = vector.shape_cast %82 : vector<1x1x8x8xf32> to vector<8x8xf32>
    %cst_71 = arith.constant dense<0.000000e+00> : vector<8x384xf32>
    %84 = tpu.matmul %83, %81, %cst_71 {dimension_numbers = #tpu.dot_dimension_numbers<[1], [0], [0], [1], [0, 0, 1, 1], [], []>} : vector<8x8xf32>, vector<8x384xf32>, vector<8x384xf32> -> vector<8x384xf32>
    %85 = arith.addf %80, %84 : vector<8x384xf32>
    %86 = vector.extract_strided_slice %59 {offsets = [0, 129], sizes = [8, 384], strides = [1, 1]} : vector<8x640xf32> to vector<8x384xf32>
    %c1_72 = arith.constant 1 : index
    %c5_73 = arith.constant 5 : index
    %c0_74 = arith.constant 0 : index
    %c0_75 = arith.constant 0 : index
    %87 = vector.load %arg2[%c1_72, %c5_73, %c0_74, %c0_75] : memref<4x9x8x8xf32, #tpu.memory_space<vmem>>, vector<1x1x8x8xf32>
    %88 = vector.shape_cast %87 : vector<1x1x8x8xf32> to vector<8x8xf32>
    %cst_76 = arith.constant dense<0.000000e+00> : vector<8x384xf32>
    %89 = tpu.matmul %88, %86, %cst_76 {dimension_numbers = #tpu.dot_dimension_numbers<[1], [0], [0], [1], [0, 0, 1, 1], [], []>} : vector<8x8xf32>, vector<8x384xf32>, vector<8x384xf32> -> vector<8x384xf32>
    %90 = arith.addf %85, %89 : vector<8x384xf32>
    %91 = vector.extract_strided_slice %59 {offsets = [0, 145], sizes = [8, 384], strides = [1, 1]} : vector<8x640xf32> to vector<8x384xf32>
    %c1_77 = arith.constant 1 : index
    %c6_78 = arith.constant 6 : index
    %c0_79 = arith.constant 0 : index
    %c0_80 = arith.constant 0 : index
    %92 = vector.load %arg2[%c1_77, %c6_78, %c0_79, %c0_80] : memref<4x9x8x8xf32, #tpu.memory_space<vmem>>, vector<1x1x8x8xf32>
    %93 = vector.shape_cast %92 : vector<1x1x8x8xf32> to vector<8x8xf32>
    %cst_81 = arith.constant dense<0.000000e+00> : vector<8x384xf32>
    %94 = tpu.matmul %93, %91, %cst_81 {dimension_numbers = #tpu.dot_dimension_numbers<[1], [0], [0], [1], [0, 0, 1, 1], [], []>} : vector<8x8xf32>, vector<8x384xf32>, vector<8x384xf32> -> vector<8x384xf32>
    %95 = arith.addf %90, %94 : vector<8x384xf32>
    %96 = vector.extract_strided_slice %59 {offsets = [0, 146], sizes = [8, 384], strides = [1, 1]} : vector<8x640xf32> to vector<8x384xf32>
    %c1_82 = arith.constant 1 : index
    %c7_83 = arith.constant 7 : index
    %c0_84 = arith.constant 0 : index
    %c0_85 = arith.constant 0 : index
    %97 = vector.load %arg2[%c1_82, %c7_83, %c0_84, %c0_85] : memref<4x9x8x8xf32, #tpu.memory_space<vmem>>, vector<1x1x8x8xf32>
    %98 = vector.shape_cast %97 : vector<1x1x8x8xf32> to vector<8x8xf32>
    %cst_86 = arith.constant dense<0.000000e+00> : vector<8x384xf32>
    %99 = tpu.matmul %98, %96, %cst_86 {dimension_numbers = #tpu.dot_dimension_numbers<[1], [0], [0], [1], [0, 0, 1, 1], [], []>} : vector<8x8xf32>, vector<8x384xf32>, vector<8x384xf32> -> vector<8x384xf32>
    %100 = arith.addf %95, %99 : vector<8x384xf32>
    %101 = vector.extract_strided_slice %59 {offsets = [0, 147], sizes = [8, 384], strides = [1, 1]} : vector<8x640xf32> to vector<8x384xf32>
    %c1_87 = arith.constant 1 : index
    %c8_88 = arith.constant 8 : index
    %c0_89 = arith.constant 0 : index
    %c0_90 = arith.constant 0 : index
    %102 = vector.load %arg2[%c1_87, %c8_88, %c0_89, %c0_90] : memref<4x9x8x8xf32, #tpu.memory_space<vmem>>, vector<1x1x8x8xf32>
    %103 = vector.shape_cast %102 : vector<1x1x8x8xf32> to vector<8x8xf32>
    %cst_91 = arith.constant dense<0.000000e+00> : vector<8x384xf32>
    %104 = tpu.matmul %103, %101, %cst_91 {dimension_numbers = #tpu.dot_dimension_numbers<[1], [0], [0], [1], [0, 0, 1, 1], [], []>} : vector<8x8xf32>, vector<8x384xf32>, vector<8x384xf32> -> vector<8x384xf32>
    %105 = arith.addf %100, %104 : vector<8x384xf32>
    %c1_92 = arith.constant 1 : index
    %c0_93 = arith.constant 0 : index
    %c0_94 = arith.constant 0 : index
    %106 = vector.load %arg3[%c1_92, %c0_93, %c0_94] : memref<4x8x1xf32, #tpu.memory_space<vmem>>, vector<1x8x1xf32>
    %107 = vector.shape_cast %106 : vector<1x8x1xf32> to vector<8x1xf32>
    %108 = vector.broadcast %107 : vector<8x1xf32> to vector<8x384xf32>
    %109 = arith.addf %105, %108 : vector<8x384xf32>
    %cst_95 = arith.constant 0.000000e+00 : f32
    %110 = vector.broadcast %cst_95 : f32 to vector<8x384xf32>
    %111 = arith.maximumf %109, %110 : vector<8x384xf32>
    %112 = vector.broadcast %2 : vector<1x384xf32> to vector<8x384xf32>
    %113 = arith.mulf %111, %112 : vector<8x384xf32>
    %114 = tpu.concatenate %3, %113, %3 in 1 : vector<8x128xf32>, vector<8x384xf32>, vector<8x128xf32> -> vector<8x640xf32>
    %cst_96 = arith.constant 0.000000e+00 : f32
    %115 = vector.broadcast %cst_96 : f32 to vector<8x384xf32>
    %116 = vector.extract_strided_slice %114 {offsets = [0, 109], sizes = [8, 384], strides = [1, 1]} : vector<8x640xf32> to vector<8x384xf32>
    %c2_97 = arith.constant 2 : index
    %c0_98 = arith.constant 0 : index
    %c0_99 = arith.constant 0 : index
    %c0_100 = arith.constant 0 : index
    %117 = vector.load %arg2[%c2_97, %c0_98, %c0_99, %c0_100] : memref<4x9x8x8xf32, #tpu.memory_space<vmem>>, vector<1x1x8x8xf32>
    %118 = vector.shape_cast %117 : vector<1x1x8x8xf32> to vector<8x8xf32>
    %cst_101 = arith.constant dense<0.000000e+00> : vector<8x384xf32>
    %119 = tpu.matmul %118, %116, %cst_101 {dimension_numbers = #tpu.dot_dimension_numbers<[1], [0], [0], [1], [0, 0, 1, 1], [], []>} : vector<8x8xf32>, vector<8x384xf32>, vector<8x384xf32> -> vector<8x384xf32>
    %120 = arith.addf %115, %119 : vector<8x384xf32>
    %121 = vector.extract_strided_slice %114 {offsets = [0, 110], sizes = [8, 384], strides = [1, 1]} : vector<8x640xf32> to vector<8x384xf32>
    %c2_102 = arith.constant 2 : index
    %c1_103 = arith.constant 1 : index
    %c0_104 = arith.constant 0 : index
    %c0_105 = arith.constant 0 : index
    %122 = vector.load %arg2[%c2_102, %c1_103, %c0_104, %c0_105] : memref<4x9x8x8xf32, #tpu.memory_space<vmem>>, vector<1x1x8x8xf32>
    %123 = vector.shape_cast %122 : vector<1x1x8x8xf32> to vector<8x8xf32>
    %cst_106 = arith.constant dense<0.000000e+00> : vector<8x384xf32>
    %124 = tpu.matmul %123, %121, %cst_106 {dimension_numbers = #tpu.dot_dimension_numbers<[1], [0], [0], [1], [0, 0, 1, 1], [], []>} : vector<8x8xf32>, vector<8x384xf32>, vector<8x384xf32> -> vector<8x384xf32>
    %125 = arith.addf %120, %124 : vector<8x384xf32>
    %126 = vector.extract_strided_slice %114 {offsets = [0, 111], sizes = [8, 384], strides = [1, 1]} : vector<8x640xf32> to vector<8x384xf32>
    %c2_107 = arith.constant 2 : index
    %c2_108 = arith.constant 2 : index
    %c0_109 = arith.constant 0 : index
    %c0_110 = arith.constant 0 : index
    %127 = vector.load %arg2[%c2_107, %c2_108, %c0_109, %c0_110] : memref<4x9x8x8xf32, #tpu.memory_space<vmem>>, vector<1x1x8x8xf32>
    %128 = vector.shape_cast %127 : vector<1x1x8x8xf32> to vector<8x8xf32>
    %cst_111 = arith.constant dense<0.000000e+00> : vector<8x384xf32>
    %129 = tpu.matmul %128, %126, %cst_111 {dimension_numbers = #tpu.dot_dimension_numbers<[1], [0], [0], [1], [0, 0, 1, 1], [], []>} : vector<8x8xf32>, vector<8x384xf32>, vector<8x384xf32> -> vector<8x384xf32>
    %130 = arith.addf %125, %129 : vector<8x384xf32>
    %131 = vector.extract_strided_slice %114 {offsets = [0, 127], sizes = [8, 384], strides = [1, 1]} : vector<8x640xf32> to vector<8x384xf32>
    %c2_112 = arith.constant 2 : index
    %c3_113 = arith.constant 3 : index
    %c0_114 = arith.constant 0 : index
    %c0_115 = arith.constant 0 : index
    %132 = vector.load %arg2[%c2_112, %c3_113, %c0_114, %c0_115] : memref<4x9x8x8xf32, #tpu.memory_space<vmem>>, vector<1x1x8x8xf32>
    %133 = vector.shape_cast %132 : vector<1x1x8x8xf32> to vector<8x8xf32>
    %cst_116 = arith.constant dense<0.000000e+00> : vector<8x384xf32>
    %134 = tpu.matmul %133, %131, %cst_116 {dimension_numbers = #tpu.dot_dimension_numbers<[1], [0], [0], [1], [0, 0, 1, 1], [], []>} : vector<8x8xf32>, vector<8x384xf32>, vector<8x384xf32> -> vector<8x384xf32>
    %135 = arith.addf %130, %134 : vector<8x384xf32>
    %136 = vector.extract_strided_slice %114 {offsets = [0, 128], sizes = [8, 384], strides = [1, 1]} : vector<8x640xf32> to vector<8x384xf32>
    %c2_117 = arith.constant 2 : index
    %c4_118 = arith.constant 4 : index
    %c0_119 = arith.constant 0 : index
    %c0_120 = arith.constant 0 : index
    %137 = vector.load %arg2[%c2_117, %c4_118, %c0_119, %c0_120] : memref<4x9x8x8xf32, #tpu.memory_space<vmem>>, vector<1x1x8x8xf32>
    %138 = vector.shape_cast %137 : vector<1x1x8x8xf32> to vector<8x8xf32>
    %cst_121 = arith.constant dense<0.000000e+00> : vector<8x384xf32>
    %139 = tpu.matmul %138, %136, %cst_121 {dimension_numbers = #tpu.dot_dimension_numbers<[1], [0], [0], [1], [0, 0, 1, 1], [], []>} : vector<8x8xf32>, vector<8x384xf32>, vector<8x384xf32> -> vector<8x384xf32>
    %140 = arith.addf %135, %139 : vector<8x384xf32>
    %141 = vector.extract_strided_slice %114 {offsets = [0, 129], sizes = [8, 384], strides = [1, 1]} : vector<8x640xf32> to vector<8x384xf32>
    %c2_122 = arith.constant 2 : index
    %c5_123 = arith.constant 5 : index
    %c0_124 = arith.constant 0 : index
    %c0_125 = arith.constant 0 : index
    %142 = vector.load %arg2[%c2_122, %c5_123, %c0_124, %c0_125] : memref<4x9x8x8xf32, #tpu.memory_space<vmem>>, vector<1x1x8x8xf32>
    %143 = vector.shape_cast %142 : vector<1x1x8x8xf32> to vector<8x8xf32>
    %cst_126 = arith.constant dense<0.000000e+00> : vector<8x384xf32>
    %144 = tpu.matmul %143, %141, %cst_126 {dimension_numbers = #tpu.dot_dimension_numbers<[1], [0], [0], [1], [0, 0, 1, 1], [], []>} : vector<8x8xf32>, vector<8x384xf32>, vector<8x384xf32> -> vector<8x384xf32>
    %145 = arith.addf %140, %144 : vector<8x384xf32>
    %146 = vector.extract_strided_slice %114 {offsets = [0, 145], sizes = [8, 384], strides = [1, 1]} : vector<8x640xf32> to vector<8x384xf32>
    %c2_127 = arith.constant 2 : index
    %c6_128 = arith.constant 6 : index
    %c0_129 = arith.constant 0 : index
    %c0_130 = arith.constant 0 : index
    %147 = vector.load %arg2[%c2_127, %c6_128, %c0_129, %c0_130] : memref<4x9x8x8xf32, #tpu.memory_space<vmem>>, vector<1x1x8x8xf32>
    %148 = vector.shape_cast %147 : vector<1x1x8x8xf32> to vector<8x8xf32>
    %cst_131 = arith.constant dense<0.000000e+00> : vector<8x384xf32>
    %149 = tpu.matmul %148, %146, %cst_131 {dimension_numbers = #tpu.dot_dimension_numbers<[1], [0], [0], [1], [0, 0, 1, 1], [], []>} : vector<8x8xf32>, vector<8x384xf32>, vector<8x384xf32> -> vector<8x384xf32>
    %150 = arith.addf %145, %149 : vector<8x384xf32>
    %151 = vector.extract_strided_slice %114 {offsets = [0, 146], sizes = [8, 384], strides = [1, 1]} : vector<8x640xf32> to vector<8x384xf32>
    %c2_132 = arith.constant 2 : index
    %c7_133 = arith.constant 7 : index
    %c0_134 = arith.constant 0 : index
    %c0_135 = arith.constant 0 : index
    %152 = vector.load %arg2[%c2_132, %c7_133, %c0_134, %c0_135] : memref<4x9x8x8xf32, #tpu.memory_space<vmem>>, vector<1x1x8x8xf32>
    %153 = vector.shape_cast %152 : vector<1x1x8x8xf32> to vector<8x8xf32>
    %cst_136 = arith.constant dense<0.000000e+00> : vector<8x384xf32>
    %154 = tpu.matmul %153, %151, %cst_136 {dimension_numbers = #tpu.dot_dimension_numbers<[1], [0], [0], [1], [0, 0, 1, 1], [], []>} : vector<8x8xf32>, vector<8x384xf32>, vector<8x384xf32> -> vector<8x384xf32>
    %155 = arith.addf %150, %154 : vector<8x384xf32>
    %156 = vector.extract_strided_slice %114 {offsets = [0, 147], sizes = [8, 384], strides = [1, 1]} : vector<8x640xf32> to vector<8x384xf32>
    %c2_137 = arith.constant 2 : index
    %c8_138 = arith.constant 8 : index
    %c0_139 = arith.constant 0 : index
    %c0_140 = arith.constant 0 : index
    %157 = vector.load %arg2[%c2_137, %c8_138, %c0_139, %c0_140] : memref<4x9x8x8xf32, #tpu.memory_space<vmem>>, vector<1x1x8x8xf32>
    %158 = vector.shape_cast %157 : vector<1x1x8x8xf32> to vector<8x8xf32>
    %cst_141 = arith.constant dense<0.000000e+00> : vector<8x384xf32>
    %159 = tpu.matmul %158, %156, %cst_141 {dimension_numbers = #tpu.dot_dimension_numbers<[1], [0], [0], [1], [0, 0, 1, 1], [], []>} : vector<8x8xf32>, vector<8x384xf32>, vector<8x384xf32> -> vector<8x384xf32>
    %160 = arith.addf %155, %159 : vector<8x384xf32>
    %c2_142 = arith.constant 2 : index
    %c0_143 = arith.constant 0 : index
    %c0_144 = arith.constant 0 : index
    %161 = vector.load %arg3[%c2_142, %c0_143, %c0_144] : memref<4x8x1xf32, #tpu.memory_space<vmem>>, vector<1x8x1xf32>
    %162 = vector.shape_cast %161 : vector<1x8x1xf32> to vector<8x1xf32>
    %163 = vector.broadcast %162 : vector<8x1xf32> to vector<8x384xf32>
    %164 = arith.addf %160, %163 : vector<8x384xf32>
    %cst_145 = arith.constant 0.000000e+00 : f32
    %165 = vector.broadcast %cst_145 : f32 to vector<8x384xf32>
    %166 = arith.maximumf %164, %165 : vector<8x384xf32>
    %167 = vector.broadcast %2 : vector<1x384xf32> to vector<8x384xf32>
    %168 = arith.mulf %166, %167 : vector<8x384xf32>
    %169 = arith.addf %58, %168 : vector<8x384xf32>
    %170 = tpu.concatenate %3, %169, %3 in 1 : vector<8x128xf32>, vector<8x384xf32>, vector<8x128xf32> -> vector<8x640xf32>
    %cst_146 = arith.constant 0.000000e+00 : f32
    %171 = vector.broadcast %cst_146 : f32 to vector<8x384xf32>
    %172 = vector.extract_strided_slice %170 {offsets = [0, 109], sizes = [8, 384], strides = [1, 1]} : vector<8x640xf32> to vector<8x384xf32>
    %c1_147 = arith.constant 1 : index
    %c0_148 = arith.constant 0 : index
    %c0_149 = arith.constant 0 : index
    %c0_150 = arith.constant 0 : index
    %173 = vector.load %arg2[%c1_147, %c0_148, %c0_149, %c0_150] : memref<4x9x8x8xf32, #tpu.memory_space<vmem>>, vector<1x1x8x8xf32>
    %174 = vector.shape_cast %173 : vector<1x1x8x8xf32> to vector<8x8xf32>
    %cst_151 = arith.constant dense<0.000000e+00> : vector<8x384xf32>
    %175 = tpu.matmul %174, %172, %cst_151 {dimension_numbers = #tpu.dot_dimension_numbers<[1], [0], [0], [1], [0, 0, 1, 1], [], []>} : vector<8x8xf32>, vector<8x384xf32>, vector<8x384xf32> -> vector<8x384xf32>
    %176 = arith.addf %171, %175 : vector<8x384xf32>
    %177 = vector.extract_strided_slice %170 {offsets = [0, 110], sizes = [8, 384], strides = [1, 1]} : vector<8x640xf32> to vector<8x384xf32>
    %c1_152 = arith.constant 1 : index
    %c1_153 = arith.constant 1 : index
    %c0_154 = arith.constant 0 : index
    %c0_155 = arith.constant 0 : index
    %178 = vector.load %arg2[%c1_152, %c1_153, %c0_154, %c0_155] : memref<4x9x8x8xf32, #tpu.memory_space<vmem>>, vector<1x1x8x8xf32>
    %179 = vector.shape_cast %178 : vector<1x1x8x8xf32> to vector<8x8xf32>
    %cst_156 = arith.constant dense<0.000000e+00> : vector<8x384xf32>
    %180 = tpu.matmul %179, %177, %cst_156 {dimension_numbers = #tpu.dot_dimension_numbers<[1], [0], [0], [1], [0, 0, 1, 1], [], []>} : vector<8x8xf32>, vector<8x384xf32>, vector<8x384xf32> -> vector<8x384xf32>
    %181 = arith.addf %176, %180 : vector<8x384xf32>
    %182 = vector.extract_strided_slice %170 {offsets = [0, 111], sizes = [8, 384], strides = [1, 1]} : vector<8x640xf32> to vector<8x384xf32>
    %c1_157 = arith.constant 1 : index
    %c2_158 = arith.constant 2 : index
    %c0_159 = arith.constant 0 : index
    %c0_160 = arith.constant 0 : index
    %183 = vector.load %arg2[%c1_157, %c2_158, %c0_159, %c0_160] : memref<4x9x8x8xf32, #tpu.memory_space<vmem>>, vector<1x1x8x8xf32>
    %184 = vector.shape_cast %183 : vector<1x1x8x8xf32> to vector<8x8xf32>
    %cst_161 = arith.constant dense<0.000000e+00> : vector<8x384xf32>
    %185 = tpu.matmul %184, %182, %cst_161 {dimension_numbers = #tpu.dot_dimension_numbers<[1], [0], [0], [1], [0, 0, 1, 1], [], []>} : vector<8x8xf32>, vector<8x384xf32>, vector<8x384xf32> -> vector<8x384xf32>
    %186 = arith.addf %181, %185 : vector<8x384xf32>
    %187 = vector.extract_strided_slice %170 {offsets = [0, 127], sizes = [8, 384], strides = [1, 1]} : vector<8x640xf32> to vector<8x384xf32>
    %c1_162 = arith.constant 1 : index
    %c3_163 = arith.constant 3 : index
    %c0_164 = arith.constant 0 : index
    %c0_165 = arith.constant 0 : index
    %188 = vector.load %arg2[%c1_162, %c3_163, %c0_164, %c0_165] : memref<4x9x8x8xf32, #tpu.memory_space<vmem>>, vector<1x1x8x8xf32>
    %189 = vector.shape_cast %188 : vector<1x1x8x8xf32> to vector<8x8xf32>
    %cst_166 = arith.constant dense<0.000000e+00> : vector<8x384xf32>
    %190 = tpu.matmul %189, %187, %cst_166 {dimension_numbers = #tpu.dot_dimension_numbers<[1], [0], [0], [1], [0, 0, 1, 1], [], []>} : vector<8x8xf32>, vector<8x384xf32>, vector<8x384xf32> -> vector<8x384xf32>
    %191 = arith.addf %186, %190 : vector<8x384xf32>
    %192 = vector.extract_strided_slice %170 {offsets = [0, 128], sizes = [8, 384], strides = [1, 1]} : vector<8x640xf32> to vector<8x384xf32>
    %c1_167 = arith.constant 1 : index
    %c4_168 = arith.constant 4 : index
    %c0_169 = arith.constant 0 : index
    %c0_170 = arith.constant 0 : index
    %193 = vector.load %arg2[%c1_167, %c4_168, %c0_169, %c0_170] : memref<4x9x8x8xf32, #tpu.memory_space<vmem>>, vector<1x1x8x8xf32>
    %194 = vector.shape_cast %193 : vector<1x1x8x8xf32> to vector<8x8xf32>
    %cst_171 = arith.constant dense<0.000000e+00> : vector<8x384xf32>
    %195 = tpu.matmul %194, %192, %cst_171 {dimension_numbers = #tpu.dot_dimension_numbers<[1], [0], [0], [1], [0, 0, 1, 1], [], []>} : vector<8x8xf32>, vector<8x384xf32>, vector<8x384xf32> -> vector<8x384xf32>
    %196 = arith.addf %191, %195 : vector<8x384xf32>
    %197 = vector.extract_strided_slice %170 {offsets = [0, 129], sizes = [8, 384], strides = [1, 1]} : vector<8x640xf32> to vector<8x384xf32>
    %c1_172 = arith.constant 1 : index
    %c5_173 = arith.constant 5 : index
    %c0_174 = arith.constant 0 : index
    %c0_175 = arith.constant 0 : index
    %198 = vector.load %arg2[%c1_172, %c5_173, %c0_174, %c0_175] : memref<4x9x8x8xf32, #tpu.memory_space<vmem>>, vector<1x1x8x8xf32>
    %199 = vector.shape_cast %198 : vector<1x1x8x8xf32> to vector<8x8xf32>
    %cst_176 = arith.constant dense<0.000000e+00> : vector<8x384xf32>
    %200 = tpu.matmul %199, %197, %cst_176 {dimension_numbers = #tpu.dot_dimension_numbers<[1], [0], [0], [1], [0, 0, 1, 1], [], []>} : vector<8x8xf32>, vector<8x384xf32>, vector<8x384xf32> -> vector<8x384xf32>
    %201 = arith.addf %196, %200 : vector<8x384xf32>
    %202 = vector.extract_strided_slice %170 {offsets = [0, 145], sizes = [8, 384], strides = [1, 1]} : vector<8x640xf32> to vector<8x384xf32>
    %c1_177 = arith.constant 1 : index
    %c6_178 = arith.constant 6 : index
    %c0_179 = arith.constant 0 : index
    %c0_180 = arith.constant 0 : index
    %203 = vector.load %arg2[%c1_177, %c6_178, %c0_179, %c0_180] : memref<4x9x8x8xf32, #tpu.memory_space<vmem>>, vector<1x1x8x8xf32>
    %204 = vector.shape_cast %203 : vector<1x1x8x8xf32> to vector<8x8xf32>
    %cst_181 = arith.constant dense<0.000000e+00> : vector<8x384xf32>
    %205 = tpu.matmul %204, %202, %cst_181 {dimension_numbers = #tpu.dot_dimension_numbers<[1], [0], [0], [1], [0, 0, 1, 1], [], []>} : vector<8x8xf32>, vector<8x384xf32>, vector<8x384xf32> -> vector<8x384xf32>
    %206 = arith.addf %201, %205 : vector<8x384xf32>
    %207 = vector.extract_strided_slice %170 {offsets = [0, 146], sizes = [8, 384], strides = [1, 1]} : vector<8x640xf32> to vector<8x384xf32>
    %c1_182 = arith.constant 1 : index
    %c7_183 = arith.constant 7 : index
    %c0_184 = arith.constant 0 : index
    %c0_185 = arith.constant 0 : index
    %208 = vector.load %arg2[%c1_182, %c7_183, %c0_184, %c0_185] : memref<4x9x8x8xf32, #tpu.memory_space<vmem>>, vector<1x1x8x8xf32>
    %209 = vector.shape_cast %208 : vector<1x1x8x8xf32> to vector<8x8xf32>
    %cst_186 = arith.constant dense<0.000000e+00> : vector<8x384xf32>
    %210 = tpu.matmul %209, %207, %cst_186 {dimension_numbers = #tpu.dot_dimension_numbers<[1], [0], [0], [1], [0, 0, 1, 1], [], []>} : vector<8x8xf32>, vector<8x384xf32>, vector<8x384xf32> -> vector<8x384xf32>
    %211 = arith.addf %206, %210 : vector<8x384xf32>
    %212 = vector.extract_strided_slice %170 {offsets = [0, 147], sizes = [8, 384], strides = [1, 1]} : vector<8x640xf32> to vector<8x384xf32>
    %c1_187 = arith.constant 1 : index
    %c8_188 = arith.constant 8 : index
    %c0_189 = arith.constant 0 : index
    %c0_190 = arith.constant 0 : index
    %213 = vector.load %arg2[%c1_187, %c8_188, %c0_189, %c0_190] : memref<4x9x8x8xf32, #tpu.memory_space<vmem>>, vector<1x1x8x8xf32>
    %214 = vector.shape_cast %213 : vector<1x1x8x8xf32> to vector<8x8xf32>
    %cst_191 = arith.constant dense<0.000000e+00> : vector<8x384xf32>
    %215 = tpu.matmul %214, %212, %cst_191 {dimension_numbers = #tpu.dot_dimension_numbers<[1], [0], [0], [1], [0, 0, 1, 1], [], []>} : vector<8x8xf32>, vector<8x384xf32>, vector<8x384xf32> -> vector<8x384xf32>
    %216 = arith.addf %211, %215 : vector<8x384xf32>
    %c1_192 = arith.constant 1 : index
    %c0_193 = arith.constant 0 : index
    %c0_194 = arith.constant 0 : index
    %217 = vector.load %arg3[%c1_192, %c0_193, %c0_194] : memref<4x8x1xf32, #tpu.memory_space<vmem>>, vector<1x8x1xf32>
    %218 = vector.shape_cast %217 : vector<1x8x1xf32> to vector<8x1xf32>
    %219 = vector.broadcast %218 : vector<8x1xf32> to vector<8x384xf32>
    %220 = arith.addf %216, %219 : vector<8x384xf32>
    %cst_195 = arith.constant 0.000000e+00 : f32
    %221 = vector.broadcast %cst_195 : f32 to vector<8x384xf32>
    %222 = arith.maximumf %220, %221 : vector<8x384xf32>
    %223 = vector.broadcast %2 : vector<1x384xf32> to vector<8x384xf32>
    %224 = arith.mulf %222, %223 : vector<8x384xf32>
    %225 = tpu.concatenate %3, %224, %3 in 1 : vector<8x128xf32>, vector<8x384xf32>, vector<8x128xf32> -> vector<8x640xf32>
    %cst_196 = arith.constant 0.000000e+00 : f32
    %226 = vector.broadcast %cst_196 : f32 to vector<8x384xf32>
    %227 = vector.extract_strided_slice %225 {offsets = [0, 109], sizes = [8, 384], strides = [1, 1]} : vector<8x640xf32> to vector<8x384xf32>
    %c2_197 = arith.constant 2 : index
    %c0_198 = arith.constant 0 : index
    %c0_199 = arith.constant 0 : index
    %c0_200 = arith.constant 0 : index
    %228 = vector.load %arg2[%c2_197, %c0_198, %c0_199, %c0_200] : memref<4x9x8x8xf32, #tpu.memory_space<vmem>>, vector<1x1x8x8xf32>
    %229 = vector.shape_cast %228 : vector<1x1x8x8xf32> to vector<8x8xf32>
    %cst_201 = arith.constant dense<0.000000e+00> : vector<8x384xf32>
    %230 = tpu.matmul %229, %227, %cst_201 {dimension_numbers = #tpu.dot_dimension_numbers<[1], [0], [0], [1], [0, 0, 1, 1], [], []>} : vector<8x8xf32>, vector<8x384xf32>, vector<8x384xf32> -> vector<8x384xf32>
    %231 = arith.addf %226, %230 : vector<8x384xf32>
    %232 = vector.extract_strided_slice %225 {offsets = [0, 110], sizes = [8, 384], strides = [1, 1]} : vector<8x640xf32> to vector<8x384xf32>
    %c2_202 = arith.constant 2 : index
    %c1_203 = arith.constant 1 : index
    %c0_204 = arith.constant 0 : index
    %c0_205 = arith.constant 0 : index
    %233 = vector.load %arg2[%c2_202, %c1_203, %c0_204, %c0_205] : memref<4x9x8x8xf32, #tpu.memory_space<vmem>>, vector<1x1x8x8xf32>
    %234 = vector.shape_cast %233 : vector<1x1x8x8xf32> to vector<8x8xf32>
    %cst_206 = arith.constant dense<0.000000e+00> : vector<8x384xf32>
    %235 = tpu.matmul %234, %232, %cst_206 {dimension_numbers = #tpu.dot_dimension_numbers<[1], [0], [0], [1], [0, 0, 1, 1], [], []>} : vector<8x8xf32>, vector<8x384xf32>, vector<8x384xf32> -> vector<8x384xf32>
    %236 = arith.addf %231, %235 : vector<8x384xf32>
    %237 = vector.extract_strided_slice %225 {offsets = [0, 111], sizes = [8, 384], strides = [1, 1]} : vector<8x640xf32> to vector<8x384xf32>
    %c2_207 = arith.constant 2 : index
    %c2_208 = arith.constant 2 : index
    %c0_209 = arith.constant 0 : index
    %c0_210 = arith.constant 0 : index
    %238 = vector.load %arg2[%c2_207, %c2_208, %c0_209, %c0_210] : memref<4x9x8x8xf32, #tpu.memory_space<vmem>>, vector<1x1x8x8xf32>
    %239 = vector.shape_cast %238 : vector<1x1x8x8xf32> to vector<8x8xf32>
    %cst_211 = arith.constant dense<0.000000e+00> : vector<8x384xf32>
    %240 = tpu.matmul %239, %237, %cst_211 {dimension_numbers = #tpu.dot_dimension_numbers<[1], [0], [0], [1], [0, 0, 1, 1], [], []>} : vector<8x8xf32>, vector<8x384xf32>, vector<8x384xf32> -> vector<8x384xf32>
    %241 = arith.addf %236, %240 : vector<8x384xf32>
    %242 = vector.extract_strided_slice %225 {offsets = [0, 127], sizes = [8, 384], strides = [1, 1]} : vector<8x640xf32> to vector<8x384xf32>
    %c2_212 = arith.constant 2 : index
    %c3_213 = arith.constant 3 : index
    %c0_214 = arith.constant 0 : index
    %c0_215 = arith.constant 0 : index
    %243 = vector.load %arg2[%c2_212, %c3_213, %c0_214, %c0_215] : memref<4x9x8x8xf32, #tpu.memory_space<vmem>>, vector<1x1x8x8xf32>
    %244 = vector.shape_cast %243 : vector<1x1x8x8xf32> to vector<8x8xf32>
    %cst_216 = arith.constant dense<0.000000e+00> : vector<8x384xf32>
    %245 = tpu.matmul %244, %242, %cst_216 {dimension_numbers = #tpu.dot_dimension_numbers<[1], [0], [0], [1], [0, 0, 1, 1], [], []>} : vector<8x8xf32>, vector<8x384xf32>, vector<8x384xf32> -> vector<8x384xf32>
    %246 = arith.addf %241, %245 : vector<8x384xf32>
    %247 = vector.extract_strided_slice %225 {offsets = [0, 128], sizes = [8, 384], strides = [1, 1]} : vector<8x640xf32> to vector<8x384xf32>
    %c2_217 = arith.constant 2 : index
    %c4_218 = arith.constant 4 : index
    %c0_219 = arith.constant 0 : index
    %c0_220 = arith.constant 0 : index
    %248 = vector.load %arg2[%c2_217, %c4_218, %c0_219, %c0_220] : memref<4x9x8x8xf32, #tpu.memory_space<vmem>>, vector<1x1x8x8xf32>
    %249 = vector.shape_cast %248 : vector<1x1x8x8xf32> to vector<8x8xf32>
    %cst_221 = arith.constant dense<0.000000e+00> : vector<8x384xf32>
    %250 = tpu.matmul %249, %247, %cst_221 {dimension_numbers = #tpu.dot_dimension_numbers<[1], [0], [0], [1], [0, 0, 1, 1], [], []>} : vector<8x8xf32>, vector<8x384xf32>, vector<8x384xf32> -> vector<8x384xf32>
    %251 = arith.addf %246, %250 : vector<8x384xf32>
    %252 = vector.extract_strided_slice %225 {offsets = [0, 129], sizes = [8, 384], strides = [1, 1]} : vector<8x640xf32> to vector<8x384xf32>
    %c2_222 = arith.constant 2 : index
    %c5_223 = arith.constant 5 : index
    %c0_224 = arith.constant 0 : index
    %c0_225 = arith.constant 0 : index
    %253 = vector.load %arg2[%c2_222, %c5_223, %c0_224, %c0_225] : memref<4x9x8x8xf32, #tpu.memory_space<vmem>>, vector<1x1x8x8xf32>
    %254 = vector.shape_cast %253 : vector<1x1x8x8xf32> to vector<8x8xf32>
    %cst_226 = arith.constant dense<0.000000e+00> : vector<8x384xf32>
    %255 = tpu.matmul %254, %252, %cst_226 {dimension_numbers = #tpu.dot_dimension_numbers<[1], [0], [0], [1], [0, 0, 1, 1], [], []>} : vector<8x8xf32>, vector<8x384xf32>, vector<8x384xf32> -> vector<8x384xf32>
    %256 = arith.addf %251, %255 : vector<8x384xf32>
    %257 = vector.extract_strided_slice %225 {offsets = [0, 145], sizes = [8, 384], strides = [1, 1]} : vector<8x640xf32> to vector<8x384xf32>
    %c2_227 = arith.constant 2 : index
    %c6_228 = arith.constant 6 : index
    %c0_229 = arith.constant 0 : index
    %c0_230 = arith.constant 0 : index
    %258 = vector.load %arg2[%c2_227, %c6_228, %c0_229, %c0_230] : memref<4x9x8x8xf32, #tpu.memory_space<vmem>>, vector<1x1x8x8xf32>
    %259 = vector.shape_cast %258 : vector<1x1x8x8xf32> to vector<8x8xf32>
    %cst_231 = arith.constant dense<0.000000e+00> : vector<8x384xf32>
    %260 = tpu.matmul %259, %257, %cst_231 {dimension_numbers = #tpu.dot_dimension_numbers<[1], [0], [0], [1], [0, 0, 1, 1], [], []>} : vector<8x8xf32>, vector<8x384xf32>, vector<8x384xf32> -> vector<8x384xf32>
    %261 = arith.addf %256, %260 : vector<8x384xf32>
    %262 = vector.extract_strided_slice %225 {offsets = [0, 146], sizes = [8, 384], strides = [1, 1]} : vector<8x640xf32> to vector<8x384xf32>
    %c2_232 = arith.constant 2 : index
    %c7_233 = arith.constant 7 : index
    %c0_234 = arith.constant 0 : index
    %c0_235 = arith.constant 0 : index
    %263 = vector.load %arg2[%c2_232, %c7_233, %c0_234, %c0_235] : memref<4x9x8x8xf32, #tpu.memory_space<vmem>>, vector<1x1x8x8xf32>
    %264 = vector.shape_cast %263 : vector<1x1x8x8xf32> to vector<8x8xf32>
    %cst_236 = arith.constant dense<0.000000e+00> : vector<8x384xf32>
    %265 = tpu.matmul %264, %262, %cst_236 {dimension_numbers = #tpu.dot_dimension_numbers<[1], [0], [0], [1], [0, 0, 1, 1], [], []>} : vector<8x8xf32>, vector<8x384xf32>, vector<8x384xf32> -> vector<8x384xf32>
    %266 = arith.addf %261, %265 : vector<8x384xf32>
    %267 = vector.extract_strided_slice %225 {offsets = [0, 147], sizes = [8, 384], strides = [1, 1]} : vector<8x640xf32> to vector<8x384xf32>
    %c2_237 = arith.constant 2 : index
    %c8_238 = arith.constant 8 : index
    %c0_239 = arith.constant 0 : index
    %c0_240 = arith.constant 0 : index
    %268 = vector.load %arg2[%c2_237, %c8_238, %c0_239, %c0_240] : memref<4x9x8x8xf32, #tpu.memory_space<vmem>>, vector<1x1x8x8xf32>
    %269 = vector.shape_cast %268 : vector<1x1x8x8xf32> to vector<8x8xf32>
    %cst_241 = arith.constant dense<0.000000e+00> : vector<8x384xf32>
    %270 = tpu.matmul %269, %267, %cst_241 {dimension_numbers = #tpu.dot_dimension_numbers<[1], [0], [0], [1], [0, 0, 1, 1], [], []>} : vector<8x8xf32>, vector<8x384xf32>, vector<8x384xf32> -> vector<8x384xf32>
    %271 = arith.addf %266, %270 : vector<8x384xf32>
    %c2_242 = arith.constant 2 : index
    %c0_243 = arith.constant 0 : index
    %c0_244 = arith.constant 0 : index
    %272 = vector.load %arg3[%c2_242, %c0_243, %c0_244] : memref<4x8x1xf32, #tpu.memory_space<vmem>>, vector<1x8x1xf32>
    %273 = vector.shape_cast %272 : vector<1x8x1xf32> to vector<8x1xf32>
    %274 = vector.broadcast %273 : vector<8x1xf32> to vector<8x384xf32>
    %275 = arith.addf %271, %274 : vector<8x384xf32>
    %cst_245 = arith.constant 0.000000e+00 : f32
    %276 = vector.broadcast %cst_245 : f32 to vector<8x384xf32>
    %277 = arith.maximumf %275, %276 : vector<8x384xf32>
    %278 = vector.broadcast %2 : vector<1x384xf32> to vector<8x384xf32>
    %279 = arith.mulf %277, %278 : vector<8x384xf32>
    %280 = arith.addf %169, %279 : vector<8x384xf32>
    %281 = tpu.concatenate %3, %280, %3 in 1 : vector<8x128xf32>, vector<8x384xf32>, vector<8x128xf32> -> vector<8x640xf32>
    %cst_246 = arith.constant 0.000000e+00 : f32
    %282 = vector.broadcast %cst_246 : f32 to vector<8x384xf32>
    %283 = vector.extract_strided_slice %281 {offsets = [0, 109], sizes = [8, 384], strides = [1, 1]} : vector<8x640xf32> to vector<8x384xf32>
    %c3_247 = arith.constant 3 : index
    %c0_248 = arith.constant 0 : index
    %c0_249 = arith.constant 0 : index
    %c0_250 = arith.constant 0 : index
    %284 = vector.load %arg2[%c3_247, %c0_248, %c0_249, %c0_250] : memref<4x9x8x8xf32, #tpu.memory_space<vmem>>, vector<1x1x8x8xf32>
    %285 = vector.shape_cast %284 : vector<1x1x8x8xf32> to vector<8x8xf32>
    %cst_251 = arith.constant dense<0.000000e+00> : vector<8x384xf32>
    %286 = tpu.matmul %285, %283, %cst_251 {dimension_numbers = #tpu.dot_dimension_numbers<[1], [0], [0], [1], [0, 0, 1, 1], [], []>} : vector<8x8xf32>, vector<8x384xf32>, vector<8x384xf32> -> vector<8x384xf32>
    %287 = arith.addf %282, %286 : vector<8x384xf32>
    %288 = vector.extract_strided_slice %281 {offsets = [0, 110], sizes = [8, 384], strides = [1, 1]} : vector<8x640xf32> to vector<8x384xf32>
    %c3_252 = arith.constant 3 : index
    %c1_253 = arith.constant 1 : index
    %c0_254 = arith.constant 0 : index
    %c0_255 = arith.constant 0 : index
    %289 = vector.load %arg2[%c3_252, %c1_253, %c0_254, %c0_255] : memref<4x9x8x8xf32, #tpu.memory_space<vmem>>, vector<1x1x8x8xf32>
    %290 = vector.shape_cast %289 : vector<1x1x8x8xf32> to vector<8x8xf32>
    %cst_256 = arith.constant dense<0.000000e+00> : vector<8x384xf32>
    %291 = tpu.matmul %290, %288, %cst_256 {dimension_numbers = #tpu.dot_dimension_numbers<[1], [0], [0], [1], [0, 0, 1, 1], [], []>} : vector<8x8xf32>, vector<8x384xf32>, vector<8x384xf32> -> vector<8x384xf32>
    %292 = arith.addf %287, %291 : vector<8x384xf32>
    %293 = vector.extract_strided_slice %281 {offsets = [0, 111], sizes = [8, 384], strides = [1, 1]} : vector<8x640xf32> to vector<8x384xf32>
    %c3_257 = arith.constant 3 : index
    %c2_258 = arith.constant 2 : index
    %c0_259 = arith.constant 0 : index
    %c0_260 = arith.constant 0 : index
    %294 = vector.load %arg2[%c3_257, %c2_258, %c0_259, %c0_260] : memref<4x9x8x8xf32, #tpu.memory_space<vmem>>, vector<1x1x8x8xf32>
    %295 = vector.shape_cast %294 : vector<1x1x8x8xf32> to vector<8x8xf32>
    %cst_261 = arith.constant dense<0.000000e+00> : vector<8x384xf32>
    %296 = tpu.matmul %295, %293, %cst_261 {dimension_numbers = #tpu.dot_dimension_numbers<[1], [0], [0], [1], [0, 0, 1, 1], [], []>} : vector<8x8xf32>, vector<8x384xf32>, vector<8x384xf32> -> vector<8x384xf32>
    %297 = arith.addf %292, %296 : vector<8x384xf32>
    %298 = vector.extract_strided_slice %281 {offsets = [0, 127], sizes = [8, 384], strides = [1, 1]} : vector<8x640xf32> to vector<8x384xf32>
    %c3_262 = arith.constant 3 : index
    %c3_263 = arith.constant 3 : index
    %c0_264 = arith.constant 0 : index
    %c0_265 = arith.constant 0 : index
    %299 = vector.load %arg2[%c3_262, %c3_263, %c0_264, %c0_265] : memref<4x9x8x8xf32, #tpu.memory_space<vmem>>, vector<1x1x8x8xf32>
    %300 = vector.shape_cast %299 : vector<1x1x8x8xf32> to vector<8x8xf32>
    %cst_266 = arith.constant dense<0.000000e+00> : vector<8x384xf32>
    %301 = tpu.matmul %300, %298, %cst_266 {dimension_numbers = #tpu.dot_dimension_numbers<[1], [0], [0], [1], [0, 0, 1, 1], [], []>} : vector<8x8xf32>, vector<8x384xf32>, vector<8x384xf32> -> vector<8x384xf32>
    %302 = arith.addf %297, %301 : vector<8x384xf32>
    %303 = vector.extract_strided_slice %281 {offsets = [0, 128], sizes = [8, 384], strides = [1, 1]} : vector<8x640xf32> to vector<8x384xf32>
    %c3_267 = arith.constant 3 : index
    %c4_268 = arith.constant 4 : index
    %c0_269 = arith.constant 0 : index
    %c0_270 = arith.constant 0 : index
    %304 = vector.load %arg2[%c3_267, %c4_268, %c0_269, %c0_270] : memref<4x9x8x8xf32, #tpu.memory_space<vmem>>, vector<1x1x8x8xf32>
    %305 = vector.shape_cast %304 : vector<1x1x8x8xf32> to vector<8x8xf32>
    %cst_271 = arith.constant dense<0.000000e+00> : vector<8x384xf32>
    %306 = tpu.matmul %305, %303, %cst_271 {dimension_numbers = #tpu.dot_dimension_numbers<[1], [0], [0], [1], [0, 0, 1, 1], [], []>} : vector<8x8xf32>, vector<8x384xf32>, vector<8x384xf32> -> vector<8x384xf32>
    %307 = arith.addf %302, %306 : vector<8x384xf32>
    %308 = vector.extract_strided_slice %281 {offsets = [0, 129], sizes = [8, 384], strides = [1, 1]} : vector<8x640xf32> to vector<8x384xf32>
    %c3_272 = arith.constant 3 : index
    %c5_273 = arith.constant 5 : index
    %c0_274 = arith.constant 0 : index
    %c0_275 = arith.constant 0 : index
    %309 = vector.load %arg2[%c3_272, %c5_273, %c0_274, %c0_275] : memref<4x9x8x8xf32, #tpu.memory_space<vmem>>, vector<1x1x8x8xf32>
    %310 = vector.shape_cast %309 : vector<1x1x8x8xf32> to vector<8x8xf32>
    %cst_276 = arith.constant dense<0.000000e+00> : vector<8x384xf32>
    %311 = tpu.matmul %310, %308, %cst_276 {dimension_numbers = #tpu.dot_dimension_numbers<[1], [0], [0], [1], [0, 0, 1, 1], [], []>} : vector<8x8xf32>, vector<8x384xf32>, vector<8x384xf32> -> vector<8x384xf32>
    %312 = arith.addf %307, %311 : vector<8x384xf32>
    %313 = vector.extract_strided_slice %281 {offsets = [0, 145], sizes = [8, 384], strides = [1, 1]} : vector<8x640xf32> to vector<8x384xf32>
    %c3_277 = arith.constant 3 : index
    %c6_278 = arith.constant 6 : index
    %c0_279 = arith.constant 0 : index
    %c0_280 = arith.constant 0 : index
    %314 = vector.load %arg2[%c3_277, %c6_278, %c0_279, %c0_280] : memref<4x9x8x8xf32, #tpu.memory_space<vmem>>, vector<1x1x8x8xf32>
    %315 = vector.shape_cast %314 : vector<1x1x8x8xf32> to vector<8x8xf32>
    %cst_281 = arith.constant dense<0.000000e+00> : vector<8x384xf32>
    %316 = tpu.matmul %315, %313, %cst_281 {dimension_numbers = #tpu.dot_dimension_numbers<[1], [0], [0], [1], [0, 0, 1, 1], [], []>} : vector<8x8xf32>, vector<8x384xf32>, vector<8x384xf32> -> vector<8x384xf32>
    %317 = arith.addf %312, %316 : vector<8x384xf32>
    %318 = vector.extract_strided_slice %281 {offsets = [0, 146], sizes = [8, 384], strides = [1, 1]} : vector<8x640xf32> to vector<8x384xf32>
    %c3_282 = arith.constant 3 : index
    %c7_283 = arith.constant 7 : index
    %c0_284 = arith.constant 0 : index
    %c0_285 = arith.constant 0 : index
    %319 = vector.load %arg2[%c3_282, %c7_283, %c0_284, %c0_285] : memref<4x9x8x8xf32, #tpu.memory_space<vmem>>, vector<1x1x8x8xf32>
    %320 = vector.shape_cast %319 : vector<1x1x8x8xf32> to vector<8x8xf32>
    %cst_286 = arith.constant dense<0.000000e+00> : vector<8x384xf32>
    %321 = tpu.matmul %320, %318, %cst_286 {dimension_numbers = #tpu.dot_dimension_numbers<[1], [0], [0], [1], [0, 0, 1, 1], [], []>} : vector<8x8xf32>, vector<8x384xf32>, vector<8x384xf32> -> vector<8x384xf32>
    %322 = arith.addf %317, %321 : vector<8x384xf32>
    %323 = vector.extract_strided_slice %281 {offsets = [0, 147], sizes = [8, 384], strides = [1, 1]} : vector<8x640xf32> to vector<8x384xf32>
    %c3_287 = arith.constant 3 : index
    %c8_288 = arith.constant 8 : index
    %c0_289 = arith.constant 0 : index
    %c0_290 = arith.constant 0 : index
    %324 = vector.load %arg2[%c3_287, %c8_288, %c0_289, %c0_290] : memref<4x9x8x8xf32, #tpu.memory_space<vmem>>, vector<1x1x8x8xf32>
    %325 = vector.shape_cast %324 : vector<1x1x8x8xf32> to vector<8x8xf32>
    %cst_291 = arith.constant dense<0.000000e+00> : vector<8x384xf32>
    %326 = tpu.matmul %325, %323, %cst_291 {dimension_numbers = #tpu.dot_dimension_numbers<[1], [0], [0], [1], [0, 0, 1, 1], [], []>} : vector<8x8xf32>, vector<8x384xf32>, vector<8x384xf32> -> vector<8x384xf32>
    %327 = arith.addf %322, %326 : vector<8x384xf32>
    %c3_292 = arith.constant 3 : index
    %c0_293 = arith.constant 0 : index
    %c0_294 = arith.constant 0 : index
    %328 = vector.load %arg3[%c3_292, %c0_293, %c0_294] : memref<4x8x1xf32, #tpu.memory_space<vmem>>, vector<1x8x1xf32>
    %329 = vector.shape_cast %328 : vector<1x8x1xf32> to vector<8x1xf32>
    %330 = vector.broadcast %329 : vector<8x1xf32> to vector<8x384xf32>
    %331 = arith.addf %327, %330 : vector<8x384xf32>
    %cst_295 = arith.constant 0.000000e+00 : f32
    %332 = vector.broadcast %cst_295 : f32 to vector<8x384xf32>
    %333 = arith.subf %332, %331 : vector<8x384xf32>
    %334 = math.exp %333 : vector<8x384xf32>
    %cst_296 = arith.constant 1.000000e+00 : f32
    %335 = vector.broadcast %cst_296 : f32 to vector<8x384xf32>
    %336 = arith.addf %335, %334 : vector<8x384xf32>
    %cst_297 = arith.constant 1.000000e+00 : f32
    %337 = vector.broadcast %cst_297 : f32 to vector<8x384xf32>
    %338 = arith.divf %337, %336 : vector<8x384xf32>
    %339 = vector.extract_strided_slice %1 {offsets = [0, 0], sizes = [3, 384], strides = [1, 1]} : vector<8x384xf32> to vector<3x384xf32>
    %340 = vector.extract_strided_slice %338 {offsets = [0, 0], sizes = [3, 384], strides = [1, 1]} : vector<8x384xf32> to vector<3x384xf32>
    %341 = arith.subf %339, %340 : vector<3x384xf32>
    %c0_298 = arith.constant 0 : index
    %c0_299 = arith.constant 0 : index
    %c0_300 = arith.constant 0 : index
    %342 = vector.load %arg5[%c0_298, %c0_299, %c0_300] : memref<1x3x384xf32, #tpu.memory_space<vmem>>, vector<1x3x384xf32>
    %343 = vector.shape_cast %342 : vector<1x3x384xf32> to vector<3x384xf32>
    %344 = vector.shape_cast %341 : vector<3x384xf32> to vector<1x3x384xf32>
    tpu.vector_store %arg5[%c0_298, %c0_299, %c0_300], %344 {strides = array<i32>} : memref<1x3x384xf32, #tpu.memory_space<vmem>>, vector<1x3x384xf32>,
    return
  }
  func.func @transform_0(%arg0: i32) -> (i32, i32, i32) {
    %c0_i32 = arith.constant 0 : i32
    %c0_i32_0 = arith.constant 0 : i32
    %c0_i32_1 = arith.constant 0 : i32
    return %arg0, %c0_i32, %c0_i32_0 : i32, i32, i32
  }
  func.func @transform_1(%arg0: i32) -> (i32, i32, i32, i32) {
    %c0_i32 = arith.constant 0 : i32
    %c0_i32_0 = arith.constant 0 : i32
    %c0_i32_1 = arith.constant 0 : i32
    %c0_i32_2 = arith.constant 0 : i32
    %c0_i32_3 = arith.constant 0 : i32
    return %c0_i32, %c0_i32_0, %c0_i32_1, %c0_i32_2 : i32, i32, i32, i32
  }
  func.func @transform_2(%arg0: i32) -> (i32, i32, i32) {
    %c0_i32 = arith.constant 0 : i32
    %c0_i32_0 = arith.constant 0 : i32
    %c0_i32_1 = arith.constant 0 : i32
    %c0_i32_2 = arith.constant 0 : i32
    return %c0_i32, %c0_i32_0, %c0_i32_1 : i32, i32, i32
  }
  func.func @transform_3(%arg0: i32) -> (i32, i32) {
    %c0_i32 = arith.constant 0 : i32
    %c0_i32_0 = arith.constant 0 : i32
    %c0_i32_1 = arith.constant 0 : i32
    return %c0_i32, %c0_i32_0 : i32, i32
  }
  func.func @transform_4(%arg0: i32) -> (i32, i32, i32) {
    %c0_i32 = arith.constant 0 : i32
    %c0_i32_0 = arith.constant 0 : i32
    %c0_i32_1 = arith.constant 0 : i32
    return %arg0, %c0_i32, %c0_i32_0 : i32, i32, i32
  }
}

</mosaic_0001>

<bundles_post_ra>
// kernel: self_calibrated_forward.1
= control target key start
LH: loop header
LB: loop body
LE: loop exit
PB: predicated region body
PF: predicated region fallthrough
CT: control target
= control target key end

     0   :  { %s9631_s15 = smov 0   ;;  %s10936_s0 = inlined_call_operand.vmem [shape: f32[2,8,384], index: 0, kind: input, shape index: {}]   ;;  %s10937_s1 = inlined_call_operand.vmem [shape: f32[4,9,8,8], index: 1, kind: input, shape index: {}]   ;;  %s10938_s2 = inlined_call_operand.vmem [shape: f32[4,8,1], index: 2, kind: input, shape index: {}]   ;;  %s10939_s3 = inlined_call_operand.vmem [shape: f32[1,384], index: 3, kind: input, shape index: {}]   ;;  %s10940_s4 = inlined_call_operand.vmem [shape: f32[2,3,384], index: 4, kind: output, shape index: {}]  }
   0x1 LB: > { %s8920_s16 = sadd.s32 4294967295, %s9593_s15   ;;  %p8924_p0 = scmp.ge.s32.totalorder %s9593_s15, 1  ;;  %s9593_s15 = sphi %s9631_s15, %s14_s15  }
   0x2   : > { %p162_p1 = scmp.lt.s32.totalorder %s9593_s15, 3 }
   0x4   : > { %p163_p2 = pnand %p8924_p0, %p162_p1 }
   0x5   : > { %p188_p3 = scmp.lt.s32.totalorder (!%p163_p2), %s8920_s16, 1  ;;  %v9595_v0 = vmov (!%p163_p2), 0.0   ;;  %s9596_s17 = smov (!%p163_p2), 18   ;;  %vm9604_vm0 = vmmov (!%p163_p2), 0   ;;  %v1661_v4 = vld [vmem:[%s10938_s2] sm:$0xff] (!%p163_p2)  ;;  %v9605_v5 = vmov (!%p163_p2), 0  }
   0x6   : > { %166 = sbr.rel (%p163_p2) target bundleno = 2464 (0x9a0), region = 36  ;;  %209 = vrot.lane.b32.xlu1 (!%p163_p2), %v9595_v0, %s9596_s17  ;;  %292 = vmatprep.mubr.f32.mxu0 (!%p163_p2), %v9595_v0  ;;  %s9597_s22 = smov (!%p163_p2), 19   ;;  %vm217_vm1 = vcmask (!%p163_p2), 146432   ;;  %v9738_v12 = vld [vmem:[%s10937_s1 + $0x8] sm:$0xff] (!%p163_p2)  ;;  %vm224_vm2 = vcmask (!%p163_p2), 64512   ;;  %vm377_vm3 = vcmask (!%p163_p2), 154624  }
   0x7   : > { %9183 = vmatprep.subr.mxu1 (!%p163_p2), %v9595_v0  ;;  %s9598_s23 = smov (!%p163_p2), 17   ;;  %s9599_s24 = smov (!%p163_p2), 1   ;;  %9185 = vmatprep.mubr.msk.f32.mxu1 (!%p163_p2), %vm9604_vm0, %v9595_v0  ;;  %vm538_vm4 = vcmask (!%p163_p2), 138240   ;;  %v9758_v21 = vld [vmem:[%s10937_s1] sm:$0xff] (!%p163_p2)  ;;  %vm702_vm5 = vcmask (!%p163_p2), 7168   ;;  %v9778_v28 = vld [vmem:[%s10937_s1 + $0x10] sm:$0xff] (!%p163_p2) }
   0x8   : > { %s9600_s25 = smov (!%p163_p2), 127   ;;  %s9601_s26 = smov (!%p163_p2), 111   ;;  %9570 = vset.pattern.permute.xlu0 (!%p163_p2), %v9605_v5  ;;  %9571 = vset.pattern.permute.xlu1 (!%p163_p2), %v9605_v5  ;;  %vm1015_vm6 = vcmask (!%p163_p2), 1039360   ;;  %v8935_v34 = vld [vmem:[%s10937_s1 + $0x18] sm:$0xff] (!%p163_p2)  ;;  %vm1179_vm7 = vcmask (!%p163_p2), 908288   ;;  %v8938_v40 = vld [vmem:[%s10937_s1 + $0x20] sm:$0xff] (!%p163_p2) }
   0x9   : > { %s9602_s27 = smov (!%p163_p2), 110   ;;  %s9603_s28 = smov (!%p163_p2), 109   ;;  %vm1343_vm8 = vcmask (!%p163_p2), 900096   ;;  %v8941_v46 = vld [vmem:[%s10937_s1 + $0x28] sm:$0xff] (!%p163_p2)  ;;  %vm1507_vm9 = vcmask (!%p163_p2), 891904   ;;  %v8944_v55 = vld [vmem:[%s10937_s1 + $0x30] sm:$0xff] (!%p163_p2) }
   0xa   : > { %v8947_v60 = vld [vmem:[%s10937_s1 + $0x38] sm:$0xff] (!%p163_p2) }
   0xd   : > { %s10942_s16 = smov (!%p188_p3, %s8920_s16), 1 }
   0xe   : > { %s9549_s18 = smul.u32 24, %s10942_s16 }
   0xf   : > { %s9550_s20 = smul.u32 12, %s10942_s16 }
  0x10   : > { %s9649_s21 = scalar_lea.vmem %s10936_s0, %s9549_s18 }
  0x11   : > { %v9652_v1 = vld [vmem:[%s9649_s21] sm:$0xff]  ;;  %v9659_v2 = vld [vmem:[%s9649_s21 + $0x8] sm:$0xff]  ;;  %v9678_v3 = vld [vmem:[%s9649_s21 + $0x10] sm:$0xff] }
  0x12   : > { %371 = vrot.lane.b32.xlu1 %v9652_v1, %s9597_s22  ;;  %211 = vrot.lane.b32.xlu0 %v9652_v1, %s9596_s17 }
  0x16   : > { %369 = vrot.lane.b32.xlu1 %v9595_v0, %s9597_s22  ;;  %213 = vrot.lane.b32.xlu0 %v9659_v2, %s9596_s17 }
  0x1a   : > { %534 = vrot.lane.b32.xlu1 %v9659_v2, %s9598_s23  ;;  %373 = vrot.lane.b32.xlu0 %v9659_v2, %s9597_s22 }
  0x1e   : > { %696 = vrot.lane.b32.xlu1 %v9652_v1, %s9599_s24  ;;  %532 = vrot.lane.b32.xlu0 %v9652_v1, %s9598_s23 }
  0x22   : > { %694 = vrot.lane.b32.xlu1 %v9595_v0, %s9599_s24  ;;  %530 = vrot.lane.b32.xlu0 %v9595_v0, %s9598_s23 }
  0x26   : > { %1011 = vrot.lane.b32.xlu1 %v9678_v3, %s9600_s25  ;;  %698 = vrot.lane.b32.xlu0 %v9659_v2, %s9599_s24 }
  0x2a   : > { %1173 = vrot.lane.b32.xlu1 %v9659_v2, %s9601_s26  ;;  %1009 = vrot.lane.b32.xlu0 %v9659_v2, %s9600_s25 }
  0x2e   : > { %1171 = vrot.lane.b32.xlu1 %v9652_v1, %s9601_s26  ;;  %1007 = vrot.lane.b32.xlu0 %v9652_v1, %s9600_s25 }
  0x32   : > { %1339 = vrot.lane.b32.xlu1 %v9678_v3, %s9602_s27  ;;  %1175 = vrot.lane.b32.xlu0 %v9678_v3, %s9601_s26 }
  0x36   : > { %1501 = vrot.lane.b32.xlu1 %v9659_v2, %s9603_s28  ;;  %1337 = vrot.lane.b32.xlu0 %v9659_v2, %s9602_s27 }
  0x3a   : > { %1499 = vrot.lane.b32.xlu1 %v9652_v1, %s9603_s28  ;;  %1335 = vrot.lane.b32.xlu0 %v9652_v1, %s9602_s27 }
  0x3e   : > { %375 = vrot.lane.b32.xlu1 %v9678_v3, %s9597_s22  ;;  %1503 = vrot.lane.b32.xlu0 %v9678_v3, %s9603_s28 }
  0x42   : > { %700 = vrot.lane.b32.xlu1 %v9678_v3, %s9599_s24  ;;  %215 = vrot.lane.b32.xlu0 %v9678_v3, %s9596_s17 }
  0x46   : > { %1177 = vrot.lane.b32.xlu1 %v9595_v0, %s9601_s26  ;;  %536 = vrot.lane.b32.xlu0 %v9678_v3, %s9598_s23 }
  0x4a   : > { %1013 = vrot.lane.b32.xlu0 %v9595_v0, %s9600_s25  ;;  %1505 = vrot.lane.b32.xlu1 %v9595_v0, %s9603_s28 }
  0x4e   : > { %1341 = vrot.lane.b32.xlu0 %v9595_v0, %s9602_s27 }
  0x52   : > { %1664 = vperm.xlu0 %9570, %v1661_v4  }
  0x78   : > { %v9727_v6 = vpop.permute.xlu1 %209 }
  0x84   : > { %v372_v7 = vpop.permute.xlu1 %371  ;;  %v212_v8 = vpop.permute.xlu0 %211 }
  0x85   : > { %v218_v13 = vsel %vm217_vm1, %v9727_v6, %v212_v8 }
  0x88   : > { %v9729_v9 = vpop.permute.xlu1 %369  ;;  %v9731_v10 = vpop.permute.xlu0 %213 }
  0x89   : > { %v219_v11 = vsel %vm217_vm1, %v212_v8, %v9731_v10  ;;  %v378_v16 = vsel %vm377_vm3, %v9729_v9, %v372_v7 }
  0x8a   : > { %228 = vmatprep.subr.mxu0 %v219_v11 }
  0x8b   : > { %229 = vmatpush1.msra.mxu0 %v218_v13 }
  0x8c   : > { %v9742_v14 = vpop.permute.xlu1 %534  ;;  %8928 = vmatmul.mubr.msk.f32.vlgmr.msra.gmra.mrb[0].mxu0 %vm224_vm2, %v9738_v12  ;;  %v9746_v15 = vpop.permute.xlu0 %373 }
  0x8d   : > { %v379_v17 = vsel %vm377_vm3, %v372_v7, %v9746_v15  ;;  %451 = vmatprep.mubr.f32.mxu0 %v9595_v0 }
  0x8e   : > { %387 = vmatprep.subr.mxu0 %v379_v17 }
  0x8f   : > { %388 = vmatpush1.msra.mxu0 %v378_v16 }
  0x90   : > { %v697_v18 = vpop.permute.xlu1 %696  ;;  %v533_v19 = vpop.permute.xlu0 %532 }
  0x91   : > { %v540_v20 = vsel %vm538_vm4, %v533_v19, %v9742_v14 }
  0x92   : > { %548 = vmatprep.subr.mxu0 %v540_v20 }
  0x94   : > { %v9760_v22 = vpop.permute.xlu1 %694  ;;  %8930 = vmatmul.mubr.msk.f32.vlgmr.msra.gmra.mrb[0].mxu0 %vm224_vm2, %v9758_v21  ;;  %v9764_v23 = vpop.permute.xlu0 %530 }
  0x95   : > { %v539_v24 = vsel %vm538_vm4, %v9764_v23, %v533_v19  ;;  %612 = vmatprep.mubr.f32.mxu0 %v9595_v0  ;;  %v703_v29 = vsel %vm702_vm5, %v9760_v22, %v697_v18 }
  0x96   : > { %549 = vmatpush1.msra.mxu0 %v539_v24 }
  0x98   : > { %v9769_v25 = vpop.permute.xlu1 %1011  ;;  %v9771_v26 = vpop.permute.xlu0 %698 }
  0x99   : > { %v704_v27 = vsel %vm702_vm5, %v697_v18, %v9771_v26  ;;  %v1674_v18 = vlaneseq }
  0x9a   : > { %712 = vmatprep.subr.mxu0 %v704_v27 }
  0x9b   : > { %v1675_v24 = vshrl.u32 %v1674_v18, 7 }
  0x9c   : > { %v1174_v30 = vpop.permute.xlu1 %1173  ;;  %8933 = vmatmul.mubr.msk.f32.vlgmr.msra.gmra.mrb[0].mxu0 %vm224_vm2, %v9778_v28  ;;  %v1010_v31 = vpop.permute.xlu0 %1009 }
  0x9d   : > { %713 = vmatpush1.msra.mxu0 %v703_v29  ;;  %776 = vmatprep.mubr.f32.mxu0 %v9595_v0  ;;  %v1017_v35 = vsel %vm1015_vm6, %v1010_v31, %v9769_v25  ;;  %v201_v29 = vld [vmem:[%s10939_s3] sm:$0x7] }
  0x9e   : > { %861 = vmatprep.subr.mxu0 %v9659_v2  ;;  %v8950_v2 = vld [vmem:[%s10937_s1 + $0x40] sm:$0xff] }
  0xa0   : > { %v1172_v32 = vpop.permute.xlu1 %1171  ;;  %v1008_v33 = vpop.permute.xlu0 %1007 }
  0xa1   : > { %v1016_v41 = vsel %vm1015_vm6, %v1008_v33, %v1010_v31  ;;  %v1180_v47 = vsel %vm1179_vm7, %v1172_v32, %v1174_v30 }
  0xa4   : > { %v9791_v36 = vpop.permute.xlu1 %1339  ;;  %8936 = vmatmul.mubr.msk.f32.vlgmr.msra.gmra.mrb[0].mxu0 %vm224_vm2, %v8935_v34  ;;  %v9794_v37 = vpop.permute.xlu0 %1175 }
  0xa5   : > { %862 = vmatpush1.msra.mxu0 %v9652_v1  ;;  %925 = vmatprep.mubr.f32.mxu0 %v9595_v0  ;;  %v1181_v42 = vsel %vm1179_vm7, %v1174_v30, %v9794_v37 }
  0xa6   : > { %1025 = vmatprep.subr.mxu0 %v1017_v35 }
  0xa8   : > { %v1502_v38 = vpop.permute.xlu1 %1501  ;;  %v1338_v39 = vpop.permute.xlu0 %1337 }
  0xa9   : > { %v1345_v48 = vsel %vm1343_vm8, %v1338_v39, %v9791_v36 }
  0xac   : > { %8939 = vmatmul.mubr.msk.f32.vlgmr.msra.gmra.mrb[0].mxu0 %vm224_vm2, %v8938_v40  ;;  %v1336_v43 = vpop.permute.xlu0 %1335  ;;  %v1500_v44 = vpop.permute.xlu1 %1499 }
  0xad   : > { %1026 = vmatpush1.msra.mxu0 %v1016_v41  ;;  %1089 = vmatprep.mubr.f32.mxu0 %v9595_v0  ;;  %v1344_v56 = vsel %vm1343_vm8, %v1336_v43, %v1338_v39  ;;  %v1508_v61 = vsel %vm1507_vm9, %v1500_v44, %v1502_v38 }
  0xae   : > { %1189 = vmatprep.subr.mxu0 %v1181_v42 }
  0xb0   : > { %v9806_v45 = vpop.permute.xlu0 %1503  ;;  %v376_v49 = vpop.permute.xlu1 %375 }
  0xb1   : > { %v380_v52 = vsel %vm377_vm3, %v9746_v15, %v376_v49  ;;  %v1509_v58 = vsel %vm1507_vm9, %v1502_v38, %v9806_v45  ;;  %v1680_v38 = vsub.s32 1, %v1675_v24 }
  0xb4   : > { %8942 = vmatmul.mubr.msk.f32.vlgmr.msra.gmra.mrb[0].mxu0 %vm224_vm2, %v8941_v46  ;;  %v216_v50 = vpop.permute.xlu0 %215  ;;  %v701_v57 = vpop.permute.xlu1 %700 }
  0xb5   : > { %1190 = vmatpush1.msra.mxu0 %v1180_v47  ;;  %v220_v51 = vsel %vm217_vm1, %v9731_v10, %v216_v50  ;;  %1253 = vmatprep.mubr.f32.mxu0 %v9595_v0  ;;  %v705_v59 = vsel %vm702_vm5, %v9771_v26, %v701_v57 }
  0xb6   : > { %9184 = vmatpush3.msra.mxu1 %v220_v51  ;;  %1353 = vmatprep.subr.mxu0 %v1345_v48 }
  0xb7   : > { %9186 = vmatmul.mubr.msk.f32.vlgmr.msra.gmra.mrb[0].mxu1 %vm224_vm2, %v9738_v12  ;;  %9188 = vmatprep.subr.mxu1 %v9595_v0 }
  0xb8   : > { %9189 = vmatpush3.msra.mxu1 %v380_v52  ;;  %v537_v53 = vpop.permute.xlu0 %536  ;;  %9190 = vmatprep.mubr.msk.f32.mxu1 %vm9604_vm0, %v9595_v0  ;;  %v9865_v1 = vpop.permute.xlu1 %1177 }
  0xb9   : > { %v541_v54 = vsel %vm538_vm4, %v9742_v14, %v537_v53  ;;  %9193 = vmatprep.subr.mxu1 %v9595_v0 }
  0xbb   : > { %9191 = vmatmul.mubr.msk.f32.vlgmr.msra.gmra.mrb[2].mxu1 %vm224_vm2, %v9758_v21 }
  0xbc   : > { %9194 = vmatpush3.msra.mxu1 %v541_v54  ;;  %8945 = vmatmul.mubr.msk.f32.vlgmr.msra.gmra.mrb[0].mxu0 %vm224_vm2, %v8944_v55  ;;  %v9853_v62 = vpop.permute.xlu0 %1013  ;;  %v9888_v7 = vpop.permute.xlu1 %1505 }
  0xbd   : > { %1354 = vmatpush1.msra.mxu0 %v1344_v56  ;;  %9195 = vmatprep.mubr.msk.f32.mxu1 %vm9604_vm0, %v9595_v0  ;;  %v1018_v63 = vsel %vm1015_vm6, %v9769_v25, %v9853_v62  ;;  %v1510_v8 = vsel %vm1507_vm9, %v9806_v45, %v9888_v7 }
  0xbe   : > { %9198 = vmatprep.subr.mxu1 %v9595_v0  ;;  %1417 = vmatprep.mubr.f32.mxu0 %v9595_v0 }
  0xbf   : > { %9196 = vmatmul.mubr.msk.f32.vlgmr.msra.gmra.mrb[4].mxu1 %vm224_vm2, %v9778_v28  ;;  %1517 = vmatprep.subr.mxu0 %v1509_v58  ;;  %v1676_v28 = vsub.s32 0, %v1675_v24 }
  0xc0   : > { %9199 = vmatpush3.msra.mxu1 %v705_v59  ;;  %9200 = vmatprep.mubr.msk.f32.mxu1 %vm9604_vm0, %v9595_v0  ;;  %v9877_v4 = vpop.permute.xlu0 %1341  ;;  %v8980_v59 = vld [vmem:[%s10938_s2 + $0x8] sm:$0xff] }
  0xc1   : > { %9203 = vmatprep.subr.mxu1 %v9595_v0  ;;  %v1346_v5 = vsel %vm1343_vm8, %v9791_v36, %v9877_v4  ;;  %v9906_v35 = vrot.slane %v201_v29, %v1676_v28 }
  0xc3   : > { %9201 = vmatmul.mubr.msk.f32.vlgmr.msra.gmra.mrb[6].mxu1 %vm224_vm2, %v8935_v34 }
  0xc4   : > { %8948 = vmatmul.mubr.msk.f32.vlgmr.msra.gmra.mrb[0].mxu0 %vm224_vm2, %v8947_v60  ;;  %9204 = vmatpush3.msra.mxu1 %v9678_v3  ;;  %v1182_v3 = vsel %vm1179_vm7, %v9794_v37, %v9865_v1 }
  0xc5   : > { %1518 = vmatpush1.msra.mxu0 %v1508_v61  ;;  %9205 = vmatprep.mubr.msk.f32.mxu1 %vm9604_vm0, %v9595_v0 }
  0xc6   : > { %9208 = vmatprep.subr.mxu1 %v9595_v0  ;;  %1581 = vmatprep.mubr.f32.mxu0 %v9595_v0 }
  0xc7   : > { %9206 = vmatmul.mubr.msk.f32.vlgmr.msra.gmra.mrb[8].mxu1 %vm224_vm2, %v8938_v40 }
  0xc8   : > { %9209 = vmatpush3.msra.mxu1 %v1018_v63  ;;  %9210 = vmatprep.mubr.msk.f32.mxu1 %vm9604_vm0, %v9595_v0 }
  0xc9   : > { %9213 = vmatprep.subr.mxu1 %v9595_v0 }
  0xcb   : > { %9211 = vmatmul.mubr.msk.f32.vlgmr.msra.gmra.mrb[10].mxu1 %vm224_vm2, %v8941_v46  ;;  %v9911_v46 = vrot.slane %v201_v29, %v1680_v38 }
  0xcc   : > { %9214 = vmatpush3.msra.mxu1 %v1182_v3  ;;  %8951 = vmatmul.mubr.msk.f32.vlgmr.msra.gmra.mrb[0].mxu0 %vm224_vm2, %v8950_v2 }
  0xcd   : > { %9215 = vmatprep.mubr.msk.f32.mxu1 %vm9604_vm0, %v9595_v0  ;;  %9218 = vmatprep.subr.mxu1 %v9595_v0 }
  0xce   : > { %1778 = vmatprep.mubr.f32.mxu0 %v9595_v0 }
  0xcf   : > { %9216 = vmatmul.mubr.msk.f32.vlgmr.msra.gmra.mrb[12].mxu1 %vm224_vm2, %v8944_v55  ;;  %v1684_v55 = vsub.s32 2, %v1675_v24 }
  0xd0   : > { %9219 = vmatpush3.msra.mxu1 %v1346_v5  ;;  %9220 = vmatprep.mubr.msk.f32.mxu1 %vm9604_vm0, %v9595_v0  ;;  %v9976_v5 = vld [vmem:[%s10937_s1 + $0x50] sm:$0xff] }
  0xd1   : > { %9223 = vmatprep.subr.mxu1 %v9595_v0  ;;  %v1665_v30 = vpop.permute.xlu0 %1664  ;;  %v9932_v57 = vrot.slane %v201_v29, %v1684_v55 }
  0xd3   : > { %9221 = vmatmul.mubr.msk.f32.vlgmr.msra.gmra.mrb[14].mxu1 %vm224_vm2, %v8947_v60 }
  0xd4   : > { %9224 = vmatpush3.msra.mxu1 %v1510_v8  ;;  %9225 = vmatprep.mubr.msk.f32.mxu1 %vm9604_vm0, %v9595_v0 }
  0xd5   : > { %9228 = vmatprep.subr.mxu1 %v9595_v0 }
  0xd7   : > { %9226 = vmatmul.mubr.msk.f32.vlgmr.msra.gmra.mrb[16].mxu1 %vm224_vm2, %v8950_v2 }
  0xd8   : > { %9230 = vmatprep.mubr.msk.f32.mxu1 %vm9604_vm0, %v9595_v0 }
 0x18a   : > { %v365_v10 = vpop.f32.mrb[0].mxu1 }
 0x18b   : > { %v9187_v11 = vpop.f32.mrb[1].mxu1 }
 0x18e   : > { %v524_v12 = vpop.f32.mrb[2].mxu1 }
 0x18f   : > { %v525_v13 = vadd.f32 %v524_v12, %v365_v10  ;;  %v9192_v14 = vpop.f32.mrb[3].mxu1 }
 0x192   : > { %v685_v15 = vpop.f32.mrb[4].mxu1 }
 0x193   : > { %v691_v16 = vadd.f32 %v685_v15, %v525_v13  ;;  %v9197_v17 = vpop.f32.mrb[5].mxu1 }
 0x194   : > { %v9990_v17 = vld [vmem:[%s10937_s1 + $0x48] sm:$0xff] }
 0x196   : > { %v849_v19 = vpop.f32.mrb[6].mxu1 }
 0x197   : > { %v855_v20 = vadd.f32 %v849_v19, %v691_v16  ;;  %v9202_v21 = vpop.f32.mrb[7].mxu1 }
 0x19a   : > { %v998_v25 = vpop.f32.mrb[8].mxu1 }
 0x19b   : > { %v1004_v26 = vadd.f32 %v998_v25, %v855_v20  ;;  %v9207_v27 = vpop.f32.mrb[9].mxu1 }
 0x19e   : > { %v1162_v31 = vpop.f32.mrb[10].mxu1 }
 0x19f   : > { %v1583_v32 = vpop.f32.mrb[0].mxu0  ;;  %v1168_v33 = vadd.f32 %v1162_v31, %v1004_v26  ;;  %v9212_v34 = vpop.f32.mrb[11].mxu1  ;;  %v10005_v26 = vld [vmem:[%s10937_s1 + $0x58] sm:$0xff] }
 0x1a0   : > { %v1667_v36 = vadd.f32 %v1665_v30, %v1583_v32  ;;  %v1585_v37 = vpop.f32.mrb[1].mxu0  ;;  %v10016_v32 = vld [vmem:[%s10937_s1 + $0x60] sm:$0xff] }
 0x1a1   : > { %v1668_v39 = vadd.f32 %v1665_v30, %v1585_v37 }
 0x1a2   : > { %v1670_v40 = vmax.f32 %v1667_v36, 0.0  ;;  %v1326_v41 = vpop.f32.mrb[12].mxu1 }
 0x1a3   : > { %v1332_v42 = vadd.f32 %v1326_v41, %v1168_v33  ;;  %v9217_v43 = vpop.f32.mrb[13].mxu1  ;;  %v1671_v45 = vmax.f32 %v1668_v39, 0.0 }
 0x1a4   : > { %v9909_v44 = vmul.f32 %v9906_v35, %v1670_v40  ;;  %v10032_v40 = vld [vmem:[%s10937_s1 + $0x68] sm:$0xff] }
 0x1a5   : > { %v9918_v50 = vmul.f32 %v9911_v46, %v1671_v45 }
 0x1a6   : > { %1855 = vrot.lane.b32.xlu0 %v9909_v44, %s9597_s22  ;;  %1699 = vrot.lane.b32.xlu1 %v9909_v44, %s9596_s17  ;;  %v1490_v47 = vpop.f32.mrb[14].mxu1 }
 0x1a7   : > { %v1496_v48 = vadd.f32 %v1490_v47, %v1332_v42  ;;  %v9222_v49 = vpop.f32.mrb[15].mxu1 }
 0x1a8   : > { %v10049_v49 = vld [vmem:[%s10937_s1 + $0x70] sm:$0xff] }
 0x1aa   : > { %v1654_v51 = vpop.f32.mrb[16].mxu1  ;;  %2013 = vrot.lane.b32.xlu0 %v9909_v44, %s9598_s23  ;;  %1701 = vrot.lane.b32.xlu1 %v9918_v50, %s9596_s17 }
 0x1ab   : > { %v1660_v52 = vadd.f32 %v1654_v51, %v1496_v48  ;;  %v9227_v53 = vpop.f32.mrb[17].mxu1 }
 0x1ad   : > { %v1669_v54 = vadd.f32 %v1665_v30, %v1660_v52 }
 0x1ae   : > { %2174 = vrot.lane.b32.xlu0 %v9909_v44, %s9599_s24  ;;  %1857 = vrot.lane.b32.xlu1 %v9918_v50, %s9597_s22 }
 0x1af   : > { %v1672_v56 = vmax.f32 %v1669_v54, 0.0 }
 0x1b1   : > { %v9939_v58 = vmul.f32 %v9932_v57, %v1672_v56  ;;  %v10073_v56 = vld [vmem:[%s10937_s1 + $0x78] sm:$0xff] }
 0x1b2   : > { %2486 = vrot.lane.b32.xlu0 %v9918_v50, %s9600_s25  ;;  %2015 = vrot.lane.b32.xlu1 %v9918_v50, %s9598_s23 }
 0x1b6   : > { %2484 = vrot.lane.b32.xlu0 %v9909_v44, %s9600_s25  ;;  %2176 = vrot.lane.b32.xlu1 %v9918_v50, %s9599_s24 }
 0x1ba   : > { %2649 = vrot.lane.b32.xlu0 %v9939_v58, %s9601_s26  ;;  %2488 = vrot.lane.b32.xlu1 %v9939_v58, %s9600_s25 }
 0x1be   : > { %2808 = vrot.lane.b32.xlu0 %v9918_v50, %s9602_s27  ;;  %2647 = vrot.lane.b32.xlu1 %v9918_v50, %s9601_s26 }
 0x1c2   : > { %2806 = vrot.lane.b32.xlu0 %v9909_v44, %s9602_s27  ;;  %2645 = vrot.lane.b32.xlu1 %v9909_v44, %s9601_s26 }
 0x1c6   : > { %2971 = vrot.lane.b32.xlu0 %v9939_v58, %s9603_s28  ;;  %2810 = vrot.lane.b32.xlu1 %v9939_v58, %s9602_s27 }
 0x1ca   : > { %1703 = vrot.lane.b32.xlu0 %v9939_v58, %s9596_s17  ;;  %2969 = vrot.lane.b32.xlu1 %v9918_v50, %s9603_s28 }
 0x1ce   : > { %2017 = vrot.lane.b32.xlu0 %v9939_v58, %s9598_s23  ;;  %2967 = vrot.lane.b32.xlu1 %v9909_v44, %s9603_s28 }
 0x1d2   : > { %3130 = vperm.xlu0 %9570, %v8980_v59   ;;  %1859 = vrot.lane.b32.xlu1 %v9939_v58, %s9597_s22 }
 0x1d6   : > { %2178 = vrot.lane.b32.xlu1 %v9939_v58, %s9599_s24 }
 0x218   : > { %v1856_v60 = vpop.permute.xlu0 %1855  ;;  %v1700_v61 = vpop.permute.xlu1 %1699 }
 0x219   : > { %v1705_v8 = vsel %vm217_vm1, %v9727_v6, %v1700_v61  ;;  %v1861_v13 = vsel %vm377_vm3, %v9729_v9, %v1856_v60 }
 0x21c   : > { %v2014_v63 = vpop.permute.xlu0 %2013  ;;  %v1702_v2 = vpop.permute.xlu1 %1701 }
 0x21d   : > { %v1706_v3 = vsel %vm217_vm1, %v1700_v61, %v1702_v2  ;;  %v2019_v19 = vsel %vm538_vm4, %v9764_v23, %v2014_v63 }
 0x21e   : > { %1714 = vmatprep.subr.mxu0 %v1706_v3 }
 0x21f   : > { %1715 = vmatpush1.msra.mxu0 %v1705_v8 }
 0x220   : > { %v2175_v10 = vpop.permute.xlu0 %2174  ;;  %8955 = vmatmul.mubr.msk.f32.vlgmr.msra.gmra.mrb[2].mxu0 %vm224_vm2, %v9976_v5  ;;  %v1858_v11 = vpop.permute.xlu1 %1857 }
 0x221   : > { %v1862_v12 = vsel %vm377_vm3, %v1856_v60, %v1858_v11  ;;  %1934 = vmatprep.mubr.f32.mxu0 %v9595_v0  ;;  %v2180_v28 = vsel %vm702_vm5, %v9760_v22, %v2175_v10 }
 0x222   : > { %1870 = vmatprep.subr.mxu0 %v1862_v12 }
 0x223   : > { %1871 = vmatpush1.msra.mxu0 %v1861_v13 }
 0x224   : > { %v2487_v14 = vpop.permute.xlu0 %2486  ;;  %v2016_v15 = vpop.permute.xlu1 %2015 }
 0x225   : > { %v2020_v16 = vsel %vm538_vm4, %v2014_v63, %v2016_v15  ;;  %v10098_v63 = vld [vmem:[%s10937_s1 + $0x80] sm:$0xff] }
 0x226   : > { %2028 = vmatprep.subr.mxu0 %v2020_v16 }
 0x228   : > { %v2485_v18 = vpop.permute.xlu0 %2484  ;;  %8957 = vmatmul.mubr.msk.f32.vlgmr.msra.gmra.mrb[2].mxu0 %vm224_vm2, %v9990_v17  ;;  %v2177_v20 = vpop.permute.xlu1 %2176 }
 0x229   : > { %2029 = vmatpush1.msra.mxu0 %v2019_v19  ;;  %v2181_v21 = vsel %vm702_vm5, %v2175_v10, %v2177_v20  ;;  %2092 = vmatprep.mubr.f32.mxu0 %v9595_v0  ;;  %v2490_v41 = vsel %vm1015_vm6, %v2485_v18, %v2487_v14  ;;  %v10123_v10 = vld [vmem:[%s10937_s1 + $0x88] sm:$0xff] }
 0x22a   : > { %2189 = vmatprep.subr.mxu0 %v2181_v21 }
 0x22c   : > { %v9998_v24 = vpop.permute.xlu0 %2649  ;;  %v10000_v25 = vpop.permute.xlu1 %2488 }
 0x22d   : > { %v2491_v36 = vsel %vm1015_vm6, %v2487_v14, %v10000_v25  ;;  %v2492_v61 = vsel %vm1015_vm6, %v10000_v25, %v9853_v62 }
 0x230   : > { %v2809_v27 = vpop.permute.xlu0 %2808  ;;  %8960 = vmatmul.mubr.msk.f32.vlgmr.msra.gmra.mrb[2].mxu0 %vm224_vm2, %v10005_v26  ;;  %v2648_v29 = vpop.permute.xlu1 %2647 }
 0x231   : > { %2190 = vmatpush1.msra.mxu0 %v2180_v28  ;;  %2253 = vmatprep.mubr.f32.mxu0 %v9595_v0  ;;  %v2652_v43 = vsel %vm1179_vm7, %v2648_v29, %v9998_v24 }
 0x232   : > { %2338 = vmatprep.subr.mxu0 %v9918_v50 }
 0x234   : > { %v2807_v30 = vpop.permute.xlu0 %2806  ;;  %v2646_v31 = vpop.permute.xlu1 %2645 }
 0x235   : > { %v2651_v52 = vsel %vm1179_vm7, %v2646_v31, %v2648_v29  ;;  %v2812_v59 = vsel %vm1343_vm8, %v2807_v30, %v2809_v27 }
 0x238   : > { %v10018_v33 = vpop.permute.xlu0 %2971  ;;  %8963 = vmatmul.mubr.msk.f32.vlgmr.msra.gmra.mrb[2].mxu0 %vm224_vm2, %v10016_v32  ;;  %v10022_v34 = vpop.permute.xlu1 %2810 }
 0x239   : > { %2339 = vmatpush1.msra.mxu0 %v9909_v44  ;;  %2402 = vmatprep.mubr.f32.mxu0 %v9595_v0  ;;  %v2813_v55 = vsel %vm1343_vm8, %v2809_v27, %v10022_v34  ;;  %v2814_v8 = vsel %vm1343_vm8, %v10022_v34, %v9877_v4 }
 0x23a   : > { %2499 = vmatprep.subr.mxu0 %v2491_v36 }
 0x23c   : > { %v1704_v37 = vpop.permute.xlu0 %1703  ;;  %v2970_v38 = vpop.permute.xlu1 %2969 }
 0x23d   : > { %v1707_v39 = vsel %vm217_vm1, %v1702_v2, %v1704_v37  ;;  %v2974_v60 = vsel %vm1507_vm9, %v2970_v38, %v10018_v33  ;;  %v2653_v2 = vsel %vm1179_vm7, %v9998_v24, %v9865_v1 }
 0x23e   : > { %9229 = vmatpush3.msra.mxu1 %v1707_v39 }
 0x23f   : > { %9231 = vmatmul.mubr.msk.f32.vlgmr.msra.gmra.mrb[18].mxu1 %vm224_vm2, %v9976_v5  ;;  %9233 = vmatprep.subr.mxu1 %v9595_v0 }
 0x240   : > { %8966 = vmatmul.mubr.msk.f32.vlgmr.msra.gmra.mrb[2].mxu0 %vm224_vm2, %v10032_v40  ;;  %v2968_v42 = vpop.permute.xlu1 %2967  ;;  %9235 = vmatprep.mubr.msk.f32.mxu1 %vm9604_vm0, %v9595_v0  ;;  %v2018_v45 = vpop.permute.xlu0 %2017 }
 0x241   : > { %2500 = vmatpush1.msra.mxu0 %v2490_v41  ;;  %2563 = vmatprep.mubr.f32.mxu0 %v9595_v0  ;;  %v2021_v51 = vsel %vm538_vm4, %v2016_v15, %v2018_v45  ;;  %v2973_v3 = vsel %vm1507_vm9, %v2968_v42, %v2970_v38 }
 0x242   : > { %2660 = vmatprep.subr.mxu0 %v2652_v43 }
 0x244   : > { %v1860_v47 = vpop.permute.xlu1 %1859 }
 0x245   : > { %v1863_v48 = vsel %vm377_vm3, %v1858_v11, %v1860_v47  ;;  %v2975_v11 = vsel %vm1507_vm9, %v10018_v33, %v9888_v7 }
 0x246   : > { %9234 = vmatpush3.msra.mxu1 %v1863_v48 }
 0x247   : > { %9236 = vmatmul.mubr.msk.f32.vlgmr.msra.gmra.mrb[20].mxu1 %vm224_vm2, %v9990_v17  ;;  %9238 = vmatprep.subr.mxu1 %v9595_v0 }
 0x248   : > { %9239 = vmatpush3.msra.mxu1 %v2021_v51  ;;  %8969 = vmatmul.mubr.msk.f32.vlgmr.msra.gmra.mrb[2].mxu0 %vm224_vm2, %v10049_v49  ;;  %v2179_v53 = vpop.permute.xlu1 %2178 }
 0x249   : > { %2661 = vmatpush1.msra.mxu0 %v2651_v52  ;;  %v2182_v54 = vsel %vm702_vm5, %v2177_v20, %v2179_v53  ;;  %9240 = vmatprep.mubr.msk.f32.mxu1 %vm9604_vm0, %v9595_v0 }
 0x24a   : > { %2821 = vmatprep.subr.mxu0 %v2813_v55  ;;  %9243 = vmatprep.subr.mxu1 %v9595_v0 }
 0x24b   : > { %9241 = vmatmul.mubr.msk.f32.vlgmr.msra.gmra.mrb[22].mxu1 %vm224_vm2, %v10005_v26  ;;  %2724 = vmatprep.mubr.f32.mxu0 %v9595_v0 }
 0x24c   : > { %9244 = vmatpush3.msra.mxu1 %v2182_v54  ;;  %9245 = vmatprep.mubr.msk.f32.mxu1 %vm9604_vm0, %v9595_v0 }
 0x24d   : > { %9248 = vmatprep.subr.mxu1 %v9595_v0 }
 0x24f   : > { %9246 = vmatmul.mubr.msk.f32.vlgmr.msra.gmra.mrb[24].mxu1 %vm224_vm2, %v10016_v32 }
 0x250   : > { %9249 = vmatpush3.msra.mxu1 %v9939_v58  ;;  %8972 = vmatmul.mubr.msk.f32.vlgmr.msra.gmra.mrb[2].mxu0 %vm224_vm2, %v10073_v56 }
 0x251   : > { %2822 = vmatpush1.msra.mxu0 %v2812_v59  ;;  %9250 = vmatprep.mubr.msk.f32.mxu1 %vm9604_vm0, %v9595_v0  ;;  %v10140_v38 = vpop.permute.xlu0 %3130 }
 0x252   : > { %2982 = vmatprep.subr.mxu0 %v2974_v60  ;;  %9253 = vmatprep.subr.mxu1 %v9595_v0 }
 0x253   : > { %9251 = vmatmul.mubr.msk.f32.vlgmr.msra.gmra.mrb[26].mxu1 %vm224_vm2, %v10032_v40  ;;  %2885 = vmatprep.mubr.f32.mxu0 %v9595_v0 }
 0x254   : > { %9254 = vmatpush3.msra.mxu1 %v2492_v61  ;;  %9255 = vmatprep.mubr.msk.f32.mxu1 %vm9604_vm0, %v9595_v0 }
 0x255   : > { %9258 = vmatprep.subr.mxu1 %v9595_v0 }
 0x257   : > { %9256 = vmatmul.mubr.msk.f32.vlgmr.msra.gmra.mrb[28].mxu1 %vm224_vm2, %v10049_v49 }
 0x258   : > { %9259 = vmatpush3.msra.mxu1 %v2653_v2  ;;  %8975 = vmatmul.mubr.msk.f32.vlgmr.msra.gmra.mrb[2].mxu0 %vm224_vm2, %v10098_v63 }
 0x259   : > { %2983 = vmatpush1.msra.mxu0 %v2973_v3  ;;  %9260 = vmatprep.mubr.msk.f32.mxu1 %vm9604_vm0, %v9595_v0 }
 0x25a   : > { %9263 = vmatprep.subr.mxu1 %v9595_v0  ;;  %3046 = vmatprep.mubr.f32.mxu0 %v9595_v0 }
 0x25b   : > { %9261 = vmatmul.mubr.msk.f32.vlgmr.msra.gmra.mrb[30].mxu1 %vm224_vm2, %v10073_v56 }
 0x25c   : > { %9264 = vmatpush3.msra.mxu1 %v2814_v8  ;;  %9265 = vmatprep.mubr.msk.f32.mxu1 %vm9604_vm0, %v9595_v0  ;;  %v9008_v8 = vld [vmem:[%s10938_s2 + $0x10] sm:$0xff] }
 0x25d   : > { %9268 = vmatprep.subr.mxu1 %v9595_v0 }
 0x25f   : > { %9266 = vmatmul.mubr.msk.f32.vlgmr.msra.gmra.mrb[32].mxu1 %vm224_vm2, %v10098_v63 }
 0x260   : > { %9269 = vmatpush3.msra.mxu1 %v2975_v11  ;;  %8978 = vmatmul.mubr.msk.f32.vlgmr.msra.gmra.mrb[2].mxu0 %vm224_vm2, %v10123_v10 }
 0x261   : > { %9270 = vmatprep.mubr.msk.f32.mxu1 %vm9604_vm0, %v9595_v0  ;;  %3228 = vmatprep.mubr.f32.mxu0 %v9595_v0 }
 0x262   : > { %9273 = vmatprep.subr.mxu1 %v9595_v0 }
 0x263   : > { %9271 = vmatmul.mubr.msk.f32.vlgmr.msra.gmra.mrb[34].mxu1 %vm224_vm2, %v10123_v10 }
 0x264   : > { %9275 = vmatprep.mubr.msk.f32.mxu1 %vm9604_vm0, %v9595_v0 }
 0x312   : > { %v1851_v12 = vpop.f32.mrb[18].mxu1 }
 0x313   : > { %v9232_v13 = vpop.f32.mrb[19].mxu1 }
 0x31a   : > { %v2007_v14 = vpop.f32.mrb[20].mxu1 }
 0x31b   : > { %v2008_v15 = vadd.f32 %v2007_v14, %v1851_v12  ;;  %v9237_v16 = vpop.f32.mrb[21].mxu1  ;;  %v10209_v14 = vld [vmem:[%s10937_s1 + $0x98] sm:$0xff] }
 0x31e   : > { %v2165_v18 = vpop.f32.mrb[22].mxu1 }
 0x31f   : > { %v2171_v19 = vadd.f32 %v2165_v18, %v2008_v15  ;;  %v9242_v20 = vpop.f32.mrb[23].mxu1 }
 0x322   : > { %v2326_v21 = vpop.f32.mrb[24].mxu1 }
 0x323   : > { %v2332_v24 = vadd.f32 %v2326_v21, %v2171_v19  ;;  %v9247_v25 = vpop.f32.mrb[25].mxu1 }
 0x326   : > { %v2475_v27 = vpop.f32.mrb[26].mxu1 }
 0x327   : > { %v2481_v28 = vadd.f32 %v2475_v27, %v2332_v24  ;;  %v9252_v29 = vpop.f32.mrb[27].mxu1  ;;  %v10223_v27 = vld [vmem:[%s10937_s1 + $0x90] sm:$0xff] }
 0x32a   : > { %v2636_v30 = vpop.f32.mrb[28].mxu1 }
 0x32b   : > { %v2642_v31 = vadd.f32 %v2636_v30, %v2481_v28  ;;  %v9257_v33 = vpop.f32.mrb[29].mxu1 }
 0x32e   : > { %v2797_v34 = vpop.f32.mrb[30].mxu1 }
 0x32f   : > { %v2803_v36 = vadd.f32 %v2797_v34, %v2642_v31  ;;  %v9262_v37 = vpop.f32.mrb[31].mxu1 }
 0x332   : > { %v2958_v39 = vpop.f32.mrb[32].mxu1 }
 0x333   : > { %v3048_v41 = vpop.f32.mrb[2].mxu0  ;;  %v2964_v42 = vadd.f32 %v2958_v39, %v2803_v36  ;;  %v9267_v43 = vpop.f32.mrb[33].mxu1  ;;  %v10239_v36 = vld [vmem:[%s10937_s1 + $0xa0] sm:$0xff] }
 0x334   : > { %v3133_v45 = vadd.f32 %v10140_v38, %v3048_v41  ;;  %v3050_v47 = vpop.f32.mrb[3].mxu0 }
 0x335   : > { %v3134_v48 = vadd.f32 %v10140_v38, %v3050_v47 }
 0x336   : > { %v3136_v51 = vmax.f32 %v3133_v45, 0.0  ;;  %v3119_v52 = vpop.f32.mrb[34].mxu1  ;;  %v10252_v45 = vld [vmem:[%s10937_s1 + $0xa8] sm:$0xff] }
 0x337   : > { %v3137_v53 = vmax.f32 %v3134_v48, 0.0  ;;  %v3125_v54 = vadd.f32 %v3119_v52, %v2964_v42  ;;  %v9272_v55 = vpop.f32.mrb[35].mxu1 }
 0x338   : > { %v10145_v59 = vmul.f32 %v3136_v51, %v9906_v35 }
 0x339   : > { %v10148_v60 = vmul.f32 %v3137_v53, %v9911_v46  ;;  %v3135_v61 = vadd.f32 %v10140_v38, %v3125_v54  ;;  %v10265_v54 = vld [vmem:[%s10937_s1 + $0xb0] sm:$0xff] }
 0x33a   : > { %3149 = vrot.lane.b32.xlu1 %v10145_v59, %s9596_s17 }
 0x33b   : > { %3151 = vrot.lane.b32.xlu0 %v10148_v60, %s9596_s17  ;;  %v3138_v2 = vmax.f32 %v3135_v61, 0.0 }
 0x33d   : > { %v10168_v3 = vmul.f32 %v3138_v2, %v9932_v57 }
 0x33e   : > { %3305 = vrot.lane.b32.xlu1 %v10145_v59, %s9597_s22 }
 0x33f   : > { %3307 = vrot.lane.b32.xlu0 %v10148_v60, %s9597_s22 }
 0x342   : > { %3463 = vrot.lane.b32.xlu1 %v10145_v59, %s9598_s23 }
 0x343   : > { %3465 = vrot.lane.b32.xlu0 %v10148_v60, %s9598_s23 }
 0x346   : > { %3624 = vrot.lane.b32.xlu1 %v10145_v59, %s9599_s24 }
 0x347   : > { %3626 = vrot.lane.b32.xlu0 %v10148_v60, %s9599_s24 }
 0x34a   : > { %3936 = vrot.lane.b32.xlu1 %v10148_v60, %s9600_s25 }
 0x34b   : > { %3938 = vrot.lane.b32.xlu0 %v10168_v3, %s9600_s25 }
 0x34e   : > { %3934 = vrot.lane.b32.xlu1 %v10145_v59, %s9600_s25 }
 0x34f   : > { %4097 = vrot.lane.b32.xlu0 %v10148_v60, %s9601_s26 }
 0x352   : > { %4099 = vrot.lane.b32.xlu1 %v10168_v3, %s9601_s26 }
 0x353   : > { %4095 = vrot.lane.b32.xlu0 %v10145_v59, %s9601_s26 }
 0x356   : > { %4258 = vrot.lane.b32.xlu1 %v10148_v60, %s9602_s27 }
 0x357   : > { %4260 = vrot.lane.b32.xlu0 %v10168_v3, %s9602_s27 }
 0x35a   : > { %4256 = vrot.lane.b32.xlu1 %v10145_v59, %s9602_s27 }
 0x35b   : > { %4419 = vrot.lane.b32.xlu0 %v10148_v60, %s9603_s28 }
 0x35e   : > { %4421 = vrot.lane.b32.xlu1 %v10168_v3, %s9603_s28 }
 0x35f   : > { %4417 = vrot.lane.b32.xlu0 %v10145_v59, %s9603_s28 }
 0x362   : > { %3153 = vrot.lane.b32.xlu1 %v10168_v3, %s9596_s17 }
 0x363   : > { %3309 = vrot.lane.b32.xlu0 %v10168_v3, %s9597_s22 }
 0x366   : > { %3467 = vrot.lane.b32.xlu1 %v10168_v3, %s9598_s23 }
 0x367   : > { %3628 = vrot.lane.b32.xlu0 %v10168_v3, %s9599_s24 }
 0x36a   : > { %4580 = vperm.xlu1 %9571, %v9008_v8  }
 0x3ac   : > { %v3150_v11 = vpop.permute.xlu1 %3149 }
 0x3ad   : > { %v3152_v12 = vpop.permute.xlu0 %3151  ;;  %v3155_v15 = vsel %vm217_vm1, %v9727_v6, %v3150_v11 }
 0x3ae   : > { %v3156_v13 = vsel %vm217_vm1, %v3150_v11, %v3152_v12 }
 0x3af   : > { %3164 = vmatprep.subr.mxu0 %v3156_v13 }
 0x3b0   : > { %3165 = vmatpush1.msra.mxu0 %v3155_v15  ;;  %v3306_v16 = vpop.permute.xlu1 %3305  ;;  %v10280_v15 = vld [vmem:[%s10937_s1 + $0xb8] sm:$0xff] }
 0x3b1   : > { %v3308_v18 = vpop.permute.xlu0 %3307  ;;  %8983 = vmatmul.mubr.msk.f32.vlgmr.msra.gmra.mrb[4].mxu0 %vm224_vm2, %v10209_v14  ;;  %v3311_v20 = vsel %vm377_vm3, %v9729_v9, %v3306_v16 }
 0x3b2   : > { %v3312_v19 = vsel %vm377_vm3, %v3306_v16, %v3308_v18  ;;  %3384 = vmatprep.mubr.f32.mxu0 %v9595_v0 }
 0x3b3   : > { %3320 = vmatprep.subr.mxu0 %v3312_v19 }
 0x3b4   : > { %3321 = vmatpush1.msra.mxu0 %v3311_v20  ;;  %v3464_v21 = vpop.permute.xlu1 %3463 }
 0x3b5   : > { %v3466_v24 = vpop.permute.xlu0 %3465  ;;  %v3469_v29 = vsel %vm538_vm4, %v9764_v23, %v3464_v21 }
 0x3b6   : > { %v3470_v25 = vsel %vm538_vm4, %v3464_v21, %v3466_v24  ;;  %v10303_v21 = vld [vmem:[%s10937_s1 + $0xc0] sm:$0xff] }
 0x3b7   : > { %3478 = vmatprep.subr.mxu0 %v3470_v25 }
 0x3b8   : > { %v3625_v28 = vpop.permute.xlu1 %3624 }
 0x3b9   : > { %v10227_v30 = vpop.permute.xlu0 %3626  ;;  %8985 = vmatmul.mubr.msk.f32.vlgmr.msra.gmra.mrb[4].mxu0 %vm224_vm2, %v10223_v27  ;;  %v3630_v39 = vsel %vm702_vm5, %v9760_v22, %v3625_v28 }
 0x3ba   : > { %3479 = vmatpush1.msra.mxu0 %v3469_v29  ;;  %v3631_v31 = vsel %vm702_vm5, %v3625_v28, %v10227_v30  ;;  %3542 = vmatprep.mubr.f32.mxu0 %v9595_v0  ;;  %v10327_v29 = vld [vmem:[%s10937_s1 + $0xc8] sm:$0xff] }
 0x3bb   : > { %3639 = vmatprep.subr.mxu0 %v3631_v31 }
 0x3bc   : > { %v3937_v33 = vpop.permute.xlu1 %3936 }
 0x3bd   : > { %v10234_v34 = vpop.permute.xlu0 %3938 }
 0x3be   : > { %v3941_v51 = vsel %vm1015_vm6, %v3937_v33, %v10234_v34 }
 0x3c0   : > { %v3935_v37 = vpop.permute.xlu1 %3934 }
 0x3c1   : > { %v4098_v41 = vpop.permute.xlu0 %4097  ;;  %8988 = vmatmul.mubr.msk.f32.vlgmr.msra.gmra.mrb[4].mxu0 %vm224_vm2, %v10239_v36 }
 0x3c2   : > { %3640 = vmatpush1.msra.mxu0 %v3630_v39  ;;  %3703 = vmatprep.mubr.f32.mxu0 %v9595_v0 }
 0x3c3   : > { %3788 = vmatprep.subr.mxu0 %v10148_v60  ;;  %v3940_v60 = vsel %vm1015_vm6, %v3935_v37, %v3937_v33  ;;  %v10352_v33 = vld [vmem:[%s10937_s1 + $0xd0] sm:$0xff] }
 0x3c4   : > { %v10247_v42 = vpop.permute.xlu1 %4099 }
 0x3c5   : > { %v4096_v43 = vpop.permute.xlu0 %4095  ;;  %v4103_v31 = vsel %vm1179_vm7, %v10247_v42, %v9865_v1 }
 0x3c8   : > { %v4259_v47 = vpop.permute.xlu1 %4258 }
 0x3c9   : > { %v10254_v48 = vpop.permute.xlu0 %4260  ;;  %8991 = vmatmul.mubr.msk.f32.vlgmr.msra.gmra.mrb[4].mxu0 %vm224_vm2, %v10252_v45 }
 0x3ca   : > { %3789 = vmatpush1.msra.mxu0 %v10145_v59  ;;  %3852 = vmatprep.mubr.f32.mxu0 %v9595_v0  ;;  %v4102_v59 = vsel %vm1179_vm7, %v4098_v41, %v10247_v42  ;;  %v4263_v19 = vsel %vm1343_vm8, %v4259_v47, %v10254_v48 }
 0x3cb   : > { %3949 = vmatprep.subr.mxu0 %v3941_v51 }
 0x3cc   : > { %v4257_v52 = vpop.permute.xlu1 %4256 }
 0x3cd   : > { %v4420_v53 = vpop.permute.xlu0 %4419  ;;  %v4262_v25 = vsel %vm1343_vm8, %v4257_v52, %v4259_v47 }
 0x3d0   : > { %v10267_v55 = vpop.permute.xlu1 %4421 }
 0x3d1   : > { %v4418_v61 = vpop.permute.xlu0 %4417  ;;  %8994 = vmatmul.mubr.msk.f32.vlgmr.msra.gmra.mrb[4].mxu0 %vm224_vm2, %v10265_v54  ;;  %v4424_v28 = vsel %vm1507_vm9, %v4420_v53, %v10267_v55  ;;  %v4425_v37 = vsel %vm1507_vm9, %v10267_v55, %v9888_v7 }
 0x3d2   : > { %3950 = vmatpush1.msra.mxu0 %v3940_v60  ;;  %4013 = vmatprep.mubr.f32.mxu0 %v9595_v0 }
 0x3d3   : > { %4110 = vmatprep.subr.mxu0 %v4102_v59 }
 0x3d4   : > { %v3154_v2 = vpop.permute.xlu1 %3153 }
 0x3d5   : > { %v3157_v8 = vsel %vm217_vm1, %v3152_v12, %v3154_v2  ;;  %v3310_v11 = vpop.permute.xlu0 %3309  ;;  %v4101_v12 = vsel %vm1179_vm7, %v4096_v43, %v4098_v41 }
 0x3d6   : > { %v3313_v13 = vsel %vm377_vm3, %v3308_v18, %v3310_v11  ;;  %9274 = vmatpush3.msra.mxu1 %v3157_v8 }
 0x3d7   : > { %9276 = vmatmul.mubr.msk.f32.vlgmr.msra.gmra.mrb[36].mxu1 %vm224_vm2, %v10209_v14  ;;  %9278 = vmatprep.subr.mxu1 %v9595_v0 }
 0x3d8   : > { %9279 = vmatpush3.msra.mxu1 %v3313_v13  ;;  %v3468_v16 = vpop.permute.xlu1 %3467  ;;  %9280 = vmatprep.mubr.msk.f32.mxu1 %vm9604_vm0, %v9595_v0 }
 0x3d9   : > { %v3471_v18 = vsel %vm538_vm4, %v3466_v24, %v3468_v16  ;;  %8997 = vmatmul.mubr.msk.f32.vlgmr.msra.gmra.mrb[4].mxu0 %vm224_vm2, %v10280_v15  ;;  %9283 = vmatprep.subr.mxu1 %v9595_v0  ;;  %v3629_v20 = vpop.permute.xlu0 %3628 }
 0x3da   : > { %4111 = vmatpush1.msra.mxu0 %v4101_v12  ;;  %4174 = vmatprep.mubr.f32.mxu0 %v9595_v0  ;;  %v3632_v24 = vsel %vm702_vm5, %v10227_v30, %v3629_v20  ;;  %v3942_v30 = vsel %vm1015_vm6, %v10234_v34, %v9853_v62  ;;  %v4264_v34 = vsel %vm1343_vm8, %v10254_v48, %v9877_v4 }
 0x3db   : > { %4271 = vmatprep.subr.mxu0 %v4263_v19  ;;  %9281 = vmatmul.mubr.msk.f32.vlgmr.msra.gmra.mrb[38].mxu1 %vm224_vm2, %v10223_v27 }
 0x3dc   : > { %9284 = vmatpush3.msra.mxu1 %v3471_v18  ;;  %9285 = vmatprep.mubr.msk.f32.mxu1 %vm9604_vm0, %v9595_v0 }
 0x3dd   : > { %9288 = vmatprep.subr.mxu1 %v9595_v0 }
 0x3df   : > { %9286 = vmatmul.mubr.msk.f32.vlgmr.msra.gmra.mrb[40].mxu1 %vm224_vm2, %v10239_v36 }
 0x3e0   : > { %9289 = vmatpush3.msra.mxu1 %v3632_v24  ;;  %9290 = vmatprep.mubr.msk.f32.mxu1 %vm9604_vm0, %v9595_v0 }
 0x3e1   : > { %9000 = vmatmul.mubr.msk.f32.vlgmr.msra.gmra.mrb[4].mxu0 %vm224_vm2, %v10303_v21  ;;  %9293 = vmatprep.subr.mxu1 %v9595_v0 }
 0x3e2   : > { %4272 = vmatpush1.msra.mxu0 %v4262_v25  ;;  %4335 = vmatprep.mubr.f32.mxu0 %v9595_v0 }
 0x3e3   : > { %4432 = vmatprep.subr.mxu0 %v4424_v28  ;;  %9291 = vmatmul.mubr.msk.f32.vlgmr.msra.gmra.mrb[42].mxu1 %vm224_vm2, %v10252_v45 }
 0x3e4   : > { %9294 = vmatpush3.msra.mxu1 %v10168_v3  ;;  %9295 = vmatprep.mubr.msk.f32.mxu1 %vm9604_vm0, %v9595_v0  ;;  %v4423_v3 = vsel %vm1507_vm9, %v4418_v61, %v4420_v53 }
 0x3e5   : > { %9298 = vmatprep.subr.mxu1 %v9595_v0 }
 0x3e7   : > { %9296 = vmatmul.mubr.msk.f32.vlgmr.msra.gmra.mrb[44].mxu1 %vm224_vm2, %v10265_v54 }
 0x3e8   : > { %9299 = vmatpush3.msra.mxu1 %v3942_v30  ;;  %9300 = vmatprep.mubr.msk.f32.mxu1 %vm9604_vm0, %v9595_v0 }
 0x3e9   : > { %9003 = vmatmul.mubr.msk.f32.vlgmr.msra.gmra.mrb[4].mxu0 %vm224_vm2, %v10327_v29  ;;  %9303 = vmatprep.subr.mxu1 %v9595_v0  ;;  %v10377_v16 = vpop.permute.xlu1 %4580 }
 0x3ea   : > { %4433 = vmatpush1.msra.mxu0 %v4423_v3  ;;  %4496 = vmatprep.mubr.f32.mxu0 %v9595_v0 }
 0x3eb   : > { %9301 = vmatmul.mubr.msk.f32.vlgmr.msra.gmra.mrb[46].mxu1 %vm224_vm2, %v10280_v15 }
 0x3ec   : > { %9304 = vmatpush3.msra.mxu1 %v4103_v31  ;;  %9305 = vmatprep.mubr.msk.f32.mxu1 %vm9604_vm0, %v9595_v0 }
 0x3ed   : > { %9308 = vmatprep.subr.mxu1 %v9595_v0 }
 0x3ef   : > { %9306 = vmatmul.mubr.msk.f32.vlgmr.msra.gmra.mrb[48].mxu1 %vm224_vm2, %v10303_v21 }
 0x3f0   : > { %9309 = vmatpush3.msra.mxu1 %v4264_v34  ;;  %9310 = vmatprep.mubr.msk.f32.mxu1 %vm9604_vm0, %v9595_v0 }
 0x3f1   : > { %9006 = vmatmul.mubr.msk.f32.vlgmr.msra.gmra.mrb[4].mxu0 %vm224_vm2, %v10352_v33  ;;  %9313 = vmatprep.subr.mxu1 %v9595_v0 }
 0x3f2   : > { %4674 = vmatprep.mubr.f32.mxu0 %v9595_v0 }
 0x3f3   : > { %9311 = vmatmul.mubr.msk.f32.vlgmr.msra.gmra.mrb[50].mxu1 %vm224_vm2, %v10327_v29 }
 0x3f4   : > { %9314 = vmatpush3.msra.mxu1 %v4425_v37  ;;  %9315 = vmatprep.mubr.msk.f32.mxu1 %vm9604_vm0, %v9595_v0 }
 0x3f5   : > { %9318 = vmatprep.subr.mxu1 %v9595_v0 }
 0x3f7   : > { %9316 = vmatmul.mubr.msk.f32.vlgmr.msra.gmra.mrb[52].mxu1 %vm224_vm2, %v10352_v33 }
 0x3f8   : > { %9320 = vmatprep.mubr.msk.f32.mxu1 %vm9604_vm0, %v9595_v0 }
 0x4aa   : > { %v3301_v39 = vpop.f32.mrb[36].mxu1 }
 0x4ab   : > { %v9277_v41 = vpop.f32.mrb[37].mxu1 }
 0x4ae   : > { %v3457_v42 = vpop.f32.mrb[38].mxu1 }
 0x4af   : > { %v3458_v43 = vadd.f32 %v3457_v42, %v3301_v39  ;;  %v9282_v47 = vpop.f32.mrb[39].mxu1 }
 0x4b2   : > { %v3615_v48 = vpop.f32.mrb[40].mxu1 }
 0x4b3   : > { %v3621_v51 = vadd.f32 %v3615_v48, %v3458_v43  ;;  %v9287_v52 = vpop.f32.mrb[41].mxu1 }
 0x4b6   : > { %v3776_v53 = vpop.f32.mrb[42].mxu1 }
 0x4b7   : > { %v3782_v55 = vadd.f32 %v3776_v53, %v3621_v51  ;;  %v9292_v60 = vpop.f32.mrb[43].mxu1 }
 0x4ba   : > { %v3925_v61 = vpop.f32.mrb[44].mxu1 }
 0x4bb   : > { %v3931_v59 = vadd.f32 %v3925_v61, %v3782_v55  ;;  %v9297_v2 = vpop.f32.mrb[45].mxu1 }
 0x4be   : > { %v4086_v8 = vpop.f32.mrb[46].mxu1 }
 0x4bf   : > { %v4092_v11 = vadd.f32 %v4086_v8, %v3931_v59  ;;  %v9302_v13 = vpop.f32.mrb[47].mxu1 }
 0x4c2   : > { %v4247_v12 = vpop.f32.mrb[48].mxu1 }
 0x4c3   : > { %v4253_v18 = vadd.f32 %v4247_v12, %v4092_v11  ;;  %v9307_v19 = vpop.f32.mrb[49].mxu1 }
 0x4c4   : > { %v4498_v20 = vpop.f32.mrb[4].mxu0 }
 0x4c5   : > { %v4583_v24 = vadd.f32 %v10377_v16, %v4498_v20  ;;  %v4500_v25 = vpop.f32.mrb[5].mxu0 }
 0x4c6   : > { %v4584_v28 = vadd.f32 %v10377_v16, %v4500_v25  ;;  %v4408_v30 = vpop.f32.mrb[50].mxu1 }
 0x4c7   : > { %v4586_v3 = vmax.f32 %v4583_v24, 0.0  ;;  %v4414_v31 = vadd.f32 %v4408_v30, %v4253_v18  ;;  %v9312_v34 = vpop.f32.mrb[51].mxu1 }
 0x4c8   : > { %v4587_v37 = vmax.f32 %v4584_v28, 0.0 }
 0x4c9   : > { %v4589_v39 = vmul.f32 %v4586_v3, %v9906_v35 }
 0x4ca   : > { %v4590_v41 = vmul.f32 %v4587_v37, %v9911_v46  ;;  %v4569_v42 = vpop.f32.mrb[52].mxu1 }
 0x4cb   : > { %v10384_v43 = vadd.f32 %v4589_v39, %v9909_v44  ;;  %v4575_v47 = vadd.f32 %v4569_v42, %v4414_v31  ;;  %v9317_v48 = vpop.f32.mrb[53].mxu1 }
 0x4cc   : > { %v10387_v51 = vadd.f32 %v4590_v41, %v9918_v50 }
 0x4cd   : > { %4598 = vrot.lane.b32.xlu0 %v10384_v43, %s9596_s17  ;;  %v4585_v52 = vadd.f32 %v10377_v16, %v4575_v47 }
 0x4ce   : > { %4600 = vrot.lane.b32.xlu1 %v10387_v51, %s9596_s17 }
 0x4cf   : > { %v4588_v44 = vmax.f32 %v4585_v52, 0.0 }
 0x4d1   : > { %4751 = vrot.lane.b32.xlu0 %v10384_v43, %s9597_s22  ;;  %v4591_v50 = vmul.f32 %v4588_v44, %v9932_v57 }
 0x4d2   : > { %4753 = vrot.lane.b32.xlu1 %v10387_v51, %s9597_s22 }
 0x4d3   : > { %v10408_v53 = vadd.f32 %v4591_v50, %v9939_v58 }
 0x4d5   : > { %4904 = vrot.lane.b32.xlu0 %v10384_v43, %s9598_s23 }
 0x4d6   : > { %4906 = vrot.lane.b32.xlu1 %v10387_v51, %s9598_s23 }
 0x4d9   : > { %5060 = vrot.lane.b32.xlu0 %v10384_v43, %s9599_s24 }
 0x4da   : > { %5062 = vrot.lane.b32.xlu1 %v10387_v51, %s9599_s24 }
 0x4dd   : > { %5362 = vrot.lane.b32.xlu0 %v10387_v51, %s9600_s25 }
 0x4de   : > { %5364 = vrot.lane.b32.xlu1 %v10408_v53, %s9600_s25 }
 0x4e1   : > { %5360 = vrot.lane.b32.xlu0 %v10384_v43, %s9600_s25 }
 0x4e2   : > { %5518 = vrot.lane.b32.xlu1 %v10387_v51, %s9601_s26 }
 0x4e5   : > { %5520 = vrot.lane.b32.xlu0 %v10408_v53, %s9601_s26 }
 0x4e6   : > { %5516 = vrot.lane.b32.xlu1 %v10384_v43, %s9601_s26 }
 0x4e9   : > { %5674 = vrot.lane.b32.xlu0 %v10387_v51, %s9602_s27 }
 0x4ea   : > { %5676 = vrot.lane.b32.xlu1 %v10408_v53, %s9602_s27 }
 0x4ed   : > { %5672 = vrot.lane.b32.xlu0 %v10384_v43, %s9602_s27 }
 0x4ee   : > { %5830 = vrot.lane.b32.xlu1 %v10387_v51, %s9603_s28 }
 0x4f1   : > { %5832 = vrot.lane.b32.xlu0 %v10408_v53, %s9603_s28 }
 0x4f2   : > { %5828 = vrot.lane.b32.xlu1 %v10384_v43, %s9603_s28 }
 0x4f5   : > { %4602 = vrot.lane.b32.xlu0 %v10408_v53, %s9596_s17 }
 0x4f6   : > { %4755 = vrot.lane.b32.xlu1 %v10408_v53, %s9597_s22 }
 0x4f9   : > { %4908 = vrot.lane.b32.xlu0 %v10408_v53, %s9598_s23 }
 0x4fa   : > { %5064 = vrot.lane.b32.xlu1 %v10408_v53, %s9599_s24 }
 0x53f   : > { %v4599_v58 = vpop.permute.xlu0 %4598 }
 0x540   : > { %v4601_v55 = vpop.permute.xlu1 %4600  ;;  %v4604_v61 = vsel %vm217_vm1, %v9727_v6, %v4599_v58 }
 0x541   : > { %v4605_v60 = vsel %vm217_vm1, %v4599_v58, %v4601_v55 }
 0x542   : > { %4610 = vmatprep.subr.mxu0 %v4605_v60 }
 0x543   : > { %4611 = vmatpush1.msra.mxu0 %v4604_v61  ;;  %v4752_v59 = vpop.permute.xlu0 %4751 }
 0x544   : > { %v4754_v2 = vpop.permute.xlu1 %4753  ;;  %9009 = vmatmul.mubr.msk.f32.vlgmr.msra.gmra.mrb[6].mxu0 %vm224_vm2, %v9976_v5  ;;  %v4757_v11 = vsel %vm377_vm3, %v9729_v9, %v4752_v59 }
 0x545   : > { %v4758_v8 = vsel %vm377_vm3, %v4752_v59, %v4754_v2  ;;  %4827 = vmatprep.mubr.f32.mxu0 %v9595_v0 }
 0x546   : > { %4763 = vmatprep.subr.mxu0 %v4758_v8 }
 0x547   : > { %4764 = vmatpush1.msra.mxu0 %v4757_v11  ;;  %v4905_v13 = vpop.permute.xlu0 %4904 }
 0x548   : > { %v4907_v12 = vpop.permute.xlu1 %4906  ;;  %v4910_v20 = vsel %vm538_vm4, %v9764_v23, %v4905_v13 }
 0x549   : > { %v4911_v18 = vsel %vm538_vm4, %v4905_v13, %v4907_v12 }
 0x54a   : > { %4916 = vmatprep.subr.mxu0 %v4911_v18 }
 0x54b   : > { %v5061_v19 = vpop.permute.xlu0 %5060 }
 0x54c   : > { %v5063_v24 = vpop.permute.xlu1 %5062  ;;  %9011 = vmatmul.mubr.msk.f32.vlgmr.msra.gmra.mrb[6].mxu0 %vm224_vm2, %v9990_v17  ;;  %v5066_v31 = vsel %vm702_vm5, %v9760_v22, %v5061_v19 }
 0x54d   : > { %4917 = vmatpush1.msra.mxu0 %v4910_v20  ;;  %v5067_v25 = vsel %vm702_vm5, %v5061_v19, %v5063_v24  ;;  %4980 = vmatprep.mubr.f32.mxu0 %v9595_v0 }
 0x54e   : > { %5072 = vmatprep.subr.mxu0 %v5067_v25 }
 0x54f   : > { %v5363_v28 = vpop.permute.xlu0 %5362 }
 0x550   : > { %v10458_v30 = vpop.permute.xlu1 %5364 }
 0x551   : > { %v5367_v47 = vsel %vm1015_vm6, %v5363_v28, %v10458_v30 }
 0x553   : > { %v5361_v3 = vpop.permute.xlu0 %5360 }
 0x554   : > { %v5519_v34 = vpop.permute.xlu1 %5518  ;;  %9013 = vmatmul.mubr.msk.f32.vlgmr.msra.gmra.mrb[6].mxu0 %vm224_vm2, %v10005_v26  ;;  %v5366_v50 = vsel %vm1015_vm6, %v5361_v3, %v5363_v28 }
 0x555   : > { %5073 = vmatpush1.msra.mxu0 %v5066_v31  ;;  %5136 = vmatprep.mubr.f32.mxu0 %v9595_v0 }
 0x556   : > { %5216 = vmatprep.subr.mxu0 %v10387_v51 }
 0x557   : > { %v10466_v37 = vpop.permute.xlu0 %5520 }
 0x558   : > { %v5517_v39 = vpop.permute.xlu1 %5516  ;;  %v5523_v60 = vsel %vm1179_vm7, %v5519_v34, %v10466_v37  ;;  %v5524_v20 = vsel %vm1179_vm7, %v10466_v37, %v9865_v1 }
 0x559   : > { %v5522_v18 = vsel %vm1179_vm7, %v5517_v39, %v5519_v34 }
 0x55b   : > { %v5675_v41 = vpop.permute.xlu0 %5674 }
 0x55c   : > { %v10468_v42 = vpop.permute.xlu1 %5676  ;;  %9015 = vmatmul.mubr.msk.f32.vlgmr.msra.gmra.mrb[6].mxu0 %vm224_vm2, %v10016_v32 }
 0x55d   : > { %5217 = vmatpush1.msra.mxu0 %v10384_v43  ;;  %5280 = vmatprep.mubr.f32.mxu0 %v9595_v0 }
 0x55e   : > { %5372 = vmatprep.subr.mxu0 %v5367_v47 }
 0x55f   : > { %v5673_v48 = vpop.permute.xlu0 %5672 }
 0x560   : > { %v5831_v52 = vpop.permute.xlu1 %5830 }
 0x563   : > { %v10476_v44 = vpop.permute.xlu0 %5832 }
 0x564   : > { %v5829_v58 = vpop.permute.xlu1 %5828  ;;  %9017 = vmatmul.mubr.msk.f32.vlgmr.msra.gmra.mrb[6].mxu0 %vm224_vm2, %v10032_v40 }
 0x565   : > { %5373 = vmatpush1.msra.mxu0 %v5366_v50  ;;  %5436 = vmatprep.mubr.f32.mxu0 %v9595_v0 }
 0x566   : > { %5528 = vmatprep.subr.mxu0 %v5523_v60 }
 0x567   : > { %v4603_v61 = vpop.permute.xlu0 %4602 }
 0x568   : > { %v4606_v59 = vsel %vm217_vm1, %v4601_v55, %v4603_v61  ;;  %v4756_v8 = vpop.permute.xlu1 %4755 }
 0x569   : > { %v4759_v11 = vsel %vm377_vm3, %v4754_v2, %v4756_v8  ;;  %9319 = vmatpush3.msra.mxu1 %v4606_v59 }
 0x56a   : > { %9321 = vmatmul.mubr.msk.f32.vlgmr.msra.gmra.mrb[54].mxu1 %vm224_vm2, %v9976_v5  ;;  %9323 = vmatprep.subr.mxu1 %v9595_v0  ;;  %v5679_v5 = vsel %vm1343_vm8, %v5675_v41, %v10468_v42 }
 0x56b   : > { %9324 = vmatpush3.msra.mxu1 %v4759_v11  ;;  %v4909_v13 = vpop.permute.xlu0 %4908  ;;  %9325 = vmatprep.mubr.msk.f32.mxu1 %vm9604_vm0, %v9595_v0 }
 0x56c   : > { %v4912_v19 = vsel %vm538_vm4, %v4907_v12, %v4909_v13  ;;  %9019 = vmatmul.mubr.msk.f32.vlgmr.msra.gmra.mrb[6].mxu0 %vm224_vm2, %v10049_v49  ;;  %9328 = vmatprep.subr.mxu1 %v9595_v0  ;;  %v5065_v55 = vpop.permute.xlu1 %5064  ;;  %v5678_v12 = vsel %vm1343_vm8, %v5673_v48, %v5675_v41 }
 0x56d   : > { %5529 = vmatpush1.msra.mxu0 %v5522_v18  ;;  %5592 = vmatprep.mubr.f32.mxu0 %v9595_v0  ;;  %v5068_v2 = vsel %vm702_vm5, %v5063_v24, %v5065_v55 }
 0x56e   : > { %5684 = vmatprep.subr.mxu0 %v5679_v5  ;;  %9326 = vmatmul.mubr.msk.f32.vlgmr.msra.gmra.mrb[56].mxu1 %vm224_vm2, %v9990_v17  ;;  %v5835_v17 = vsel %vm1507_vm9, %v5831_v52, %v10476_v44 }
 0x56f   : > { %9329 = vmatpush3.msra.mxu1 %v4912_v19  ;;  %9330 = vmatprep.mubr.msk.f32.mxu1 %vm9604_vm0, %v9595_v0 }
 0x570   : > { %9333 = vmatprep.subr.mxu1 %v9595_v0 }
 0x572   : > { %9331 = vmatmul.mubr.msk.f32.vlgmr.msra.gmra.mrb[58].mxu1 %vm224_vm2, %v10005_v26  ;;  %v5368_v26 = vsel %vm1015_vm6, %v10458_v30, %v9853_v62 }
 0x573   : > { %9334 = vmatpush3.msra.mxu1 %v5068_v2  ;;  %9335 = vmatprep.mubr.msk.f32.mxu1 %vm9604_vm0, %v9595_v0 }
 0x574   : > { %9021 = vmatmul.mubr.msk.f32.vlgmr.msra.gmra.mrb[6].mxu0 %vm224_vm2, %v10073_v56  ;;  %9338 = vmatprep.subr.mxu1 %v9595_v0 }
 0x575   : > { %5685 = vmatpush1.msra.mxu0 %v5678_v12  ;;  %5748 = vmatprep.mubr.f32.mxu0 %v9595_v0 }
 0x576   : > { %5840 = vmatprep.subr.mxu0 %v5835_v17  ;;  %9336 = vmatmul.mubr.msk.f32.vlgmr.msra.gmra.mrb[60].mxu1 %vm224_vm2, %v10016_v32  ;;  %v5834_v32 = vsel %vm1507_vm9, %v5829_v58, %v5831_v52 }
 0x577   : > { %9339 = vmatpush3.msra.mxu1 %v10408_v53  ;;  %9340 = vmatprep.mubr.msk.f32.mxu1 %vm9604_vm0, %v9595_v0 }
 0x578   : > { %9343 = vmatprep.subr.mxu1 %v9595_v0 }
 0x57a   : > { %9341 = vmatmul.mubr.msk.f32.vlgmr.msra.gmra.mrb[62].mxu1 %vm224_vm2, %v10032_v40  ;;  %v5680_v40 = vsel %vm1343_vm8, %v10468_v42, %v9877_v4 }
 0x57b   : > { %9344 = vmatpush3.msra.mxu1 %v5368_v26  ;;  %9345 = vmatprep.mubr.msk.f32.mxu1 %vm9604_vm0, %v9595_v0 }
 0x57c   : > { %9023 = vmatmul.mubr.msk.f32.vlgmr.msra.gmra.mrb[6].mxu0 %vm224_vm2, %v10098_v63  ;;  %9348 = vmatprep.subr.mxu1 %v9595_v0 }
 0x57d   : > { %5841 = vmatpush1.msra.mxu0 %v5834_v32  ;;  %5904 = vmatprep.mubr.f32.mxu0 %v9595_v0 }
 0x57e   : > { %9346 = vmatmul.mubr.msk.f32.vlgmr.msra.gmra.mrb[64].mxu1 %vm224_vm2, %v10049_v49  ;;  %v5836_v49 = vsel %vm1507_vm9, %v10476_v44, %v9888_v7 }
 0x57f   : > { %9349 = vmatpush3.msra.mxu1 %v5524_v20  ;;  %9350 = vmatprep.mubr.msk.f32.mxu1 %vm9604_vm0, %v9595_v0 }
 0x580   : > { %9353 = vmatprep.subr.mxu1 %v9595_v0 }
 0x582   : > { %9351 = vmatmul.mubr.msk.f32.vlgmr.msra.gmra.mrb[66].mxu1 %vm224_vm2, %v10073_v56 }
 0x583   : > { %9354 = vmatpush3.msra.mxu1 %v5680_v40  ;;  %9355 = vmatprep.mubr.msk.f32.mxu1 %vm9604_vm0, %v9595_v0 }
 0x584   : > { %9025 = vmatmul.mubr.msk.f32.vlgmr.msra.gmra.mrb[6].mxu0 %vm224_vm2, %v10123_v10  ;;  %9358 = vmatprep.subr.mxu1 %v9595_v0 }
 0x585   : > { %6072 = vmatprep.mubr.f32.mxu0 %v9595_v0 }
 0x586   : > { %9356 = vmatmul.mubr.msk.f32.vlgmr.msra.gmra.mrb[68].mxu1 %vm224_vm2, %v10098_v63 }
 0x587   : > { %9359 = vmatpush3.msra.mxu1 %v5836_v49  ;;  %9360 = vmatprep.mubr.msk.f32.mxu1 %vm9604_vm0, %v9595_v0 }
 0x588   : > { %9363 = vmatprep.subr.mxu1 %v9595_v0 }
 0x58a   : > { %9361 = vmatmul.mubr.msk.f32.vlgmr.msra.gmra.mrb[70].mxu1 %vm224_vm2, %v10123_v10 }
 0x58b   : > { %9365 = vmatprep.mubr.msk.f32.mxu1 %vm9604_vm0, %v9595_v0 }
 0x63d   : > { %v4747_v56 = vpop.f32.mrb[54].mxu1 }
 0x63e   : > { %v9322_v24 = vpop.f32.mrb[55].mxu1 }
 0x641   : > { %v4900_v25 = vpop.f32.mrb[56].mxu1 }
 0x642   : > { %v4901_v28 = vadd.f32 %v4900_v25, %v4747_v56  ;;  %v9327_v30 = vpop.f32.mrb[57].mxu1 }
 0x645   : > { %v5053_v3 = vpop.f32.mrb[58].mxu1 }
 0x646   : > { %v5059_v31 = vadd.f32 %v5053_v3, %v4901_v28  ;;  %v9332_v63 = vpop.f32.mrb[59].mxu1 }
 0x649   : > { %v5209_v34 = vpop.f32.mrb[60].mxu1 }
 0x64a   : > { %v5215_v37 = vadd.f32 %v5209_v34, %v5059_v31  ;;  %v9337_v39 = vpop.f32.mrb[61].mxu1 }
 0x64d   : > { %v5353_v41 = vpop.f32.mrb[62].mxu1 }
 0x64e   : > { %v5359_v42 = vadd.f32 %v5353_v41, %v5215_v37  ;;  %v9342_v47 = vpop.f32.mrb[63].mxu1 }
 0x651   : > { %v5509_v48 = vpop.f32.mrb[64].mxu1 }
 0x652   : > { %v5515_v52 = vadd.f32 %v5509_v48, %v5359_v42  ;;  %v9347_v10 = vpop.f32.mrb[65].mxu1 }
 0x655   : > { %v5665_v44 = vpop.f32.mrb[66].mxu1 }
 0x656   : > { %v5671_v50 = vadd.f32 %v5665_v44, %v5515_v52  ;;  %v9352_v58 = vpop.f32.mrb[67].mxu1 }
 0x657   : > { %v5906_v60 = vpop.f32.mrb[6].mxu0 }
 0x658   : > { %v5984_v61 = vadd.f32 %v5906_v60, %v10140_v38  ;;  %v5908_v59 = vpop.f32.mrb[7].mxu0 }
 0x659   : > { %v5985_v8 = vadd.f32 %v5908_v59, %v10140_v38  ;;  %v5821_v11 = vpop.f32.mrb[68].mxu1 }
 0x65a   : > { %v5987_v13 = vmax.f32 %v5984_v61, 0.0  ;;  %v5827_v18 = vadd.f32 %v5821_v11, %v5671_v50  ;;  %v9357_v19 = vpop.f32.mrb[69].mxu1 }
 0x65b   : > { %v5988_v5 = vmax.f32 %v5985_v8, 0.0 }
 0x65c   : > { %v10568_v55 = vmul.f32 %v5987_v13, %v9906_v35 }
 0x65d   : > { %v10571_v2 = vmul.f32 %v5988_v5, %v9911_v46  ;;  %v5977_v12 = vpop.f32.mrb[70].mxu1 }
 0x65e   : > { %v5983_v17 = vadd.f32 %v5977_v12, %v5827_v18  ;;  %5996 = vrot.lane.b32.xlu0 %v10568_v55, %s9596_s17  ;;  %v9362_v26 = vpop.f32.mrb[71].mxu1 }
 0x65f   : > { %5998 = vrot.lane.b32.xlu1 %v10571_v2, %s9596_s17 }
 0x660   : > { %v5986_v32 = vadd.f32 %v5983_v17, %v10140_v38 }
 0x662   : > { %6149 = vrot.lane.b32.xlu0 %v10568_v55, %s9597_s22  ;;  %v5989_v20 = vmax.f32 %v5986_v32, 0.0 }
 0x663   : > { %6151 = vrot.lane.b32.xlu1 %v10571_v2, %s9597_s22 }
 0x664   : > { %v10591_v40 = vmul.f32 %v5989_v20, %v9932_v57 }
 0x666   : > { %6302 = vrot.lane.b32.xlu0 %v10568_v55, %s9598_s23 }
 0x667   : > { %6304 = vrot.lane.b32.xlu1 %v10571_v2, %s9598_s23 }
 0x66a   : > { %6458 = vrot.lane.b32.xlu0 %v10568_v55, %s9599_s24 }
 0x66b   : > { %6460 = vrot.lane.b32.xlu1 %v10571_v2, %s9599_s24 }
 0x66e   : > { %6760 = vrot.lane.b32.xlu0 %v10571_v2, %s9600_s25 }
 0x66f   : > { %6762 = vrot.lane.b32.xlu1 %v10591_v40, %s9600_s25 }
 0x672   : > { %6758 = vrot.lane.b32.xlu0 %v10568_v55, %s9600_s25 }
 0x673   : > { %6916 = vrot.lane.b32.xlu1 %v10571_v2, %s9601_s26 }
 0x676   : > { %6918 = vrot.lane.b32.xlu0 %v10591_v40, %s9601_s26 }
 0x677   : > { %6914 = vrot.lane.b32.xlu1 %v10568_v55, %s9601_s26 }
 0x67a   : > { %7072 = vrot.lane.b32.xlu0 %v10571_v2, %s9602_s27 }
 0x67b   : > { %7074 = vrot.lane.b32.xlu1 %v10591_v40, %s9602_s27 }
 0x67e   : > { %7070 = vrot.lane.b32.xlu0 %v10568_v55, %s9602_s27 }
 0x67f   : > { %7228 = vrot.lane.b32.xlu1 %v10571_v2, %s9603_s28 }
 0x682   : > { %7230 = vrot.lane.b32.xlu0 %v10591_v40, %s9603_s28 }
 0x683   : > { %7226 = vrot.lane.b32.xlu1 %v10568_v55, %s9603_s28 }
 0x686   : > { %6000 = vrot.lane.b32.xlu0 %v10591_v40, %s9596_s17 }
 0x687   : > { %6153 = vrot.lane.b32.xlu1 %v10591_v40, %s9597_s22 }
 0x68a   : > { %6306 = vrot.lane.b32.xlu0 %v10591_v40, %s9598_s23 }
 0x68b   : > { %6462 = vrot.lane.b32.xlu1 %v10591_v40, %s9599_s24 }
 0x6d0   : > { %v5997_v38 = vpop.permute.xlu0 %5996 }
 0x6d1   : > { %v5999_v49 = vpop.permute.xlu1 %5998  ;;  %v6002_v24 = vsel %vm217_vm1, %v9727_v6, %v5997_v38 }
 0x6d2   : > { %v6003_v56 = vsel %vm217_vm1, %v5997_v38, %v5999_v49 }
 0x6d3   : > { %6008 = vmatprep.subr.mxu0 %v6003_v56 }
 0x6d4   : > { %6009 = vmatpush1.msra.mxu0 %v6002_v24  ;;  %v6150_v25 = vpop.permute.xlu0 %6149 }
 0x6d5   : > { %v6152_v28 = vpop.permute.xlu1 %6151  ;;  %9027 = vmatmul.mubr.msk.f32.vlgmr.msra.gmra.mrb[8].mxu0 %vm224_vm2, %v10209_v14  ;;  %v6155_v3 = vsel %vm377_vm3, %v9729_v9, %v6150_v25 }
 0x6d6   : > { %v6156_v30 = vsel %vm377_vm3, %v6150_v25, %v6152_v28  ;;  %6225 = vmatprep.mubr.f32.mxu0 %v9595_v0 }
 0x6d7   : > { %6161 = vmatprep.subr.mxu0 %v6156_v30 }
 0x6d8   : > { %6162 = vmatpush1.msra.mxu0 %v6155_v3  ;;  %v6303_v31 = vpop.permute.xlu0 %6302 }
 0x6d9   : > { %v6305_v63 = vpop.permute.xlu1 %6304  ;;  %v6308_v39 = vsel %vm538_vm4, %v9764_v23, %v6303_v31 }
 0x6da   : > { %v6309_v34 = vsel %vm538_vm4, %v6303_v31, %v6305_v63 }
 0x6db   : > { %6314 = vmatprep.subr.mxu0 %v6309_v34 }
 0x6dc   : > { %v6459_v37 = vpop.permute.xlu0 %6458 }
 0x6dd   : > { %v6461_v41 = vpop.permute.xlu1 %6460  ;;  %9029 = vmatmul.mubr.msk.f32.vlgmr.msra.gmra.mrb[8].mxu0 %vm224_vm2, %v10223_v27  ;;  %v6464_v10 = vsel %vm702_vm5, %v9760_v22, %v6459_v37 }
 0x6de   : > { %6315 = vmatpush1.msra.mxu0 %v6308_v39  ;;  %v6465_v42 = vsel %vm702_vm5, %v6459_v37, %v6461_v41  ;;  %6378 = vmatprep.mubr.f32.mxu0 %v9595_v0 }
 0x6df   : > { %6470 = vmatprep.subr.mxu0 %v6465_v42 }
 0x6e0   : > { %v6761_v47 = vpop.permute.xlu0 %6760 }
 0x6e1   : > { %v10641_v48 = vpop.permute.xlu1 %6762 }
 0x6e2   : > { %v6765_v59 = vsel %vm1015_vm6, %v6761_v47, %v10641_v48 }
 0x6e4   : > { %v6759_v52 = vpop.permute.xlu0 %6758 }
 0x6e5   : > { %v6917_v44 = vpop.permute.xlu1 %6916  ;;  %9031 = vmatmul.mubr.msk.f32.vlgmr.msra.gmra.mrb[8].mxu0 %vm224_vm2, %v10239_v36  ;;  %v6764_v18 = vsel %vm1015_vm6, %v6759_v52, %v6761_v47 }
 0x6e6   : > { %6471 = vmatpush1.msra.mxu0 %v6464_v10  ;;  %6534 = vmatprep.mubr.f32.mxu0 %v9595_v0 }
 0x6e7   : > { %6614 = vmatprep.subr.mxu0 %v10571_v2 }
 0x6e8   : > { %v10649_v50 = vpop.permute.xlu0 %6918 }
 0x6e9   : > { %v6915_v58 = vpop.permute.xlu1 %6914  ;;  %v6921_v5 = vsel %vm1179_vm7, %v6917_v44, %v10649_v50 }
 0x6ea   : > { %v6920_v32 = vsel %vm1179_vm7, %v6915_v58, %v6917_v44 }
 0x6ec   : > { %v7073_v60 = vpop.permute.xlu0 %7072 }
 0x6ed   : > { %v10651_v61 = vpop.permute.xlu1 %7074  ;;  %9033 = vmatmul.mubr.msk.f32.vlgmr.msra.gmra.mrb[8].mxu0 %vm224_vm2, %v10252_v45 }
 0x6ee   : > { %6615 = vmatpush1.msra.mxu0 %v10568_v55  ;;  %6678 = vmatprep.mubr.f32.mxu0 %v9595_v0 }
 0x6ef   : > { %6770 = vmatprep.subr.mxu0 %v6765_v59 }
 0x6f0   : > { %v7071_v8 = vpop.permute.xlu0 %7070 }
 0x6f1   : > { %v7229_v11 = vpop.permute.xlu1 %7228  ;;  %v7076_v56 = vsel %vm1343_vm8, %v7071_v8, %v7073_v60 }
 0x6f4   : > { %v10659_v13 = vpop.permute.xlu0 %7230 }
 0x6f5   : > { %v7227_v19 = vpop.permute.xlu1 %7226  ;;  %9035 = vmatmul.mubr.msk.f32.vlgmr.msra.gmra.mrb[8].mxu0 %vm224_vm2, %v10265_v54 }
 0x6f6   : > { %6771 = vmatpush1.msra.mxu0 %v6764_v18  ;;  %6834 = vmatprep.mubr.f32.mxu0 %v9595_v0 }
 0x6f7   : > { %6926 = vmatprep.subr.mxu0 %v6921_v5 }
 0x6f8   : > { %v6001_v55 = vpop.permute.xlu0 %6000 }
 0x6f9   : > { %v6004_v2 = vsel %vm217_vm1, %v5999_v49, %v6001_v55  ;;  %v6154_v12 = vpop.permute.xlu1 %6153 }
 0x6fa   : > { %v6157_v17 = vsel %vm377_vm3, %v6152_v28, %v6154_v12  ;;  %9364 = vmatpush3.msra.mxu1 %v6004_v2 }
 0x6fb   : > { %9366 = vmatmul.mubr.msk.f32.vlgmr.msra.gmra.mrb[72].mxu1 %vm224_vm2, %v10209_v14  ;;  %9368 = vmatprep.subr.mxu1 %v9595_v0  ;;  %v7077_v14 = vsel %vm1343_vm8, %v7073_v60, %v10651_v61 }
 0x6fc   : > { %9369 = vmatpush3.msra.mxu1 %v6157_v17  ;;  %v6307_v26 = vpop.permute.xlu0 %6306  ;;  %9370 = vmatprep.mubr.msk.f32.mxu1 %vm9604_vm0, %v9595_v0 }
 0x6fd   : > { %v6310_v20 = vsel %vm538_vm4, %v6305_v63, %v6307_v26  ;;  %9037 = vmatmul.mubr.msk.f32.vlgmr.msra.gmra.mrb[8].mxu0 %vm224_vm2, %v10280_v15  ;;  %9373 = vmatprep.subr.mxu1 %v9595_v0  ;;  %v6463_v38 = vpop.permute.xlu1 %6462 }
 0x6fe   : > { %6927 = vmatpush1.msra.mxu0 %v6920_v32  ;;  %6990 = vmatprep.mubr.f32.mxu0 %v9595_v0  ;;  %v6466_v49 = vsel %vm702_vm5, %v6461_v41, %v6463_v38 }
 0x6ff   : > { %7082 = vmatprep.subr.mxu0 %v7077_v14  ;;  %9371 = vmatmul.mubr.msk.f32.vlgmr.msra.gmra.mrb[74].mxu1 %vm224_vm2, %v10223_v27  ;;  %v7233_v27 = vsel %vm1507_vm9, %v7229_v11, %v10659_v13 }
 0x700   : > { %9374 = vmatpush3.msra.mxu1 %v6310_v20  ;;  %9375 = vmatprep.mubr.msk.f32.mxu1 %vm9604_vm0, %v9595_v0  ;;  %v9046_v20 = vld [vmem:[%s10937_s1 + $0xe0] sm:$0xff] }
 0x701   : > { %9378 = vmatprep.subr.mxu1 %v9595_v0 }
 0x703   : > { %9376 = vmatmul.mubr.msk.f32.vlgmr.msra.gmra.mrb[76].mxu1 %vm224_vm2, %v10239_v36  ;;  %v6766_v36 = vsel %vm1015_vm6, %v10641_v48, %v9853_v62 }
 0x704   : > { %9379 = vmatpush3.msra.mxu1 %v6466_v49  ;;  %9380 = vmatprep.mubr.msk.f32.mxu1 %vm9604_vm0, %v9595_v0 }
 0x705   : > { %9039 = vmatmul.mubr.msk.f32.vlgmr.msra.gmra.mrb[8].mxu0 %vm224_vm2, %v10303_v21  ;;  %9383 = vmatprep.subr.mxu1 %v9595_v0 }
 0x706   : > { %7083 = vmatpush1.msra.mxu0 %v7076_v56  ;;  %7146 = vmatprep.mubr.f32.mxu0 %v9595_v0 }
 0x707   : > { %7238 = vmatprep.subr.mxu0 %v7233_v27  ;;  %9381 = vmatmul.mubr.msk.f32.vlgmr.msra.gmra.mrb[78].mxu1 %vm224_vm2, %v10252_v45  ;;  %v7232_v45 = vsel %vm1507_vm9, %v7227_v19, %v7229_v11 }
 0x708   : > { %9384 = vmatpush3.msra.mxu1 %v10591_v40  ;;  %9385 = vmatprep.mubr.msk.f32.mxu1 %vm9604_vm0, %v9595_v0  ;;  %v6922_v40 = vsel %vm1179_vm7, %v10649_v50, %v9865_v1 }
 0x709   : > { %9388 = vmatprep.subr.mxu1 %v9595_v0 }
 0x70b   : > { %9386 = vmatmul.mubr.msk.f32.vlgmr.msra.gmra.mrb[80].mxu1 %vm224_vm2, %v10265_v54  ;;  %v7078_v54 = vsel %vm1343_vm8, %v10651_v61, %v9877_v4 }
 0x70c   : > { %9389 = vmatpush3.msra.mxu1 %v6766_v36  ;;  %9390 = vmatprep.mubr.msk.f32.mxu1 %vm9604_vm0, %v9595_v0 }
 0x70d   : > { %9041 = vmatmul.mubr.msk.f32.vlgmr.msra.gmra.mrb[8].mxu0 %vm224_vm2, %v10327_v29  ;;  %9393 = vmatprep.subr.mxu1 %v9595_v0 }
 0x70e   : > { %7239 = vmatpush1.msra.mxu0 %v7232_v45  ;;  %7302 = vmatprep.mubr.f32.mxu0 %v9595_v0 }
 0x70f   : > { %9391 = vmatmul.mubr.msk.f32.vlgmr.msra.gmra.mrb[82].mxu1 %vm224_vm2, %v10280_v15  ;;  %v7234_v15 = vsel %vm1507_vm9, %v10659_v13, %v9888_v7 }
 0x710   : > { %9394 = vmatpush3.msra.mxu1 %v6922_v40  ;;  %9395 = vmatprep.mubr.msk.f32.mxu1 %vm9604_vm0, %v9595_v0 }
 0x711   : > { %9398 = vmatprep.subr.mxu1 %v9595_v0 }
 0x713   : > { %9396 = vmatmul.mubr.msk.f32.vlgmr.msra.gmra.mrb[84].mxu1 %vm224_vm2, %v10303_v21 }
 0x714   : > { %9399 = vmatpush3.msra.mxu1 %v7078_v54  ;;  %9400 = vmatprep.mubr.msk.f32.mxu1 %vm9604_vm0, %v9595_v0 }
 0x715   : > { %9043 = vmatmul.mubr.msk.f32.vlgmr.msra.gmra.mrb[8].mxu0 %vm224_vm2, %v10352_v33  ;;  %9403 = vmatprep.subr.mxu1 %v9595_v0 }
 0x716   : > { %7480 = vmatprep.mubr.f32.mxu0 %v9595_v0 }
 0x717   : > { %9401 = vmatmul.mubr.msk.f32.vlgmr.msra.gmra.mrb[86].mxu1 %vm224_vm2, %v10327_v29 }
 0x718   : > { %9404 = vmatpush3.msra.mxu1 %v7234_v15  ;;  %9405 = vmatprep.mubr.msk.f32.mxu1 %vm9604_vm0, %v9595_v0 }
 0x719   : > { %9408 = vmatprep.subr.mxu1 %v9595_v0 }
 0x71b   : > { %9406 = vmatmul.mubr.msk.f32.vlgmr.msra.gmra.mrb[88].mxu1 %vm224_vm2, %v10352_v33 }
 0x71c   : > { %9410 = vmatprep.mubr.msk.f32.mxu1 %vm9604_vm0, %v9595_v0 }
 0x7ce   : > { %v6145_v21 = vpop.f32.mrb[72].mxu1 }
 0x7cf   : > { %v9367_v24 = vpop.f32.mrb[73].mxu1 }
 0x7d2   : > { %v6298_v25 = vpop.f32.mrb[74].mxu1 }
 0x7d3   : > { %v6299_v28 = vadd.f32 %v6298_v25, %v6145_v21  ;;  %v9372_v30 = vpop.f32.mrb[75].mxu1 }
 0x7d6   : > { %v6451_v3 = vpop.f32.mrb[76].mxu1 }
 0x7d7   : > { %v6457_v31 = vadd.f32 %v6451_v3, %v6299_v28  ;;  %v9377_v29 = vpop.f32.mrb[77].mxu1 }
 0x7da   : > { %v6607_v63 = vpop.f32.mrb[78].mxu1 }
 0x7db   : > { %v6613_v34 = vadd.f32 %v6607_v63, %v6457_v31  ;;  %v9382_v37 = vpop.f32.mrb[79].mxu1 }
 0x7de   : > { %v6751_v39 = vpop.f32.mrb[80].mxu1 }
 0x7df   : > { %v6757_v41 = vadd.f32 %v6751_v39, %v6613_v34  ;;  %v9387_v42 = vpop.f32.mrb[81].mxu1 }
 0x7e2   : > { %v6907_v47 = vpop.f32.mrb[82].mxu1 }
 0x7e3   : > { %v6913_v48 = vadd.f32 %v6907_v47, %v6757_v41  ;;  %v9392_v33 = vpop.f32.mrb[83].mxu1 }
 0x7e4   : > { %v9057_v33 = vld [vmem:[%s10937_s1 + $0xf8] sm:$0xff] }
 0x7e6   : > { %v7063_v52 = vpop.f32.mrb[84].mxu1 }
 0x7e7   : > { %v7069_v10 = vadd.f32 %v7063_v52, %v6913_v48  ;;  %v9397_v44 = vpop.f32.mrb[85].mxu1 }
 0x7e8   : > { %v7304_v50 = vpop.f32.mrb[8].mxu0 }
 0x7e9   : > { %v7382_v58 = vadd.f32 %v7304_v50, %v10377_v16  ;;  %v7306_v60 = vpop.f32.mrb[9].mxu0 }
 0x7ea   : > { %v7383_v61 = vadd.f32 %v7306_v60, %v10377_v16  ;;  %v7219_v59 = vpop.f32.mrb[86].mxu1 }
 0x7eb   : > { %v7385_v8 = vmax.f32 %v7382_v58, 0.0  ;;  %v7225_v11 = vadd.f32 %v7219_v59, %v7069_v10  ;;  %v9402_v13 = vpop.f32.mrb[87].mxu1  ;;  %v9060_v58 = vld [vmem:[%s10937_s1 + $0x100] sm:$0xff] }
 0x7ec   : > { %v7386_v18 = vmax.f32 %v7383_v61, 0.0 }
 0x7ed   : > { %v7388_v19 = vmul.f32 %v7385_v8, %v9906_v35  ;;  %v9063_v8 = vld [vmem:[%s10937_s1 + $0x108] sm:$0xff] }
 0x7ee   : > { %v7389_v5 = vmul.f32 %v7386_v18, %v9911_v46  ;;  %v7375_v55 = vpop.f32.mrb[88].mxu1  ;;  %v9066_v18 = vld [vmem:[%s10937_s1 + $0x110] sm:$0xff] }
 0x7ef   : > { %v10753_v2 = vadd.f32 %v7388_v19, %v10384_v43  ;;  %v7381_v12 = vadd.f32 %v7375_v55, %v7225_v11  ;;  %v9407_v17 = vpop.f32.mrb[89].mxu1 }
 0x7f0   : > { %v10756_v26 = vadd.f32 %v7389_v5, %v10387_v51  ;;  %v9069_v5 = vld [vmem:[%s10937_s1 + $0x118] sm:$0xff] }
 0x7f1   : > { %7401 = vrot.lane.b32.xlu0 %v10753_v2, %s9596_s17  ;;  %v7384_v32 = vadd.f32 %v7381_v12, %v10377_v16 }
 0x7f2   : > { %7403 = vrot.lane.b32.xlu1 %v10756_v26, %s9596_s17 }
 0x7f3   : > { %v7387_v35 = vmax.f32 %v7384_v32, 0.0 }
 0x7f5   : > { %7557 = vrot.lane.b32.xlu0 %v10753_v2, %s9597_s22  ;;  %v7390_v46 = vmul.f32 %v7387_v35, %v9932_v57  ;;  %v9072_v57 = vld [vmem:[%s10938_s2 + $0x18] sm:$0xff] }
 0x7f6   : > { %7559 = vrot.lane.b32.xlu1 %v10756_v26, %s9597_s22 }
 0x7f7   : > { %v10777_v16 = vadd.f32 %v7390_v46, %v10408_v53 }
 0x7f9   : > { %7715 = vrot.lane.b32.xlu0 %v10753_v2, %s9598_s23 }
 0x7fa   : > { %7717 = vrot.lane.b32.xlu1 %v10756_v26, %s9598_s23 }
 0x7fd   : > { %7876 = vrot.lane.b32.xlu0 %v10753_v2, %s9599_s24 }
 0x7fe   : > { %7878 = vrot.lane.b32.xlu1 %v10756_v26, %s9599_s24 }
 0x801   : > { %7405 = vrot.lane.b32.xlu0 %v10777_v16, %s9596_s17  ;;  %s197_s17 = scalar_lea.vmem %s10940_s4, %s9550_s20 }
 0x802   : > { %7561 = vrot.lane.b32.xlu1 %v10777_v16, %s9597_s22 }
 0x805   : > { %8186 = vrot.lane.b32.xlu0 %v10753_v2, %s9600_s25 }
 0x806   : > { %8190 = vrot.lane.b32.xlu1 %v10777_v16, %s9600_s25 }
 0x809   : > { %8188 = vrot.lane.b32.xlu0 %v10756_v26, %s9600_s25 }
 0x80a   : > { %7719 = vrot.lane.b32.xlu1 %v10777_v16, %s9598_s23 }
 0x80d   : > { %7880 = vrot.lane.b32.xlu0 %v10777_v16, %s9599_s24 }
 0x80e   : > { %8349 = vrot.lane.b32.xlu1 %v10756_v26, %s9601_s26 }
 0x811   : > { %8351 = vrot.lane.b32.xlu0 %v10777_v16, %s9601_s26 }
 0x812   : > { %8347 = vrot.lane.b32.xlu1 %v10753_v2, %s9601_s26 }
 0x815   : > { %8510 = vrot.lane.b32.xlu0 %v10756_v26, %s9602_s27 }
 0x816   : > { %8512 = vrot.lane.b32.xlu1 %v10777_v16, %s9602_s27 }
 0x819   : > { %8508 = vrot.lane.b32.xlu0 %v10753_v2, %s9602_s27 }
 0x81a   : > { %8671 = vrot.lane.b32.xlu1 %v10756_v26, %s9603_s28 }
 0x81d   : > { %8673 = vrot.lane.b32.xlu0 %v10777_v16, %s9603_s28 }
 0x81e   : > { %8669 = vrot.lane.b32.xlu1 %v10753_v2, %s9603_s28 }
 0x821   : > { %8832 = vperm.xlu0 %9570, %v9072_v57  }
 0x863   : > { %v7402_v43 = vpop.permute.xlu0 %7401 }
 0x864   : > { %v7404_v51 = vpop.permute.xlu1 %7403  ;;  %v7407_v14 = vsel %vm217_vm1, %v9727_v6, %v7402_v43  ;;  %v9045_v6 = vld [vmem:[%s10937_s1 + $0xd8] sm:$0xff] }
 0x865   : > { %v7408_v53 = vsel %vm217_vm1, %v7402_v43, %v7404_v51 }
 0x866   : > { %7416 = vmatprep.subr.mxu0 %v7408_v53 }
 0x867   : > { %7417 = vmatpush1.msra.mxu0 %v7407_v14  ;;  %v7558_v38 = vpop.permute.xlu0 %7557 }
 0x868   : > { %v7560_v49 = vpop.permute.xlu1 %7559  ;;  %9047 = vmatmul.mubr.msk.f32.vlgmr.msra.gmra.mrb[10].mxu0 %vm224_vm2, %v9046_v20  ;;  %v7563_v27 = vsel %vm377_vm3, %v9729_v9, %v7558_v38 }
 0x869   : > { %v7564_v56 = vsel %vm377_vm3, %v7558_v38, %v7560_v49  ;;  %7636 = vmatprep.mubr.f32.mxu0 %v9595_v0 }
 0x86a   : > { %7572 = vmatprep.subr.mxu0 %v7564_v56 }
 0x86b   : > { %7573 = vmatpush1.msra.mxu0 %v7563_v27  ;;  %v7716_v36 = vpop.permute.xlu0 %7715 }
 0x86c   : > { %v7718_v45 = vpop.permute.xlu1 %7717  ;;  %v7721_v15 = vsel %vm538_vm4, %v9764_v23, %v7716_v36  ;;  %v9051_v23 = vld [vmem:[%s10937_s1 + $0xe8] sm:$0xff] }
 0x86d   : > { %v7722_v40 = vsel %vm538_vm4, %v7716_v36, %v7718_v45 }
 0x86e   : > { %7730 = vmatprep.subr.mxu0 %v7722_v40 }
 0x86f   : > { %v7877_v54 = vpop.permute.xlu0 %7876 }
 0x870   : > { %v7879_v21 = vpop.permute.xlu1 %7878  ;;  %9049 = vmatmul.mubr.msk.f32.vlgmr.msra.gmra.mrb[10].mxu0 %vm224_vm2, %v9045_v6  ;;  %v7882_v31 = vsel %vm702_vm5, %v9760_v22, %v7877_v54  ;;  %v9054_v22 = vld [vmem:[%s10937_s1 + $0xf0] sm:$0xff] }
 0x871   : > { %7731 = vmatpush1.msra.mxu0 %v7721_v15  ;;  %v7883_v9 = vsel %vm702_vm5, %v7877_v54, %v7879_v21  ;;  %7794 = vmatprep.mubr.f32.mxu0 %v9595_v0 }
 0x872   : > { %7891 = vmatprep.subr.mxu0 %v7883_v9 }
 0x873   : > { %v7406_v24 = vpop.permute.xlu0 %7405 }
 0x874   : > { %v7409_v25 = vsel %vm217_vm1, %v7404_v51, %v7406_v24  ;;  %v7562_v28 = vpop.permute.xlu1 %7561 }
 0x875   : > { %v7565_v30 = vsel %vm377_vm3, %v7560_v49, %v7562_v28  ;;  %9409 = vmatpush3.msra.mxu1 %v7409_v25 }
 0x876   : > { %9413 = vmatprep.subr.mxu1 %v9595_v0  ;;  %9411 = vmatmul.mubr.msk.f32.vlgmr.msra.gmra.mrb[90].mxu1 %vm224_vm2, %v9046_v20 }
 0x877   : > { %9414 = vmatpush3.msra.mxu1 %v7565_v30  ;;  %v8187_v3 = vpop.permute.xlu0 %8186  ;;  %9415 = vmatprep.mubr.msk.f32.mxu1 %vm9604_vm0, %v9595_v0 }
 0x878   : > { %v8191_v29 = vpop.permute.xlu1 %8190  ;;  %9052 = vmatmul.mubr.msk.f32.vlgmr.msra.gmra.mrb[10].mxu0 %vm224_vm2, %v9051_v23  ;;  %9418 = vmatprep.subr.mxu1 %v9595_v0 }
 0x879   : > { %7892 = vmatpush1.msra.mxu0 %v7882_v31  ;;  %7955 = vmatprep.mubr.f32.mxu0 %v9595_v0  ;;  %v8194_v10 = vsel %vm1015_vm6, %v8191_v29, %v9853_v62 }
 0x87a   : > { %8040 = vmatprep.subr.mxu0 %v10756_v26  ;;  %9416 = vmatmul.mubr.msk.f32.vlgmr.msra.gmra.mrb[92].mxu1 %vm224_vm2, %v9045_v6 }
 0x87b   : > { %v8189_v63 = vpop.permute.xlu0 %8188  ;;  %9420 = vmatprep.mubr.msk.f32.mxu1 %vm9604_vm0, %v9595_v0 }
 0x87c   : > { %v7720_v34 = vpop.permute.xlu1 %7719  ;;  %v8193_v47 = vsel %vm1015_vm6, %v8189_v63, %v8191_v29  ;;  %v8192_v50 = vsel %vm1015_vm6, %v8187_v3, %v8189_v63 }
 0x87d   : > { %v7723_v37 = vsel %vm538_vm4, %v7718_v45, %v7720_v34 }
 0x87e   : > { %9419 = vmatpush3.msra.mxu1 %v7723_v37 }
 0x87f   : > { %9421 = vmatmul.mubr.msk.f32.vlgmr.msra.gmra.mrb[94].mxu1 %vm224_vm2, %v9051_v23  ;;  %v7881_v39 = vpop.permute.xlu0 %7880  ;;  %9423 = vmatprep.subr.mxu1 %v9595_v0 }
 0x880   : > { %v7884_v41 = vsel %vm702_vm5, %v7879_v21, %v7881_v39  ;;  %v8350_v42 = vpop.permute.xlu1 %8349  ;;  %9055 = vmatmul.mubr.msk.f32.vlgmr.msra.gmra.mrb[10].mxu0 %vm224_vm2, %v9054_v22  ;;  %9425 = vmatprep.mubr.msk.f32.mxu1 %vm9604_vm0, %v9595_v0 }
 0x881   : > { %8041 = vmatpush1.msra.mxu0 %v10753_v2  ;;  %9424 = vmatpush3.msra.mxu1 %v7884_v41 }
 0x882   : > { %8201 = vmatprep.subr.mxu0 %v8193_v47  ;;  %9428 = vmatprep.subr.mxu1 %v9595_v0 }
 0x883   : > { %9426 = vmatmul.mubr.msk.f32.vlgmr.msra.gmra.mrb[96].mxu1 %vm224_vm2, %v9054_v22  ;;  %v8352_v48 = vpop.permute.xlu0 %8351  ;;  %8104 = vmatprep.mubr.f32.mxu0 %v9595_v0 }
 0x884   : > { %9429 = vmatpush3.msra.mxu1 %v10777_v16  ;;  %9430 = vmatprep.mubr.msk.f32.mxu1 %vm9604_vm0, %v9595_v0  ;;  %v8348_v52 = vpop.permute.xlu1 %8347  ;;  %v8354_v60 = vsel %vm1179_vm7, %v8350_v42, %v8352_v48  ;;  %v8355_v62 = vsel %vm1179_vm7, %v8352_v48, %v9865_v1 }
 0x885   : > { %9433 = vmatprep.subr.mxu1 %v9595_v0  ;;  %v8353_v1 = vsel %vm1179_vm7, %v8348_v52, %v8350_v42 }
 0x887   : > { %9431 = vmatmul.mubr.msk.f32.vlgmr.msra.gmra.mrb[98].mxu1 %vm224_vm2, %v9057_v33  ;;  %v8511_v44 = vpop.permute.xlu0 %8510 }
 0x888   : > { %9434 = vmatpush3.msra.mxu1 %v8194_v10  ;;  %9058 = vmatmul.mubr.msk.f32.vlgmr.msra.gmra.mrb[10].mxu0 %vm224_vm2, %v9057_v33  ;;  %v8513_v59 = vpop.permute.xlu1 %8512  ;;  %v9584_v33 = vld [vmem:[%s9649_s21 + $0x10] sm:$0xff] }
 0x889   : > { %8202 = vmatpush1.msra.mxu0 %v8192_v50  ;;  %9435 = vmatprep.mubr.msk.f32.mxu1 %vm9604_vm0, %v9595_v0  ;;  %v8516_v11 = vsel %vm1343_vm8, %v8513_v59, %v9877_v4  ;;  %v8515_v19 = vsel %vm1343_vm8, %v8511_v44, %v8513_v59 }
 0x88a   : > { %8362 = vmatprep.subr.mxu0 %v8354_v60  ;;  %9438 = vmatprep.subr.mxu1 %v9595_v0 }
 0x88b   : > { %9436 = vmatmul.mubr.msk.f32.vlgmr.msra.gmra.mrb[100].mxu1 %vm224_vm2, %v9060_v58  ;;  %v8509_v61 = vpop.permute.xlu0 %8508  ;;  %8265 = vmatprep.mubr.f32.mxu0 %v9595_v0 }
 0x88c   : > { %9439 = vmatpush3.msra.mxu1 %v8355_v62  ;;  %9440 = vmatprep.mubr.msk.f32.mxu1 %vm9604_vm0, %v9595_v0  ;;  %v8672_v55 = vpop.permute.xlu1 %8671  ;;  %v8514_v2 = vsel %vm1343_vm8, %v8509_v61, %v8511_v44  ;;  %v9585_v61 = vld [vmem:[%s9649_s21] sm:$0xff] }
 0x88d   : > { %9443 = vmatprep.subr.mxu1 %v9595_v0 }
 0x88f   : > { %9441 = vmatmul.mubr.msk.f32.vlgmr.msra.gmra.mrb[102].mxu1 %vm224_vm2, %v9063_v8  ;;  %v8674_v13 = vpop.permute.xlu0 %8673 }
 0x890   : > { %9444 = vmatpush3.msra.mxu1 %v8516_v11  ;;  %9061 = vmatmul.mubr.msk.f32.vlgmr.msra.gmra.mrb[10].mxu0 %vm224_vm2, %v9060_v58  ;;  %v8677_v4 = vsel %vm1507_vm9, %v8674_v13, %v9888_v7  ;;  %v8676_v7 = vsel %vm1507_vm9, %v8672_v55, %v8674_v13  ;;  %v8670_v12 = vpop.permute.xlu1 %8669 }
 0x891   : > { %8363 = vmatpush1.msra.mxu0 %v8353_v1  ;;  %9445 = vmatprep.mubr.msk.f32.mxu1 %vm9604_vm0, %v9595_v0  ;;  %v8675_v17 = vsel %vm1507_vm9, %v8670_v12, %v8672_v55 }
 0x892   : > { %8523 = vmatprep.subr.mxu0 %v8515_v19  ;;  %9448 = vmatprep.subr.mxu1 %v9595_v0 }
 0x893   : > { %9446 = vmatmul.mubr.msk.f32.vlgmr.msra.gmra.mrb[104].mxu1 %vm224_vm2, %v9066_v18  ;;  %8426 = vmatprep.mubr.f32.mxu0 %v9595_v0 }
 0x894   : > { %9449 = vmatpush3.msra.mxu1 %v8677_v4  ;;  %9450 = vmatprep.mubr.msk.f32.mxu1 %vm9604_vm0, %v9595_v0 }
 0x897   : > { %9451 = vmatmul.mubr.msk.f32.vlgmr.msra.gmra.mrb[106].mxu1 %vm224_vm2, %v9069_v5 }
 0x898   : > { %9064 = vmatmul.mubr.msk.f32.vlgmr.msra.gmra.mrb[10].mxu0 %vm224_vm2, %v9063_v8  ;;  %v9586_v8 = vld [vmem:[%s9649_s21 + $0x8] sm:$0xff] }
 0x899   : > { %8524 = vmatpush1.msra.mxu0 %v8514_v2  ;;  %8587 = vmatprep.mubr.f32.mxu0 %v9595_v0 }
 0x89a   : > { %8684 = vmatprep.subr.mxu0 %v8676_v7 }
 0x8a0   : > { %9067 = vmatmul.mubr.msk.f32.vlgmr.msra.gmra.mrb[10].mxu0 %vm224_vm2, %v9066_v18  ;;  %v8833_v28 = vpop.permute.xlu0 %8832 }
 0x8a1   : > { %8685 = vmatpush1.msra.mxu0 %v8675_v17  ;;  %8748 = vmatprep.mubr.f32.mxu0 %v9595_v0 }
 0x8a8   : > { %9070 = vmatmul.mubr.msk.f32.vlgmr.msra.gmra.mrb[10].mxu0 %vm224_vm2, %v9069_v5 }
 0x949   : > { %v7553_v26 = vpop.f32.mrb[90].mxu1 }
 0x94a   : > { %v9412_v32 = vpop.f32.mrb[91].mxu1 }
 0x94d   : > { %v7709_v35 = vpop.f32.mrb[92].mxu1 }
 0x94e   : > { %v7710_v46 = vadd.f32 %v7709_v35, %v7553_v26  ;;  %v9417_v16 = vpop.f32.mrb[93].mxu1 }
 0x952   : > { %v7867_v57 = vpop.f32.mrb[94].mxu1 }
 0x953   : > { %v7873_v43 = vadd.f32 %v7867_v57, %v7710_v46  ;;  %v9422_v51 = vpop.f32.mrb[95].mxu1 }
 0x956   : > { %v8028_v53 = vpop.f32.mrb[96].mxu1 }
 0x957   : > { %v8034_v20 = vadd.f32 %v8028_v53, %v7873_v43  ;;  %v9427_v14 = vpop.f32.mrb[97].mxu1 }
 0x95a   : > { %v8177_v38 = vpop.f32.mrb[98].mxu1 }
 0x95b   : > { %v8183_v49 = vadd.f32 %v8177_v38, %v8034_v20  ;;  %v9432_v56 = vpop.f32.mrb[99].mxu1 }
 0x95e   : > { %v8338_v27 = vpop.f32.mrb[100].mxu1 }
 0x95f   : > { %v8344_v36 = vadd.f32 %v8338_v27, %v8183_v49  ;;  %v9437_v45 = vpop.f32.mrb[101].mxu1 }
 0x962   : > { %v8499_v0 = vpop.f32.mrb[102].mxu1 }
 0x963   : > { %v8505_v40 = vadd.f32 %v8499_v0, %v8344_v36  ;;  %v9442_v6 = vpop.f32.mrb[103].mxu1 }
 0x966   : > { %v8660_v54 = vpop.f32.mrb[104].mxu1 }
 0x967   : > { %v8666_v15 = vadd.f32 %v8660_v54, %v8505_v40  ;;  %v9447_v21 = vpop.f32.mrb[105].mxu1 }
 0x96a   : > { %v8821_v9 = vpop.f32.mrb[106].mxu1 }
 0x96b   : > { %v8827_v24 = vadd.f32 %v8821_v9, %v8666_v15  ;;  %v9452_v25 = vpop.f32.mrb[107].mxu1 }
 0x96d   : > { %v8837_v30 = vadd.f32 %v8833_v28, %v8827_v24 }
 0x96f   : > { %v8840_v23 = vsub.f32 0.0, %v8837_v30 }
 0x971   : > { %v8845_v3 = vmul.f32 1.442695, %v8840_v23 }
 0x973   : > { %9572 = vpow2.f32 %v8845_v3 }
 0x97b   : > { %v8750_v31 = vpop.f32.mrb[10].mxu0 }
 0x97c   : > { %v8835_v29 = vadd.f32 %v8833_v28, %v8750_v31  ;;  %v8752_v63 = vpop.f32.mrb[11].mxu0 }
 0x97d   : > { %v9573_v34 = vpop.eup %9572  ;;  %v8836_v37 = vadd.f32 %v8833_v28, %v8752_v63 }
 0x97e   : > { %v8849_v22 = vadd.f32 1.0, %v9573_v34  ;;  %v8838_v39 = vsub.f32 0.0, %v8835_v29 }
 0x97f   : > { %v8839_v41 = vsub.f32 0.0, %v8836_v37 }
 0x980   : > { %9574 = vrcp.f32 %v8849_v22  ;;  %v8841_v42 = vmul.f32 1.442695, %v8838_v39 }
 0x981   : > { %v8843_v47 = vmul.f32 1.442695, %v8839_v41 }
 0x982   : > { %9576 = vpow2.f32 %v8841_v42 }
 0x983   : > { %9578 = vpow2.f32 %v8843_v47 }
 0x98a   : > { %v9575_v48 = vpop.eup %9574 }
 0x98b   : > { %v8858_v52 = vsub.f32 %v9584_v33, %v9575_v48 }
 0x98c   : > { %v9577_v10 = vpop.eup %9576 }
 0x98d   : > { %v9579_v44 = vpop.eup %9578  ;;  %8864 = vst [vmem:[%s197_s17 + $0x8] sm:$0x7] %v8858_v52  ;;  %v8847_v50 = vadd.f32 1.0, %v9577_v10 }
 0x98e   : > { %v8848_v58 = vadd.f32 1.0, %v9579_v44 }
 0x98f   : > { %9580 = vrcp.f32 %v8847_v50 }
 0x990   : > { %9582 = vrcp.f32 %v8848_v58 }
 0x999   : > { %v9581_v60 = vpop.eup %9580 }
 0x99a   : > { %v9583_v62 = vpop.eup %9582  ;;  %v8856_v59 = vsub.f32 %v9585_v61, %v9581_v60 }
 0x99b   : > { %v8857_v11 = vsub.f32 %v9586_v8, %v9583_v62 }
 0x99d   : > { %v8861_v1 = vcombine.low %v8856_v59, %v8857_v11 }
 0x99f   : > { %8863 = vst [vmem:[%s197_s17] sm:$0x77] %v8861_v1 }
 0x9a0 PF: > { %s14_s15 = sadd.s32 1, %s9593_s15  }
 0x9a1   : > { %p11_p4 = scmp.ge.s32.totalorder %s14_s15, 4  }
 0x9a3   :  { %13 = sbr.rel (!%p11_p4) target bundleno = 1 (0x1), region = 104 }

</bundles_post_ra>
